<compile_context>
chip_gen: v5e
topology: v5e:2x2
jax: 0.10.0
libtpu: 0.0.40
codegen_flags: <defaults>
</compile_context>

<pallas_src>
import math

import jax
import jax.numpy as jnp
from jax.experimental import pallas as pl
from jax.experimental.pallas import tpu as pltpu


def _shallownet_kernel(x_ref, w1_ref, b1_ref, w2_ref, b2_ref, m_ref, bfc_ref, o_ref):
    # Per grid step:
    #   x_ref  : (C, TB, T)     channel-leading batch tile
    #   w1_ref : (I, K)         temporal conv weights
    #   b1_ref : (I, 1)
    #   w2_ref : (O, I*C)       spatial conv weights, column f = i*C + c
    #   b2_ref : (O, 1)
    #   m_ref  : (O, Tc, NCp)   fused (avg-pool x linear) weights, lane-padded
    #   bfc_ref: (1, NCp)
    #   o_ref  : (TB, NCp)
    C, TB, T = x_ref.shape
    I, K = w1_ref.shape
    O = w2_ref.shape[0]
    Tc = m_ref.shape[1]

    w1 = w1_ref[...]                           # (I, K)
    b1 = b1_ref[...][:, :, None]               # (I, 1, 1)
    w2 = w2_ref[...]                           # (O, I*C)
    b2 = b2_ref[...][:, :, None]               # (O, 1, 1)

    # ---- temporal conv (Conv2d(1,I,(1,K)) + ReLU) streamed per EEG channel,
    #      immediately consumed by the spatial conv (Conv2d(I,O,(C,1))) ----
    acc2 = jnp.zeros((O, TB, Tc), jnp.float32)
    for c in range(C):
        x_c = x_ref[c]                         # (TB, T)
        acc1 = jnp.zeros((I, TB, Tc), jnp.float32)
        for k in range(K):                     # small-K VPU broadcast-MACs
            acc1 = acc1 + w1[:, k:k + 1][:, :, None] * x_c[None, :, k:k + Tc]
        h1_c = jnp.maximum(acc1 + b1, 0.0)     # (I, TB, Tc)
        for i in range(I):                     # channel-c contribution to spatial conv
            f = i * C + c
            acc2 = acc2 + w2[:, f:f + 1][:, :, None] * h1_c[i][None, :, :]
    out2 = jnp.maximum(acc2 + b2, 0.0)         # (O, TB, Tc)

    # ---- fused AvgPool2d((1,P), stride 5) + Linear: O accumulated MXU matmuls ----
    # TODO(synk): nn.Dropout omitted (identity in eval mode).
    acc3 = jnp.zeros(o_ref.shape, jnp.float32)  # (TB, NCp)
    for o in range(O):
        acc3 = acc3 + jnp.dot(out2[o], m_ref[o],
                              preferred_element_type=jnp.float32)
    o_ref[...] = (acc3 + bfc_ref[...]).astype(o_ref.dtype)


def shallownet_forward(x, w1_4d, b1, w2_4d, b2, wfc, bfc, *,
                       pool_size, pool_stride=5, batch_tile=None):
    """x: (B, C, T); w1_4d: (O,1,1,K); w2_4d: (O,O,C,1); wfc: (NC, O*n_pool)."""
    x = jnp.asarray(x, jnp.float32)
    B, C, T = x.shape
    O = w1_4d.shape[0]
    K = w1_4d.shape[-1]
    Tc = T - K + 1
    n_pool = (Tc - pool_size) // pool_stride + 1
    NC, F = wfc.shape
    assert F == O * n_pool, (F, O, n_pool)
    assert w2_4d.shape == (O, O, C, 1)

    # ---- host-side one-time parameter repacking ----
    w1 = w1_4d.reshape(O, K).astype(jnp.float32)
    b1_2 = b1.reshape(O, 1).astype(jnp.float32)
    w2 = w2_4d.reshape(O, O * C).astype(jnp.float32)         # col f = i*C + c
    b2_2 = b2.reshape(O, 1).astype(jnp.float32)

    # AvgPool as a matmul, fused into the classifier: M[o, t, n]
    t_idx = jnp.arange(Tc)[:, None]
    p_idx = jnp.arange(n_pool)[None, :]
    in_win = (t_idx >= p_idx * pool_stride) & (t_idx < p_idx * pool_stride + pool_size)
    pool_mat = in_win.astype(jnp.float32) / pool_size         # (Tc, n_pool)
    wfc3 = wfc.reshape(NC, O, n_pool).astype(jnp.float32)     # flatten order (o, p)
    m = jnp.einsum('tp,nop->otn', pool_mat, wfc3)             # (O, Tc, NC)

    # Lane-dense classifier output: pad classes up to a multiple of 128.
    NCp = ((NC + 127) // 128) * 128
    m_pad = jnp.zeros((O, Tc, NCp), jnp.float32).at[:, :, :NC].set(m)
    bfc_pad = jnp.zeros((1, NCp), jnp.float32).at[0, :NC].set(bfc.astype(jnp.float32))

    # ---- batch tiling (multiple of 8 sublanes) ----
    if batch_tile is None:
        batch_tile = min(1024, ((B + 7) // 8) * 8)
    TB = batch_tile
    assert TB % 8 == 0
    B_pad = ((B + TB - 1) // TB) * TB
    x_t = jnp.transpose(x, (1, 0, 2))                         # (C, B, T), channel leading
    if B_pad != B:
        x_t = jnp.pad(x_t, ((0, 0), (0, B_pad - B), (0, 0)))
    grid = (B_pad // TB,)

    def resident(shape):                                      # weights: same block every step
        return pl.BlockSpec(shape, lambda i, _s=shape: tuple(0 for _ in _s))

    out = pl.pallas_call(
        _shallownet_kernel,
        out_shape=jax.ShapeDtypeStruct((B_pad, NCp), jnp.float32),
        grid=grid,
        in_specs=[
            pl.BlockSpec((C, TB, T), lambda i: (0, i, 0)),    # x, batch-tiled
            resident((O, K)),
            resident((O, 1)),
            resident((O, O * C)),
            resident((O, 1)),
            resident((O, Tc, NCp)),
            resident((1, NCp)),
        ],
        out_specs=pl.BlockSpec((TB, NCp), lambda i: (i, 0)),
        compiler_params=pltpu.CompilerParams(
            dimension_semantics=("parallel",)),               # batch axis -> both TCs on v7x
    )(x_t, w1, b1_2, w2, b2_2, m_pad, bfc_pad)

    return out[:B, :NC]


def _reference(x, w1_4d, b1, w2_4d, b2, pool_size, pool_stride, wfc, bfc):
    """Pure-JAX reference matching the PyTorch module (eval mode)."""
    dn = ('NCHW', 'OIHW', 'NCHW')
    h = jax.lax.conv_general_dilated(x[:, None, :, :], w1_4d, (1, 1), 'VALID',
                                     dimension_numbers=dn)
    h = jax.nn.relu(h + b1.reshape(1, -1, 1, 1))
    h = jax.lax.conv_general_dilated(h, w2_4d, (1, 1), 'VALID',
                                     dimension_numbers=dn)
    h = jax.nn.relu(h + b2.reshape(1, -1, 1, 1))              # (B, O, 1, Tc)
    Tc = h.shape[-1]
    n_pool = (Tc - pool_size) // pool_stride + 1
    pooled = jnp.stack(
        [h[..., p * pool_stride:p * pool_stride + pool_size].mean(axis=-1)
         for p in range(n_pool)], axis=-1)                    # (B, O, 1, n_pool)
    feat = pooled.reshape(pooled.shape[0], -1)
    return feat @ wfc.T + bfc


if __name__ == "__main__":
    # ShallowNet defaults: n_channels=2, n_conv_chs=8, n_classes=5; small sfreq/time.
    B, C, SFREQ = 12, 2, 16
    O, NC = 8, 5
    T = 64                                     # short window at 16 Hz (small test)
    K = math.ceil(0.5 * SFREQ)                 # time_conv_size = 8
    P = math.ceil(0.25 * SFREQ)                # avg_pool_size  = 4
    STRIDE = 5
    Tc = T - K + 1
    n_pool = (Tc - P) // STRIDE + 1
    F = O * n_pool

    key = jax.random.PRNGKey(0)
    ks = jax.random.split(key, 7)
    x = jax.random.normal(ks[0], (B, C, T), dtype=jnp.float32)
    w1_4d = jax.random.normal(ks[1], (O, 1, 1, K), dtype=jnp.float32) * 0.1
    b1 = jax.random.normal(ks[2], (O,), dtype=jnp.float32) * 0.1
    w2_4d = jax.random.normal(ks[3], (O, O, C, 1), dtype=jnp.float32) * 0.1
    b2 = jax.random.normal(ks[4], (O,), dtype=jnp.float32) * 0.1
    # TODO(synk): real module hard-codes nn.Linear(6840, n_classes); here the FC
    # input size is derived from the actual conv/pool output so small shapes work.
    wfc = jax.random.normal(ks[5], (NC, F), dtype=jnp.float32) * 0.1
    bfc = jax.random.normal(ks[6], (NC,), dtype=jnp.float32) * 0.1

    out = shallownet_forward(x, w1_4d, b1, w2_4d, b2, wfc, bfc,
                             pool_size=P, pool_stride=STRIDE, batch_tile=8)
    out = jax.block_until_ready(out)

    ref = _reference(x, w1_4d, b1, w2_4d, b2, P, STRIDE, wfc, bfc)
    assert out.shape == (B, NC), out.shape
    err = float(jnp.max(jnp.abs(out - ref)))
    assert jnp.allclose(out, ref, atol=1e-4, rtol=1e-4), f"max err {err}"

    print("KERNEL_OK")
</pallas_src>

<mosaic_0001>
module attributes {stable_mosaic.version = 11 : i64} {
  func.func @_shallownet_kernel(%arg0: i32, %arg1: memref<2x8x64xf32, #tpu.memory_space<vmem>>, %arg2: memref<8x8xf32, #tpu.memory_space<vmem>>, %arg3: memref<8x1xf32, #tpu.memory_space<vmem>>, %arg4: memref<8x16xf32, #tpu.memory_space<vmem>>, %arg5: memref<8x1xf32, #tpu.memory_space<vmem>>, %arg6: memref<8x57x128xf32, #tpu.memory_space<vmem>>, %arg7: memref<1x128xf32, #tpu.memory_space<vmem>>, %arg8: memref<8x128xf32, #tpu.memory_space<vmem>>) attributes {dimension_semantics = [#tpu.dimension_semantics<parallel>], iteration_bounds = array<i64: 2>, scalar_prefetch = 0 : i64, scratch_operands = 0 : i64, tpu.core_type = #tpu.core_type<tc>, window_params = [{transform_indices = @transform_0, window_bounds = array<i64: 2, 8, 64>}, {pipeline_mode = #tpu.pipeline_mode<synchronous>, transform_indices = @transform_1, window_bounds = array<i64: 8, 8>}, {pipeline_mode = #tpu.pipeline_mode<synchronous>, transform_indices = @transform_2, window_bounds = array<i64: 8, 1>}, {pipeline_mode = #tpu.pipeline_mode<synchronous>, transform_indices = @transform_3, window_bounds = array<i64: 8, 16>}, {pipeline_mode = #tpu.pipeline_mode<synchronous>, transform_indices = @transform_4, window_bounds = array<i64: 8, 1>}, {pipeline_mode = #tpu.pipeline_mode<synchronous>, transform_indices = @transform_5, window_bounds = array<i64: 8, 57, 128>}, {pipeline_mode = #tpu.pipeline_mode<synchronous>, transform_indices = @transform_6, window_bounds = array<i64: 1, 128>}, {transform_indices = @transform_7, window_bounds = array<i64: 8, 128>}]} {
    %c0 = arith.constant 0 : index
    %c0_0 = arith.constant 0 : index
    %0 = vector.load %arg2[%c0, %c0_0] : memref<8x8xf32, #tpu.memory_space<vmem>>, vector<8x8xf32>
    %c0_1 = arith.constant 0 : index
    %c0_2 = arith.constant 0 : index
    %1 = vector.load %arg3[%c0_1, %c0_2] : memref<8x1xf32, #tpu.memory_space<vmem>>, vector<8x1xf32>
    %2 = vector.shape_cast %1 : vector<8x1xf32> to vector<8x1x1xf32>
    %c0_3 = arith.constant 0 : index
    %c0_4 = arith.constant 0 : index
    %3 = vector.load %arg4[%c0_3, %c0_4] : memref<8x16xf32, #tpu.memory_space<vmem>>, vector<8x16xf32>
    %c0_5 = arith.constant 0 : index
    %c0_6 = arith.constant 0 : index
    %4 = vector.load %arg5[%c0_5, %c0_6] : memref<8x1xf32, #tpu.memory_space<vmem>>, vector<8x1xf32>
    %5 = vector.shape_cast %4 : vector<8x1xf32> to vector<8x1x1xf32>
    %cst = arith.constant 0.000000e+00 : f32
    %6 = vector.broadcast %cst : f32 to vector<8x8x57xf32>
    %c0_7 = arith.constant 0 : index
    %c0_8 = arith.constant 0 : index
    %c0_9 = arith.constant 0 : index
    %7 = vector.load %arg1[%c0_7, %c0_8, %c0_9] : memref<2x8x64xf32, #tpu.memory_space<vmem>>, vector<1x8x64xf32>
    %8 = vector.shape_cast %7 : vector<1x8x64xf32> to vector<8x64xf32>
    %cst_10 = arith.constant 0.000000e+00 : f32
    %9 = vector.broadcast %cst_10 : f32 to vector<8x8x57xf32>
    %10 = vector.extract_strided_slice %0 {offsets = [0, 0], sizes = [8, 1], strides = [1, 1]} : vector<8x8xf32> to vector<8x1xf32>
    %11 = vector.shape_cast %10 : vector<8x1xf32> to vector<8x1x1xf32>
    %12 = vector.extract_strided_slice %8 {offsets = [0, 0], sizes = [8, 57], strides = [1, 1]} : vector<8x64xf32> to vector<8x57xf32>
    %13 = vector.shape_cast %12 : vector<8x57xf32> to vector<1x8x57xf32>
    %14 = vector.broadcast %11 : vector<8x1x1xf32> to vector<8x8x57xf32>
    %15 = vector.broadcast %13 : vector<1x8x57xf32> to vector<8x8x57xf32>
    %16 = arith.mulf %14, %15 : vector<8x8x57xf32>
    %17 = arith.addf %9, %16 : vector<8x8x57xf32>
    %18 = vector.extract_strided_slice %0 {offsets = [0, 1], sizes = [8, 1], strides = [1, 1]} : vector<8x8xf32> to vector<8x1xf32>
    %19 = vector.shape_cast %18 : vector<8x1xf32> to vector<8x1x1xf32>
    %20 = vector.extract_strided_slice %8 {offsets = [0, 1], sizes = [8, 57], strides = [1, 1]} : vector<8x64xf32> to vector<8x57xf32>
    %21 = vector.shape_cast %20 : vector<8x57xf32> to vector<1x8x57xf32>
    %22 = vector.broadcast %19 : vector<8x1x1xf32> to vector<8x8x57xf32>
    %23 = vector.broadcast %21 : vector<1x8x57xf32> to vector<8x8x57xf32>
    %24 = arith.mulf %22, %23 : vector<8x8x57xf32>
    %25 = arith.addf %17, %24 : vector<8x8x57xf32>
    %26 = vector.extract_strided_slice %0 {offsets = [0, 2], sizes = [8, 1], strides = [1, 1]} : vector<8x8xf32> to vector<8x1xf32>
    %27 = vector.shape_cast %26 : vector<8x1xf32> to vector<8x1x1xf32>
    %28 = vector.extract_strided_slice %8 {offsets = [0, 2], sizes = [8, 57], strides = [1, 1]} : vector<8x64xf32> to vector<8x57xf32>
    %29 = vector.shape_cast %28 : vector<8x57xf32> to vector<1x8x57xf32>
    %30 = vector.broadcast %27 : vector<8x1x1xf32> to vector<8x8x57xf32>
    %31 = vector.broadcast %29 : vector<1x8x57xf32> to vector<8x8x57xf32>
    %32 = arith.mulf %30, %31 : vector<8x8x57xf32>
    %33 = arith.addf %25, %32 : vector<8x8x57xf32>
    %34 = vector.extract_strided_slice %0 {offsets = [0, 3], sizes = [8, 1], strides = [1, 1]} : vector<8x8xf32> to vector<8x1xf32>
    %35 = vector.shape_cast %34 : vector<8x1xf32> to vector<8x1x1xf32>
    %36 = vector.extract_strided_slice %8 {offsets = [0, 3], sizes = [8, 57], strides = [1, 1]} : vector<8x64xf32> to vector<8x57xf32>
    %37 = vector.shape_cast %36 : vector<8x57xf32> to vector<1x8x57xf32>
    %38 = vector.broadcast %35 : vector<8x1x1xf32> to vector<8x8x57xf32>
    %39 = vector.broadcast %37 : vector<1x8x57xf32> to vector<8x8x57xf32>
    %40 = arith.mulf %38, %39 : vector<8x8x57xf32>
    %41 = arith.addf %33, %40 : vector<8x8x57xf32>
    %42 = vector.extract_strided_slice %0 {offsets = [0, 4], sizes = [8, 1], strides = [1, 1]} : vector<8x8xf32> to vector<8x1xf32>
    %43 = vector.shape_cast %42 : vector<8x1xf32> to vector<8x1x1xf32>
    %44 = vector.extract_strided_slice %8 {offsets = [0, 4], sizes = [8, 57], strides = [1, 1]} : vector<8x64xf32> to vector<8x57xf32>
    %45 = vector.shape_cast %44 : vector<8x57xf32> to vector<1x8x57xf32>
    %46 = vector.broadcast %43 : vector<8x1x1xf32> to vector<8x8x57xf32>
    %47 = vector.broadcast %45 : vector<1x8x57xf32> to vector<8x8x57xf32>
    %48 = arith.mulf %46, %47 : vector<8x8x57xf32>
    %49 = arith.addf %41, %48 : vector<8x8x57xf32>
    %50 = vector.extract_strided_slice %0 {offsets = [0, 5], sizes = [8, 1], strides = [1, 1]} : vector<8x8xf32> to vector<8x1xf32>
    %51 = vector.shape_cast %50 : vector<8x1xf32> to vector<8x1x1xf32>
    %52 = vector.extract_strided_slice %8 {offsets = [0, 5], sizes = [8, 57], strides = [1, 1]} : vector<8x64xf32> to vector<8x57xf32>
    %53 = vector.shape_cast %52 : vector<8x57xf32> to vector<1x8x57xf32>
    %54 = vector.broadcast %51 : vector<8x1x1xf32> to vector<8x8x57xf32>
    %55 = vector.broadcast %53 : vector<1x8x57xf32> to vector<8x8x57xf32>
    %56 = arith.mulf %54, %55 : vector<8x8x57xf32>
    %57 = arith.addf %49, %56 : vector<8x8x57xf32>
    %58 = vector.extract_strided_slice %0 {offsets = [0, 6], sizes = [8, 1], strides = [1, 1]} : vector<8x8xf32> to vector<8x1xf32>
    %59 = vector.shape_cast %58 : vector<8x1xf32> to vector<8x1x1xf32>
    %60 = vector.extract_strided_slice %8 {offsets = [0, 6], sizes = [8, 57], strides = [1, 1]} : vector<8x64xf32> to vector<8x57xf32>
    %61 = vector.shape_cast %60 : vector<8x57xf32> to vector<1x8x57xf32>
    %62 = vector.broadcast %59 : vector<8x1x1xf32> to vector<8x8x57xf32>
    %63 = vector.broadcast %61 : vector<1x8x57xf32> to vector<8x8x57xf32>
    %64 = arith.mulf %62, %63 : vector<8x8x57xf32>
    %65 = arith.addf %57, %64 : vector<8x8x57xf32>
    %66 = vector.extract_strided_slice %0 {offsets = [0, 7], sizes = [8, 1], strides = [1, 1]} : vector<8x8xf32> to vector<8x1xf32>
    %67 = vector.shape_cast %66 : vector<8x1xf32> to vector<8x1x1xf32>
    %68 = vector.extract_strided_slice %8 {offsets = [0, 7], sizes = [8, 57], strides = [1, 1]} : vector<8x64xf32> to vector<8x57xf32>
    %69 = vector.shape_cast %68 : vector<8x57xf32> to vector<1x8x57xf32>
    %70 = vector.broadcast %67 : vector<8x1x1xf32> to vector<8x8x57xf32>
    %71 = vector.broadcast %69 : vector<1x8x57xf32> to vector<8x8x57xf32>
    %72 = arith.mulf %70, %71 : vector<8x8x57xf32>
    %73 = arith.addf %65, %72 : vector<8x8x57xf32>
    %74 = vector.broadcast %2 : vector<8x1x1xf32> to vector<8x8x57xf32>
    %75 = arith.addf %73, %74 : vector<8x8x57xf32>
    %cst_11 = arith.constant 0.000000e+00 : f32
    %76 = vector.broadcast %cst_11 : f32 to vector<8x8x57xf32>
    %77 = arith.maximumf %75, %76 : vector<8x8x57xf32>
    %78 = vector.extract_strided_slice %3 {offsets = [0, 0], sizes = [8, 1], strides = [1, 1]} : vector<8x16xf32> to vector<8x1xf32>
    %79 = vector.shape_cast %78 : vector<8x1xf32> to vector<8x1x1xf32>
    %80 = vector.extract_strided_slice %77 {offsets = [0, 0, 0], sizes = [1, 8, 57], strides = [1, 1, 1]} : vector<8x8x57xf32> to vector<1x8x57xf32>
    %81 = vector.shape_cast %80 : vector<1x8x57xf32> to vector<8x57xf32>
    %82 = vector.shape_cast %81 : vector<8x57xf32> to vector<1x8x57xf32>
    %83 = vector.broadcast %79 : vector<8x1x1xf32> to vector<8x8x57xf32>
    %84 = vector.broadcast %82 : vector<1x8x57xf32> to vector<8x8x57xf32>
    %85 = arith.mulf %83, %84 : vector<8x8x57xf32>
    %86 = arith.addf %6, %85 : vector<8x8x57xf32>
    %87 = vector.extract_strided_slice %3 {offsets = [0, 2], sizes = [8, 1], strides = [1, 1]} : vector<8x16xf32> to vector<8x1xf32>
    %88 = vector.shape_cast %87 : vector<8x1xf32> to vector<8x1x1xf32>
    %89 = vector.extract_strided_slice %77 {offsets = [1, 0, 0], sizes = [1, 8, 57], strides = [1, 1, 1]} : vector<8x8x57xf32> to vector<1x8x57xf32>
    %90 = vector.shape_cast %89 : vector<1x8x57xf32> to vector<8x57xf32>
    %91 = vector.shape_cast %90 : vector<8x57xf32> to vector<1x8x57xf32>
    %92 = vector.broadcast %88 : vector<8x1x1xf32> to vector<8x8x57xf32>
    %93 = vector.broadcast %91 : vector<1x8x57xf32> to vector<8x8x57xf32>
    %94 = arith.mulf %92, %93 : vector<8x8x57xf32>
    %95 = arith.addf %86, %94 : vector<8x8x57xf32>
    %96 = vector.extract_strided_slice %3 {offsets = [0, 4], sizes = [8, 1], strides = [1, 1]} : vector<8x16xf32> to vector<8x1xf32>
    %97 = vector.shape_cast %96 : vector<8x1xf32> to vector<8x1x1xf32>
    %98 = vector.extract_strided_slice %77 {offsets = [2, 0, 0], sizes = [1, 8, 57], strides = [1, 1, 1]} : vector<8x8x57xf32> to vector<1x8x57xf32>
    %99 = vector.shape_cast %98 : vector<1x8x57xf32> to vector<8x57xf32>
    %100 = vector.shape_cast %99 : vector<8x57xf32> to vector<1x8x57xf32>
    %101 = vector.broadcast %97 : vector<8x1x1xf32> to vector<8x8x57xf32>
    %102 = vector.broadcast %100 : vector<1x8x57xf32> to vector<8x8x57xf32>
    %103 = arith.mulf %101, %102 : vector<8x8x57xf32>
    %104 = arith.addf %95, %103 : vector<8x8x57xf32>
    %105 = vector.extract_strided_slice %3 {offsets = [0, 6], sizes = [8, 1], strides = [1, 1]} : vector<8x16xf32> to vector<8x1xf32>
    %106 = vector.shape_cast %105 : vector<8x1xf32> to vector<8x1x1xf32>
    %107 = vector.extract_strided_slice %77 {offsets = [3, 0, 0], sizes = [1, 8, 57], strides = [1, 1, 1]} : vector<8x8x57xf32> to vector<1x8x57xf32>
    %108 = vector.shape_cast %107 : vector<1x8x57xf32> to vector<8x57xf32>
    %109 = vector.shape_cast %108 : vector<8x57xf32> to vector<1x8x57xf32>
    %110 = vector.broadcast %106 : vector<8x1x1xf32> to vector<8x8x57xf32>
    %111 = vector.broadcast %109 : vector<1x8x57xf32> to vector<8x8x57xf32>
    %112 = arith.mulf %110, %111 : vector<8x8x57xf32>
    %113 = arith.addf %104, %112 : vector<8x8x57xf32>
    %114 = vector.extract_strided_slice %3 {offsets = [0, 8], sizes = [8, 1], strides = [1, 1]} : vector<8x16xf32> to vector<8x1xf32>
    %115 = vector.shape_cast %114 : vector<8x1xf32> to vector<8x1x1xf32>
    %116 = vector.extract_strided_slice %77 {offsets = [4, 0, 0], sizes = [1, 8, 57], strides = [1, 1, 1]} : vector<8x8x57xf32> to vector<1x8x57xf32>
    %117 = vector.shape_cast %116 : vector<1x8x57xf32> to vector<8x57xf32>
    %118 = vector.shape_cast %117 : vector<8x57xf32> to vector<1x8x57xf32>
    %119 = vector.broadcast %115 : vector<8x1x1xf32> to vector<8x8x57xf32>
    %120 = vector.broadcast %118 : vector<1x8x57xf32> to vector<8x8x57xf32>
    %121 = arith.mulf %119, %120 : vector<8x8x57xf32>
    %122 = arith.addf %113, %121 : vector<8x8x57xf32>
    %123 = vector.extract_strided_slice %3 {offsets = [0, 10], sizes = [8, 1], strides = [1, 1]} : vector<8x16xf32> to vector<8x1xf32>
    %124 = vector.shape_cast %123 : vector<8x1xf32> to vector<8x1x1xf32>
    %125 = vector.extract_strided_slice %77 {offsets = [5, 0, 0], sizes = [1, 8, 57], strides = [1, 1, 1]} : vector<8x8x57xf32> to vector<1x8x57xf32>
    %126 = vector.shape_cast %125 : vector<1x8x57xf32> to vector<8x57xf32>
    %127 = vector.shape_cast %126 : vector<8x57xf32> to vector<1x8x57xf32>
    %128 = vector.broadcast %124 : vector<8x1x1xf32> to vector<8x8x57xf32>
    %129 = vector.broadcast %127 : vector<1x8x57xf32> to vector<8x8x57xf32>
    %130 = arith.mulf %128, %129 : vector<8x8x57xf32>
    %131 = arith.addf %122, %130 : vector<8x8x57xf32>
    %132 = vector.extract_strided_slice %3 {offsets = [0, 12], sizes = [8, 1], strides = [1, 1]} : vector<8x16xf32> to vector<8x1xf32>
    %133 = vector.shape_cast %132 : vector<8x1xf32> to vector<8x1x1xf32>
    %134 = vector.extract_strided_slice %77 {offsets = [6, 0, 0], sizes = [1, 8, 57], strides = [1, 1, 1]} : vector<8x8x57xf32> to vector<1x8x57xf32>
    %135 = vector.shape_cast %134 : vector<1x8x57xf32> to vector<8x57xf32>
    %136 = vector.shape_cast %135 : vector<8x57xf32> to vector<1x8x57xf32>
    %137 = vector.broadcast %133 : vector<8x1x1xf32> to vector<8x8x57xf32>
    %138 = vector.broadcast %136 : vector<1x8x57xf32> to vector<8x8x57xf32>
    %139 = arith.mulf %137, %138 : vector<8x8x57xf32>
    %140 = arith.addf %131, %139 : vector<8x8x57xf32>
    %141 = vector.extract_strided_slice %3 {offsets = [0, 14], sizes = [8, 1], strides = [1, 1]} : vector<8x16xf32> to vector<8x1xf32>
    %142 = vector.shape_cast %141 : vector<8x1xf32> to vector<8x1x1xf32>
    %143 = vector.extract_strided_slice %77 {offsets = [7, 0, 0], sizes = [1, 8, 57], strides = [1, 1, 1]} : vector<8x8x57xf32> to vector<1x8x57xf32>
    %144 = vector.shape_cast %143 : vector<1x8x57xf32> to vector<8x57xf32>
    %145 = vector.shape_cast %144 : vector<8x57xf32> to vector<1x8x57xf32>
    %146 = vector.broadcast %142 : vector<8x1x1xf32> to vector<8x8x57xf32>
    %147 = vector.broadcast %145 : vector<1x8x57xf32> to vector<8x8x57xf32>
    %148 = arith.mulf %146, %147 : vector<8x8x57xf32>
    %149 = arith.addf %140, %148 : vector<8x8x57xf32>
    %c1 = arith.constant 1 : index
    %c0_12 = arith.constant 0 : index
    %c0_13 = arith.constant 0 : index
    %150 = vector.load %arg1[%c1, %c0_12, %c0_13] : memref<2x8x64xf32, #tpu.memory_space<vmem>>, vector<1x8x64xf32>
    %151 = vector.shape_cast %150 : vector<1x8x64xf32> to vector<8x64xf32>
    %cst_14 = arith.constant 0.000000e+00 : f32
    %152 = vector.broadcast %cst_14 : f32 to vector<8x8x57xf32>
    %153 = vector.extract_strided_slice %0 {offsets = [0, 0], sizes = [8, 1], strides = [1, 1]} : vector<8x8xf32> to vector<8x1xf32>
    %154 = vector.shape_cast %153 : vector<8x1xf32> to vector<8x1x1xf32>
    %155 = vector.extract_strided_slice %151 {offsets = [0, 0], sizes = [8, 57], strides = [1, 1]} : vector<8x64xf32> to vector<8x57xf32>
    %156 = vector.shape_cast %155 : vector<8x57xf32> to vector<1x8x57xf32>
    %157 = vector.broadcast %154 : vector<8x1x1xf32> to vector<8x8x57xf32>
    %158 = vector.broadcast %156 : vector<1x8x57xf32> to vector<8x8x57xf32>
    %159 = arith.mulf %157, %158 : vector<8x8x57xf32>
    %160 = arith.addf %152, %159 : vector<8x8x57xf32>
    %161 = vector.extract_strided_slice %0 {offsets = [0, 1], sizes = [8, 1], strides = [1, 1]} : vector<8x8xf32> to vector<8x1xf32>
    %162 = vector.shape_cast %161 : vector<8x1xf32> to vector<8x1x1xf32>
    %163 = vector.extract_strided_slice %151 {offsets = [0, 1], sizes = [8, 57], strides = [1, 1]} : vector<8x64xf32> to vector<8x57xf32>
    %164 = vector.shape_cast %163 : vector<8x57xf32> to vector<1x8x57xf32>
    %165 = vector.broadcast %162 : vector<8x1x1xf32> to vector<8x8x57xf32>
    %166 = vector.broadcast %164 : vector<1x8x57xf32> to vector<8x8x57xf32>
    %167 = arith.mulf %165, %166 : vector<8x8x57xf32>
    %168 = arith.addf %160, %167 : vector<8x8x57xf32>
    %169 = vector.extract_strided_slice %0 {offsets = [0, 2], sizes = [8, 1], strides = [1, 1]} : vector<8x8xf32> to vector<8x1xf32>
    %170 = vector.shape_cast %169 : vector<8x1xf32> to vector<8x1x1xf32>
    %171 = vector.extract_strided_slice %151 {offsets = [0, 2], sizes = [8, 57], strides = [1, 1]} : vector<8x64xf32> to vector<8x57xf32>
    %172 = vector.shape_cast %171 : vector<8x57xf32> to vector<1x8x57xf32>
    %173 = vector.broadcast %170 : vector<8x1x1xf32> to vector<8x8x57xf32>
    %174 = vector.broadcast %172 : vector<1x8x57xf32> to vector<8x8x57xf32>
    %175 = arith.mulf %173, %174 : vector<8x8x57xf32>
    %176 = arith.addf %168, %175 : vector<8x8x57xf32>
    %177 = vector.extract_strided_slice %0 {offsets = [0, 3], sizes = [8, 1], strides = [1, 1]} : vector<8x8xf32> to vector<8x1xf32>
    %178 = vector.shape_cast %177 : vector<8x1xf32> to vector<8x1x1xf32>
    %179 = vector.extract_strided_slice %151 {offsets = [0, 3], sizes = [8, 57], strides = [1, 1]} : vector<8x64xf32> to vector<8x57xf32>
    %180 = vector.shape_cast %179 : vector<8x57xf32> to vector<1x8x57xf32>
    %181 = vector.broadcast %178 : vector<8x1x1xf32> to vector<8x8x57xf32>
    %182 = vector.broadcast %180 : vector<1x8x57xf32> to vector<8x8x57xf32>
    %183 = arith.mulf %181, %182 : vector<8x8x57xf32>
    %184 = arith.addf %176, %183 : vector<8x8x57xf32>
    %185 = vector.extract_strided_slice %0 {offsets = [0, 4], sizes = [8, 1], strides = [1, 1]} : vector<8x8xf32> to vector<8x1xf32>
    %186 = vector.shape_cast %185 : vector<8x1xf32> to vector<8x1x1xf32>
    %187 = vector.extract_strided_slice %151 {offsets = [0, 4], sizes = [8, 57], strides = [1, 1]} : vector<8x64xf32> to vector<8x57xf32>
    %188 = vector.shape_cast %187 : vector<8x57xf32> to vector<1x8x57xf32>
    %189 = vector.broadcast %186 : vector<8x1x1xf32> to vector<8x8x57xf32>
    %190 = vector.broadcast %188 : vector<1x8x57xf32> to vector<8x8x57xf32>
    %191 = arith.mulf %189, %190 : vector<8x8x57xf32>
    %192 = arith.addf %184, %191 : vector<8x8x57xf32>
    %193 = vector.extract_strided_slice %0 {offsets = [0, 5], sizes = [8, 1], strides = [1, 1]} : vector<8x8xf32> to vector<8x1xf32>
    %194 = vector.shape_cast %193 : vector<8x1xf32> to vector<8x1x1xf32>
    %195 = vector.extract_strided_slice %151 {offsets = [0, 5], sizes = [8, 57], strides = [1, 1]} : vector<8x64xf32> to vector<8x57xf32>
    %196 = vector.shape_cast %195 : vector<8x57xf32> to vector<1x8x57xf32>
    %197 = vector.broadcast %194 : vector<8x1x1xf32> to vector<8x8x57xf32>
    %198 = vector.broadcast %196 : vector<1x8x57xf32> to vector<8x8x57xf32>
    %199 = arith.mulf %197, %198 : vector<8x8x57xf32>
    %200 = arith.addf %192, %199 : vector<8x8x57xf32>
    %201 = vector.extract_strided_slice %0 {offsets = [0, 6], sizes = [8, 1], strides = [1, 1]} : vector<8x8xf32> to vector<8x1xf32>
    %202 = vector.shape_cast %201 : vector<8x1xf32> to vector<8x1x1xf32>
    %203 = vector.extract_strided_slice %151 {offsets = [0, 6], sizes = [8, 57], strides = [1, 1]} : vector<8x64xf32> to vector<8x57xf32>
    %204 = vector.shape_cast %203 : vector<8x57xf32> to vector<1x8x57xf32>
    %205 = vector.broadcast %202 : vector<8x1x1xf32> to vector<8x8x57xf32>
    %206 = vector.broadcast %204 : vector<1x8x57xf32> to vector<8x8x57xf32>
    %207 = arith.mulf %205, %206 : vector<8x8x57xf32>
    %208 = arith.addf %200, %207 : vector<8x8x57xf32>
    %209 = vector.extract_strided_slice %0 {offsets = [0, 7], sizes = [8, 1], strides = [1, 1]} : vector<8x8xf32> to vector<8x1xf32>
    %210 = vector.shape_cast %209 : vector<8x1xf32> to vector<8x1x1xf32>
    %211 = vector.extract_strided_slice %151 {offsets = [0, 7], sizes = [8, 57], strides = [1, 1]} : vector<8x64xf32> to vector<8x57xf32>
    %212 = vector.shape_cast %211 : vector<8x57xf32> to vector<1x8x57xf32>
    %213 = vector.broadcast %210 : vector<8x1x1xf32> to vector<8x8x57xf32>
    %214 = vector.broadcast %212 : vector<1x8x57xf32> to vector<8x8x57xf32>
    %215 = arith.mulf %213, %214 : vector<8x8x57xf32>
    %216 = arith.addf %208, %215 : vector<8x8x57xf32>
    %217 = vector.broadcast %2 : vector<8x1x1xf32> to vector<8x8x57xf32>
    %218 = arith.addf %216, %217 : vector<8x8x57xf32>
    %cst_15 = arith.constant 0.000000e+00 : f32
    %219 = vector.broadcast %cst_15 : f32 to vector<8x8x57xf32>
    %220 = arith.maximumf %218, %219 : vector<8x8x57xf32>
    %221 = vector.extract_strided_slice %3 {offsets = [0, 1], sizes = [8, 1], strides = [1, 1]} : vector<8x16xf32> to vector<8x1xf32>
    %222 = vector.shape_cast %221 : vector<8x1xf32> to vector<8x1x1xf32>
    %223 = vector.extract_strided_slice %220 {offsets = [0, 0, 0], sizes = [1, 8, 57], strides = [1, 1, 1]} : vector<8x8x57xf32> to vector<1x8x57xf32>
    %224 = vector.shape_cast %223 : vector<1x8x57xf32> to vector<8x57xf32>
    %225 = vector.shape_cast %224 : vector<8x57xf32> to vector<1x8x57xf32>
    %226 = vector.broadcast %222 : vector<8x1x1xf32> to vector<8x8x57xf32>
    %227 = vector.broadcast %225 : vector<1x8x57xf32> to vector<8x8x57xf32>
    %228 = arith.mulf %226, %227 : vector<8x8x57xf32>
    %229 = arith.addf %149, %228 : vector<8x8x57xf32>
    %230 = vector.extract_strided_slice %3 {offsets = [0, 3], sizes = [8, 1], strides = [1, 1]} : vector<8x16xf32> to vector<8x1xf32>
    %231 = vector.shape_cast %230 : vector<8x1xf32> to vector<8x1x1xf32>
    %232 = vector.extract_strided_slice %220 {offsets = [1, 0, 0], sizes = [1, 8, 57], strides = [1, 1, 1]} : vector<8x8x57xf32> to vector<1x8x57xf32>
    %233 = vector.shape_cast %232 : vector<1x8x57xf32> to vector<8x57xf32>
    %234 = vector.shape_cast %233 : vector<8x57xf32> to vector<1x8x57xf32>
    %235 = vector.broadcast %231 : vector<8x1x1xf32> to vector<8x8x57xf32>
    %236 = vector.broadcast %234 : vector<1x8x57xf32> to vector<8x8x57xf32>
    %237 = arith.mulf %235, %236 : vector<8x8x57xf32>
    %238 = arith.addf %229, %237 : vector<8x8x57xf32>
    %239 = vector.extract_strided_slice %3 {offsets = [0, 5], sizes = [8, 1], strides = [1, 1]} : vector<8x16xf32> to vector<8x1xf32>
    %240 = vector.shape_cast %239 : vector<8x1xf32> to vector<8x1x1xf32>
    %241 = vector.extract_strided_slice %220 {offsets = [2, 0, 0], sizes = [1, 8, 57], strides = [1, 1, 1]} : vector<8x8x57xf32> to vector<1x8x57xf32>
    %242 = vector.shape_cast %241 : vector<1x8x57xf32> to vector<8x57xf32>
    %243 = vector.shape_cast %242 : vector<8x57xf32> to vector<1x8x57xf32>
    %244 = vector.broadcast %240 : vector<8x1x1xf32> to vector<8x8x57xf32>
    %245 = vector.broadcast %243 : vector<1x8x57xf32> to vector<8x8x57xf32>
    %246 = arith.mulf %244, %245 : vector<8x8x57xf32>
    %247 = arith.addf %238, %246 : vector<8x8x57xf32>
    %248 = vector.extract_strided_slice %3 {offsets = [0, 7], sizes = [8, 1], strides = [1, 1]} : vector<8x16xf32> to vector<8x1xf32>
    %249 = vector.shape_cast %248 : vector<8x1xf32> to vector<8x1x1xf32>
    %250 = vector.extract_strided_slice %220 {offsets = [3, 0, 0], sizes = [1, 8, 57], strides = [1, 1, 1]} : vector<8x8x57xf32> to vector<1x8x57xf32>
    %251 = vector.shape_cast %250 : vector<1x8x57xf32> to vector<8x57xf32>
    %252 = vector.shape_cast %251 : vector<8x57xf32> to vector<1x8x57xf32>
    %253 = vector.broadcast %249 : vector<8x1x1xf32> to vector<8x8x57xf32>
    %254 = vector.broadcast %252 : vector<1x8x57xf32> to vector<8x8x57xf32>
    %255 = arith.mulf %253, %254 : vector<8x8x57xf32>
    %256 = arith.addf %247, %255 : vector<8x8x57xf32>
    %257 = vector.extract_strided_slice %3 {offsets = [0, 9], sizes = [8, 1], strides = [1, 1]} : vector<8x16xf32> to vector<8x1xf32>
    %258 = vector.shape_cast %257 : vector<8x1xf32> to vector<8x1x1xf32>
    %259 = vector.extract_strided_slice %220 {offsets = [4, 0, 0], sizes = [1, 8, 57], strides = [1, 1, 1]} : vector<8x8x57xf32> to vector<1x8x57xf32>
    %260 = vector.shape_cast %259 : vector<1x8x57xf32> to vector<8x57xf32>
    %261 = vector.shape_cast %260 : vector<8x57xf32> to vector<1x8x57xf32>
    %262 = vector.broadcast %258 : vector<8x1x1xf32> to vector<8x8x57xf32>
    %263 = vector.broadcast %261 : vector<1x8x57xf32> to vector<8x8x57xf32>
    %264 = arith.mulf %262, %263 : vector<8x8x57xf32>
    %265 = arith.addf %256, %264 : vector<8x8x57xf32>
    %266 = vector.extract_strided_slice %3 {offsets = [0, 11], sizes = [8, 1], strides = [1, 1]} : vector<8x16xf32> to vector<8x1xf32>
    %267 = vector.shape_cast %266 : vector<8x1xf32> to vector<8x1x1xf32>
    %268 = vector.extract_strided_slice %220 {offsets = [5, 0, 0], sizes = [1, 8, 57], strides = [1, 1, 1]} : vector<8x8x57xf32> to vector<1x8x57xf32>
    %269 = vector.shape_cast %268 : vector<1x8x57xf32> to vector<8x57xf32>
    %270 = vector.shape_cast %269 : vector<8x57xf32> to vector<1x8x57xf32>
    %271 = vector.broadcast %267 : vector<8x1x1xf32> to vector<8x8x57xf32>
    %272 = vector.broadcast %270 : vector<1x8x57xf32> to vector<8x8x57xf32>
    %273 = arith.mulf %271, %272 : vector<8x8x57xf32>
    %274 = arith.addf %265, %273 : vector<8x8x57xf32>
    %275 = vector.extract_strided_slice %3 {offsets = [0, 13], sizes = [8, 1], strides = [1, 1]} : vector<8x16xf32> to vector<8x1xf32>
    %276 = vector.shape_cast %275 : vector<8x1xf32> to vector<8x1x1xf32>
    %277 = vector.extract_strided_slice %220 {offsets = [6, 0, 0], sizes = [1, 8, 57], strides = [1, 1, 1]} : vector<8x8x57xf32> to vector<1x8x57xf32>
    %278 = vector.shape_cast %277 : vector<1x8x57xf32> to vector<8x57xf32>
    %279 = vector.shape_cast %278 : vector<8x57xf32> to vector<1x8x57xf32>
    %280 = vector.broadcast %276 : vector<8x1x1xf32> to vector<8x8x57xf32>
    %281 = vector.broadcast %279 : vector<1x8x57xf32> to vector<8x8x57xf32>
    %282 = arith.mulf %280, %281 : vector<8x8x57xf32>
    %283 = arith.addf %274, %282 : vector<8x8x57xf32>
    %284 = vector.extract_strided_slice %3 {offsets = [0, 15], sizes = [8, 1], strides = [1, 1]} : vector<8x16xf32> to vector<8x1xf32>
    %285 = vector.shape_cast %284 : vector<8x1xf32> to vector<8x1x1xf32>
    %286 = vector.extract_strided_slice %220 {offsets = [7, 0, 0], sizes = [1, 8, 57], strides = [1, 1, 1]} : vector<8x8x57xf32> to vector<1x8x57xf32>
    %287 = vector.shape_cast %286 : vector<1x8x57xf32> to vector<8x57xf32>
    %288 = vector.shape_cast %287 : vector<8x57xf32> to vector<1x8x57xf32>
    %289 = vector.broadcast %285 : vector<8x1x1xf32> to vector<8x8x57xf32>
    %290 = vector.broadcast %288 : vector<1x8x57xf32> to vector<8x8x57xf32>
    %291 = arith.mulf %289, %290 : vector<8x8x57xf32>
    %292 = arith.addf %283, %291 : vector<8x8x57xf32>
    %293 = vector.broadcast %5 : vector<8x1x1xf32> to vector<8x8x57xf32>
    %294 = arith.addf %292, %293 : vector<8x8x57xf32>
    %cst_16 = arith.constant 0.000000e+00 : f32
    %295 = vector.broadcast %cst_16 : f32 to vector<8x8x57xf32>
    %296 = arith.maximumf %294, %295 : vector<8x8x57xf32>
    %cst_17 = arith.constant 0.000000e+00 : f32
    %297 = vector.broadcast %cst_17 : f32 to vector<8x128xf32>
    %298 = vector.extract_strided_slice %296 {offsets = [0, 0, 0], sizes = [1, 8, 57], strides = [1, 1, 1]} : vector<8x8x57xf32> to vector<1x8x57xf32>
    %299 = vector.shape_cast %298 : vector<1x8x57xf32> to vector<8x57xf32>
    %c0_18 = arith.constant 0 : index
    %c0_19 = arith.constant 0 : index
    %c0_20 = arith.constant 0 : index
    %300 = vector.load %arg6[%c0_18, %c0_19, %c0_20] : memref<8x57x128xf32, #tpu.memory_space<vmem>>, vector<1x57x128xf32>
    %301 = vector.shape_cast %300 : vector<1x57x128xf32> to vector<57x128xf32>
    %cst_21 = arith.constant dense<0.000000e+00> : vector<8x128xf32>
    %302 = tpu.matmul %299, %301, %cst_21 {dimension_numbers = #tpu.dot_dimension_numbers<[1], [0], [0], [1], [0, 0, 1, 1], [], []>} : vector<8x57xf32>, vector<57x128xf32>, vector<8x128xf32> -> vector<8x128xf32>
    %303 = arith.addf %297, %302 : vector<8x128xf32>
    %304 = vector.extract_strided_slice %296 {offsets = [1, 0, 0], sizes = [1, 8, 57], strides = [1, 1, 1]} : vector<8x8x57xf32> to vector<1x8x57xf32>
    %305 = vector.shape_cast %304 : vector<1x8x57xf32> to vector<8x57xf32>
    %c1_22 = arith.constant 1 : index
    %c0_23 = arith.constant 0 : index
    %c0_24 = arith.constant 0 : index
    %306 = vector.load %arg6[%c1_22, %c0_23, %c0_24] : memref<8x57x128xf32, #tpu.memory_space<vmem>>, vector<1x57x128xf32>
    %307 = vector.shape_cast %306 : vector<1x57x128xf32> to vector<57x128xf32>
    %cst_25 = arith.constant dense<0.000000e+00> : vector<8x128xf32>
    %308 = tpu.matmul %305, %307, %cst_25 {dimension_numbers = #tpu.dot_dimension_numbers<[1], [0], [0], [1], [0, 0, 1, 1], [], []>} : vector<8x57xf32>, vector<57x128xf32>, vector<8x128xf32> -> vector<8x128xf32>
    %309 = arith.addf %303, %308 : vector<8x128xf32>
    %310 = vector.extract_strided_slice %296 {offsets = [2, 0, 0], sizes = [1, 8, 57], strides = [1, 1, 1]} : vector<8x8x57xf32> to vector<1x8x57xf32>
    %311 = vector.shape_cast %310 : vector<1x8x57xf32> to vector<8x57xf32>
    %c2 = arith.constant 2 : index
    %c0_26 = arith.constant 0 : index
    %c0_27 = arith.constant 0 : index
    %312 = vector.load %arg6[%c2, %c0_26, %c0_27] : memref<8x57x128xf32, #tpu.memory_space<vmem>>, vector<1x57x128xf32>
    %313 = vector.shape_cast %312 : vector<1x57x128xf32> to vector<57x128xf32>
    %cst_28 = arith.constant dense<0.000000e+00> : vector<8x128xf32>
    %314 = tpu.matmul %311, %313, %cst_28 {dimension_numbers = #tpu.dot_dimension_numbers<[1], [0], [0], [1], [0, 0, 1, 1], [], []>} : vector<8x57xf32>, vector<57x128xf32>, vector<8x128xf32> -> vector<8x128xf32>
    %315 = arith.addf %309, %314 : vector<8x128xf32>
    %316 = vector.extract_strided_slice %296 {offsets = [3, 0, 0], sizes = [1, 8, 57], strides = [1, 1, 1]} : vector<8x8x57xf32> to vector<1x8x57xf32>
    %317 = vector.shape_cast %316 : vector<1x8x57xf32> to vector<8x57xf32>
    %c3 = arith.constant 3 : index
    %c0_29 = arith.constant 0 : index
    %c0_30 = arith.constant 0 : index
    %318 = vector.load %arg6[%c3, %c0_29, %c0_30] : memref<8x57x128xf32, #tpu.memory_space<vmem>>, vector<1x57x128xf32>
    %319 = vector.shape_cast %318 : vector<1x57x128xf32> to vector<57x128xf32>
    %cst_31 = arith.constant dense<0.000000e+00> : vector<8x128xf32>
    %320 = tpu.matmul %317, %319, %cst_31 {dimension_numbers = #tpu.dot_dimension_numbers<[1], [0], [0], [1], [0, 0, 1, 1], [], []>} : vector<8x57xf32>, vector<57x128xf32>, vector<8x128xf32> -> vector<8x128xf32>
    %321 = arith.addf %315, %320 : vector<8x128xf32>
    %322 = vector.extract_strided_slice %296 {offsets = [4, 0, 0], sizes = [1, 8, 57], strides = [1, 1, 1]} : vector<8x8x57xf32> to vector<1x8x57xf32>
    %323 = vector.shape_cast %322 : vector<1x8x57xf32> to vector<8x57xf32>
    %c4 = arith.constant 4 : index
    %c0_32 = arith.constant 0 : index
    %c0_33 = arith.constant 0 : index
    %324 = vector.load %arg6[%c4, %c0_32, %c0_33] : memref<8x57x128xf32, #tpu.memory_space<vmem>>, vector<1x57x128xf32>
    %325 = vector.shape_cast %324 : vector<1x57x128xf32> to vector<57x128xf32>
    %cst_34 = arith.constant dense<0.000000e+00> : vector<8x128xf32>
    %326 = tpu.matmul %323, %325, %cst_34 {dimension_numbers = #tpu.dot_dimension_numbers<[1], [0], [0], [1], [0, 0, 1, 1], [], []>} : vector<8x57xf32>, vector<57x128xf32>, vector<8x128xf32> -> vector<8x128xf32>
    %327 = arith.addf %321, %326 : vector<8x128xf32>
    %328 = vector.extract_strided_slice %296 {offsets = [5, 0, 0], sizes = [1, 8, 57], strides = [1, 1, 1]} : vector<8x8x57xf32> to vector<1x8x57xf32>
    %329 = vector.shape_cast %328 : vector<1x8x57xf32> to vector<8x57xf32>
    %c5 = arith.constant 5 : index
    %c0_35 = arith.constant 0 : index
    %c0_36 = arith.constant 0 : index
    %330 = vector.load %arg6[%c5, %c0_35, %c0_36] : memref<8x57x128xf32, #tpu.memory_space<vmem>>, vector<1x57x128xf32>
    %331 = vector.shape_cast %330 : vector<1x57x128xf32> to vector<57x128xf32>
    %cst_37 = arith.constant dense<0.000000e+00> : vector<8x128xf32>
    %332 = tpu.matmul %329, %331, %cst_37 {dimension_numbers = #tpu.dot_dimension_numbers<[1], [0], [0], [1], [0, 0, 1, 1], [], []>} : vector<8x57xf32>, vector<57x128xf32>, vector<8x128xf32> -> vector<8x128xf32>
    %333 = arith.addf %327, %332 : vector<8x128xf32>
    %334 = vector.extract_strided_slice %296 {offsets = [6, 0, 0], sizes = [1, 8, 57], strides = [1, 1, 1]} : vector<8x8x57xf32> to vector<1x8x57xf32>
    %335 = vector.shape_cast %334 : vector<1x8x57xf32> to vector<8x57xf32>
    %c6 = arith.constant 6 : index
    %c0_38 = arith.constant 0 : index
    %c0_39 = arith.constant 0 : index
    %336 = vector.load %arg6[%c6, %c0_38, %c0_39] : memref<8x57x128xf32, #tpu.memory_space<vmem>>, vector<1x57x128xf32>
    %337 = vector.shape_cast %336 : vector<1x57x128xf32> to vector<57x128xf32>
    %cst_40 = arith.constant dense<0.000000e+00> : vector<8x128xf32>
    %338 = tpu.matmul %335, %337, %cst_40 {dimension_numbers = #tpu.dot_dimension_numbers<[1], [0], [0], [1], [0, 0, 1, 1], [], []>} : vector<8x57xf32>, vector<57x128xf32>, vector<8x128xf32> -> vector<8x128xf32>
    %339 = arith.addf %333, %338 : vector<8x128xf32>
    %340 = vector.extract_strided_slice %296 {offsets = [7, 0, 0], sizes = [1, 8, 57], strides = [1, 1, 1]} : vector<8x8x57xf32> to vector<1x8x57xf32>
    %341 = vector.shape_cast %340 : vector<1x8x57xf32> to vector<8x57xf32>
    %c7 = arith.constant 7 : index
    %c0_41 = arith.constant 0 : index
    %c0_42 = arith.constant 0 : index
    %342 = vector.load %arg6[%c7, %c0_41, %c0_42] : memref<8x57x128xf32, #tpu.memory_space<vmem>>, vector<1x57x128xf32>
    %343 = vector.shape_cast %342 : vector<1x57x128xf32> to vector<57x128xf32>
    %cst_43 = arith.constant dense<0.000000e+00> : vector<8x128xf32>
    %344 = tpu.matmul %341, %343, %cst_43 {dimension_numbers = #tpu.dot_dimension_numbers<[1], [0], [0], [1], [0, 0, 1, 1], [], []>} : vector<8x57xf32>, vector<57x128xf32>, vector<8x128xf32> -> vector<8x128xf32>
    %345 = arith.addf %339, %344 : vector<8x128xf32>
    %c0_44 = arith.constant 0 : index
    %c0_45 = arith.constant 0 : index
    %346 = vector.load %arg7[%c0_44, %c0_45] : memref<1x128xf32, #tpu.memory_space<vmem>>, vector<1x128xf32>
    %347 = vector.broadcast %346 : vector<1x128xf32> to vector<8x128xf32>
    %348 = arith.addf %345, %347 : vector<8x128xf32>
    %c0_46 = arith.constant 0 : index
    %c0_47 = arith.constant 0 : index
    %349 = vector.load %arg8[%c0_46, %c0_47] : memref<8x128xf32, #tpu.memory_space<vmem>>, vector<8x128xf32>
    tpu.vector_store %arg8[%c0_46, %c0_47], %348 {strides = array<i32>} : memref<8x128xf32, #tpu.memory_space<vmem>>, vector<8x128xf32>,
    return
  }
  func.func @transform_0(%arg0: i32) -> (i32, i32, i32) {
    %c0_i32 = arith.constant 0 : i32
    %c0_i32_0 = arith.constant 0 : i32
    %c0_i32_1 = arith.constant 0 : i32
    return %c0_i32, %arg0, %c0_i32_0 : i32, i32, i32
  }
  func.func @transform_1(%arg0: i32) -> (i32, i32) {
    %c0_i32 = arith.constant 0 : i32
    %c0_i32_0 = arith.constant 0 : i32
    %c0_i32_1 = arith.constant 0 : i32
    return %c0_i32, %c0_i32_0 : i32, i32
  }
  func.func @transform_2(%arg0: i32) -> (i32, i32) {
    %c0_i32 = arith.constant 0 : i32
    %c0_i32_0 = arith.constant 0 : i32
    %c0_i32_1 = arith.constant 0 : i32
    return %c0_i32, %c0_i32_0 : i32, i32
  }
  func.func @transform_3(%arg0: i32) -> (i32, i32) {
    %c0_i32 = arith.constant 0 : i32
    %c0_i32_0 = arith.constant 0 : i32
    %c0_i32_1 = arith.constant 0 : i32
    return %c0_i32, %c0_i32_0 : i32, i32
  }
  func.func @transform_4(%arg0: i32) -> (i32, i32) {
    %c0_i32 = arith.constant 0 : i32
    %c0_i32_0 = arith.constant 0 : i32
    %c0_i32_1 = arith.constant 0 : i32
    return %c0_i32, %c0_i32_0 : i32, i32
  }
  func.func @transform_5(%arg0: i32) -> (i32, i32, i32) {
    %c0_i32 = arith.constant 0 : i32
    %c0_i32_0 = arith.constant 0 : i32
    %c0_i32_1 = arith.constant 0 : i32
    %c0_i32_2 = arith.constant 0 : i32
    return %c0_i32, %c0_i32_0, %c0_i32_1 : i32, i32, i32
  }
  func.func @transform_6(%arg0: i32) -> (i32, i32) {
    %c0_i32 = arith.constant 0 : i32
    %c0_i32_0 = arith.constant 0 : i32
    %c0_i32_1 = arith.constant 0 : i32
    return %c0_i32, %c0_i32_0 : i32, i32
  }
  func.func @transform_7(%arg0: i32) -> (i32, i32) {
    %c0_i32 = arith.constant 0 : i32
    %c0_i32_0 = arith.constant 0 : i32
    return %arg0, %c0_i32 : i32, i32
  }
}

</mosaic_0001>

<bundles_post_ra>
// kernel: tpu_custom_call.1
= control target key start
LH: loop header
LB: loop body
LE: loop exit
PB: predicated region body
PF: predicated region fallthrough
CT: control target
= control target key end

     0   :  { %12 = vsyncpa [#allocation4], 0  ;;  %s4708_s0 = inlined_call_operand.vmem [shape: f32[2,16,64], index: 0, kind: input, shape index: {}]   ;;  %s4709_s1 = inlined_call_operand.vmem [shape: f32[8,8], index: 1, kind: input, shape index: {}]   ;;  %s4710_s2 = inlined_call_operand.vmem [shape: f32[8,1], index: 2, kind: input, shape index: {}]   ;;  %s4711_s3 = inlined_call_operand.vmem [shape: f32[8,16], index: 3, kind: input, shape index: {}]   ;;  %s4712_s4 = inlined_call_operand.vmem [shape: f32[8,1], index: 4, kind: input, shape index: {}]   ;;  %s4713_s5 = inlined_call_operand.vmem [shape: f32[8,57,128], index: 5, kind: input, shape index: {}]   ;;  %s4714_s6 = inlined_call_operand.vmem [shape: f32[1,128], index: 6, kind: input, shape index: {}]   ;;  %s4715_s7 = inlined_call_operand.hbm [shape: f32[16,128], index: 7, kind: output, shape index: {}]  }
   0x1   :  { %14 = vsyncpa [#allocation4 + $0x1], 0  ;;  %s2963_s24 = smov 0   ;;  %s2965_s25 = smov 0  }
   0x2   :  { %s2967_s26 = smov 0   ;;  %s2969_s27 = smov 0  }
   0x3 LB: > { %s2600_s28 = sadd.s32 4294967295, %s2898_s27   ;;  %s2601_s29 = sadd.s32 4294967294, %s2898_s27   ;;  %s2898_s27 = sphi %s2969_s27, %s5057_s27   ;;  %s2894_s26 = sphi %s2967_s26, %s5056_s26   ;;  %s2890_s25 = sphi %s2965_s25, %s5055_s25   ;;  %s2886_s24 = sphi %s2963_s24, %s5054_s24  }
   0x4   : > { %s2986_s30 = sadd.s32 1, %s2898_s27   ;;  %s27_s8 = sadd.s32 1, %s2894_s26 }
   0x5   : > { %s24_s9 = ssub.s32 %s2898_s27, %s2986_s30  ;;  %p34_p0 = scmp.ne.s32.totalorder %s2894_s26, %s2890_s25 }
   0x6   : > { %p25_p1 = scmp.eq.s32.totalorder %s24_s9, 0  ;;  %p35_p2 = scmp.eq.s32.totalorder %s2898_s27, 0 }
   0x7   : > { %p190_p3 = scmp.eq.s32.totalorder %s2600_s28, 1  ;;  %p195_p4 = scmp.ne.s32.totalorder %s2890_s25, %s2886_s24 }
   0x8   : > { %s2999_s10 = scalar_select %p25_p1, %s2894_s26, %s27_s8  }
   0x9   : > { %p36_p5 = por %p35_p2, %p34_p0  ;;  %p3001_p6 = por %p190_p3, %p34_p0 }
   0xa   : > { %p196_p7 = scmp.eq.s32.totalorder %s2601_s29, 1  ;;  %p2603_p9 = scmp.ge.s32.totalorder %s2898_s27, 2 }
   0xc   : > { %p3005_p8 = por %p196_p7, %p195_p4  ;;  %230 = sbr.rel (%p2603_p9) target bundleno = 23 (0x17), region = 40 }
  0x11   : > { %233 = sbr.rel (!%p36_p5) target bundleno = 23 (0x17), region = 44  ;;  %s235_s13 = sand.u32 (%p36_p5), 1, %s2894_s26  }
  0x12   : > { %s2605_s14 = sshll.u32 (%p36_p5), %s2898_s27, 3  ;;  %s2604_s15 = sshll.u32 (%p36_p5), %s235_s13, 4 }
  0x13   : > { %s239_s18 = scalar_lea.vmem (%p36_p5), %s4708_s0, %s2605_s14  ;;  %s237_s19 = scalar_lea.vmem (%p36_p5), [#allocation2], %s2604_s15 }
  0x14   : > { %v270_v0 = vld [vmem:[%s239_s18] sm:$0xff] (%p36_p5)  ;;  %v272_v1 = vld [vmem:[%s239_s18 + $0x10] sm:$0xff] (%p36_p5) }
  0x15   : > { %271 = vst [vmem:[%s237_s19] sm:$0xff] (%p36_p5), %v270_v0 }
  0x16   : > { %273 = vst [vmem:[%s237_s19 + $0x8] sm:$0xff] %v272_v1 }
  0x17 PF: > { %p2606_p10 = scmp.ge.s32.totalorder %s2898_s27, 1  ;;  %p278_p11 = scmp.lt.s32.totalorder %s2898_s27, 3 }
  0x19   : > { %p279_p12 = pnand %p2606_p10, %p278_p11 }
  0x1b   : > { %282 = sbr.rel (%p279_p12) target bundleno = 1747 (0x6d3), region = 82 }
  0x20   : > { %v316_v2 = vld [vmem:[%s4709_s1] sm:$0xff]  ;;  %v4726_v3 = vmov 0   ;;  %v4718_v7 = vmov 1   ;;  %v4722_v20 = vmov 2   ;;  %v4716_v21 = vmov 3   ;;  %s3079_s22 = sand.u32 1, %s2890_s25  }
  0x21   : > { %2749 = vset.pattern.permute.xlu2 %v4726_v3  ;;  %2748 = vset.pattern.permute.xlu1 %v4726_v3  ;;  %v341_v4 = vrot.slane %v316_v2, 4  ;;  %v339_v5 = vrot.slane %v316_v2, 2  ;;  %v338_v6 = vrot.slane %v316_v2, 1  ;;  %v342_v11 = vrot.slane %v316_v2, 5  ;;  %s2607_s23 = sshll.u32 %s3079_s22, 4  ;;  %s2904_s8 = smov 127  }
  0x22   : > { %2751 = vset.pattern.permute.xlu0 %v4718_v7  ;;  %v340_v12 = vrot.slane %v316_v2, 3  ;;  %v343_v13 = vrot.slane %v316_v2, 6  ;;  %v344_v17 = vrot.slane %v316_v2, 7  ;;  %v3045_v19 = vperm.slane %v316_v2, 0  ;;  %s3084_s29 = scalar_lea.vmem [#allocation2], %s2607_s23  ;;  %s2905_s9 = smov 126  }
  0x23   : > { %v3025_v8 = vperm.slane %v341_v4, 0  ;;  %v3027_v9 = vperm.slane %v339_v5, 0  ;;  %v3029_v10 = vperm.slane %v338_v6, 0  ;;  %v3034_v14 = vperm.slane %v342_v11, 0  ;;  %v3087_v24 = vld [vmem:[%s3084_s29] sm:$0xff]  ;;  %s2907_s13 = smov 125  }
  0x24   : > { %v3036_v15 = vperm.slane %v340_v12, 0  ;;  %v3038_v16 = vperm.slane %v343_v13, 0  ;;  %v3043_v18 = vperm.slane %v344_v17, 0  ;;  %v4720_v48 = vmov 4   ;;  %s2908_s14 = smov 124   ;;  %s2910_s15 = smov 123  }
  0x25   : > { %370 = vperm.xlu2 %2749, %v3025_v8   ;;  %362 = vperm.xlu1 %2748, %v3027_v9   ;;  %s2913_s16 = smov 122   ;;  %s2914_s17 = smov 121   ;;  %vm2248_vm0 = vcmask 1040384   ;;  %vm2244_vm1 = vcmask 465920  }
  0x26   : > { %406 = vperm.xlu0 %2751, %v3029_v10   ;;  %s2608_s23 = sshll.u32 %s3079_s22, 3 }
  0x2d   : > { %374 = vperm.xlu2 %2749, %v3034_v14   ;;  %366 = vperm.xlu1 %2748, %v3036_v15  }
  0x2e   : > { %426 = vperm.xlu0 %2751, %v3038_v16  }
  0x35   : > { %2750 = vset.pattern.permute.xlu2 %v4718_v7  ;;  %382 = vperm.xlu1 %2748, %v3043_v18  }
  0x36   : > { %402 = vperm.xlu2 %2750, %v3045_v19   ;;  %2755 = vset.pattern.permute.xlu0 %v4722_v20 }
  0x37   : > { %490 = vperm.xlu0 %2755, %v3027_v9  }
  0x3d   : > { %2752 = vset.pattern.permute.xlu1 %v4718_v7 }
  0x3e   : > { %414 = vperm.xlu2 %2750, %v3036_v15   ;;  %410 = vperm.xlu1 %2752, %v3027_v9  }
  0x3f   : > { %510 = vperm.xlu0 %2755, %v3043_v18  }
  0x46   : > { %422 = vperm.xlu2 %2750, %v3034_v14   ;;  %418 = vperm.xlu1 %2752, %v3025_v8  }
  0x47   : > { %2756 = vset.pattern.permute.xlu0 %v4716_v21 }
  0x48   : > { %562 = vperm.xlu0 %2756, %v3045_v19  }
  0x4e   : > { %2754 = vset.pattern.permute.xlu2 %v4722_v20  ;;  %430 = vperm.xlu1 %2752, %v3043_v18  }
  0x4f   : > { %486 = vperm.xlu2 %2754, %v3029_v10  }
  0x50   : > { %582 = vperm.xlu0 %2756, %v3034_v14  }
  0x56   : > { %2753 = vset.pattern.permute.xlu1 %v4722_v20 }
  0x57   : > { %482 = vperm.xlu1 %2753, %v3045_v19   ;;  %498 = vperm.xlu2 %2754, %v3025_v8  }
  0x58   : > { %2760 = vset.pattern.permute.xlu0 %v4720_v48 }
  0x5f   : > { %494 = vperm.xlu1 %2753, %v3036_v15   ;;  %506 = vperm.xlu2 %2754, %v3038_v16  }
  0x67   : > { %502 = vperm.xlu1 %2753, %v3034_v14   ;;  %2758 = vset.pattern.permute.xlu2 %v4716_v21 }
  0x68   : > { %570 = vperm.xlu2 %2758, %v3027_v9  }
  0x6f   : > { %2757 = vset.pattern.permute.xlu1 %v4716_v21 }
  0x70   : > { %566 = vperm.xlu1 %2757, %v3029_v10   ;;  %578 = vperm.xlu2 %2758, %v3025_v8  }
  0x78   : > { %574 = vperm.xlu1 %2757, %v3036_v15  }
  0x7f   : > { %v3076_v22 = vpop.permute.xlu2 %370 }
  0x87   : > { %v3081_v23 = vpop.permute.xlu2 %374 }
  0x88   : > { %4799 = vst [vmem:[#allocation6_spill] sm:$0xff] %v3081_v23 }
  0x90   : > { %v3089_v25 = vpop.permute.xlu2 %402 }
  0x91   : > { %v433_v26 = vmul.f32 %v3089_v25, %v3087_v24 }
  0x93   : > { %449 = vrot.lane.b32.xlu2 %v433_v26, %s2904_s8 }
  0x97   : > { %v3094_v27 = vpop.permute.xlu1 %362 }
  0x98   : > { %v3096_v28 = vpop.permute.xlu2 %414  ;;  %v3098_v29 = vpop.permute.xlu0 %406 }
  0x99   : > { %4800 = vst [vmem:[#allocation7_spill] sm:$0xff] %v3098_v29  ;;  %v436_v30 = vmul.f32 %v3096_v28, %v3087_v24  ;;  %v434_v31 = vmul.f32 %v3098_v29, %v3087_v24 }
  0x9b   : > { %455 = vrot.lane.b32.xlu2 %v436_v30, %s2904_s8  ;;  %451 = vrot.lane.b32.xlu0 %v434_v31, %s2904_s8 }
  0x9f   : > { %v3106_v32 = vpop.permute.xlu1 %366 }
  0xa0   : > { %v3108_v33 = vpop.permute.xlu2 %422  ;;  %v3110_v34 = vpop.permute.xlu0 %426 }
  0xa1   : > { %4801 = vst [vmem:[#allocation8_spill] sm:$0xff] %v3108_v33  ;;  %v439_v35 = vmul.f32 %v3110_v34, %v3087_v24  ;;  %v438_v62 = vmul.f32 %v3108_v33, %v3087_v24 }
  0xa3   : > { %461 = vrot.lane.b32.xlu2 %v439_v35, %s2904_s8 }
  0xa7   : > { %v3115_v36 = vpop.permute.xlu1 %382 }
  0xa8   : > { %4802 = vst [vmem:[#allocation9_spill] sm:$0xff] %v3115_v36 }
  0xa9   : > { %v3117_v37 = vpop.permute.xlu2 %486  ;;  %v3121_v39 = vpop.permute.xlu0 %490 }
  0xaa   : > { %v514_v38 = vmul.f32 %v3117_v37, %v3087_v24  ;;  %4803 = vst [vmem:[#allocation10_spill] sm:$0xff] %v3121_v39  ;;  %v515_v53 = vmul.f32 %v3121_v39, %v3087_v24 }
  0xac   : > { %531 = vrot.lane.b32.xlu2 %v514_v38, %s2905_s9 }
  0xb0   : > { %v3124_v40 = vpop.permute.xlu1 %410 }
  0xb1   : > { %4804 = vst [vmem:[#allocation11_spill] sm:$0xff] %v3124_v40  ;;  %v3126_v41 = vpop.permute.xlu2 %498  ;;  %v3131_v43 = vpop.permute.xlu0 %510  ;;  %v435_v60 = vmul.f32 %v3124_v40, %v3087_v24 }
  0xb2   : > { %v517_v42 = vmul.f32 %v3126_v41, %v3087_v24  ;;  %4805 = vst [vmem:[#allocation12_spill] sm:$0xff] %v3131_v43  ;;  %v520_v45 = vmul.f32 %v3131_v43, %v3087_v24 }
  0xb4   : > { %537 = vrot.lane.b32.xlu2 %v517_v42, %s2905_s9 }
  0xb8   : > { %v3133_v44 = vpop.permute.xlu1 %418 }
  0xb9   : > { %4806 = vst [vmem:[#allocation13_spill] sm:$0xff] %v3133_v44  ;;  %v437_v46 = vmul.f32 %v3133_v44, %v3087_v24  ;;  %v3140_v47 = vpop.permute.xlu2 %506 }
  0xba   : > { %4807 = vst [vmem:[#allocation14_spill] sm:$0xff] %v3140_v47  ;;  %v3149_v51 = vpop.permute.xlu0 %562  ;;  %v519_v5 = vmul.f32 %v3140_v47, %v3087_v24 }
  0xbb   : > { %457 = vrot.lane.b32.xlu0 %v437_v46, %s2904_s8  ;;  %4809 = vst [vmem:[#allocation16_spill] sm:$0xff] %v3149_v51  ;;  %v593_v0 = vmul.f32 %v3149_v51, %v3087_v24 }
  0xbc   : > { %543 = vrot.lane.b32.xlu2 %v520_v45, %s2905_s9 }
  0xc0   : > { %v3144_v49 = vpop.permute.xlu1 %430 }
  0xc1   : > { %4808 = vst [vmem:[#allocation15_spill] sm:$0xff] %v3144_v49  ;;  %v440_v50 = vmul.f32 %v3144_v49, %v3087_v24 }
  0xc2   : > { %v3152_v52 = vpop.permute.xlu2 %570  ;;  %v3165_v57 = vpop.permute.xlu0 %582 }
  0xc3   : > { %463 = vrot.lane.b32.xlu0 %v440_v50, %s2904_s8  ;;  %4810 = vst [vmem:[#allocation17_spill] sm:$0xff] %v3152_v52  ;;  %v595_v54 = vmul.f32 %v3152_v52, %v3087_v24  ;;  %v598_v58 = vmul.f32 %v3165_v57, %v3087_v24  ;;  %v2915_v52 = vmov 8  }
  0xc4   : > { %590 = vperm.xlu2 %2758, %v3043_v18   ;;  %4812 = vst [vmem:[#allocation19_spill] sm:$0xff] %v3165_v57 }
  0xc9   : > { %v3158_v55 = vpop.permute.xlu1 %482 }
  0xca   : > { %4811 = vst [vmem:[#allocation18_spill] sm:$0xff] %v3158_v55  ;;  %v513_v56 = vmul.f32 %v3158_v55, %v3087_v24  ;;  %v3191_v4 = vpop.permute.xlu2 %578 }
  0xcb   : > { %533 = vrot.lane.b32.xlu0 %v515_v53, %s2905_s9  ;;  %4816 = vst [vmem:[#allocation23_spill] sm:$0xff] %v3191_v4  ;;  %v597_v30 = vmul.f32 %v3191_v4, %v3087_v24 }
  0xcc   : > { %529 = vrot.lane.b32.xlu1 %v513_v56, %s2905_s9  ;;  %613 = vrot.lane.b32.xlu2 %v595_v54, %s2907_s13 }
  0xcd   : > { %2759 = vset.pattern.permute.xlu2 %v4720_v48 }
  0xd1   : > { %v3170_v59 = vpop.permute.xlu1 %494 }
  0xd2   : > { %4813 = vst [vmem:[#allocation20_spill] sm:$0xff] %v3170_v59  ;;  %v516_v1 = vmul.f32 %v3170_v59, %v3087_v24 }
  0xd4   : > { %453 = vrot.lane.b32.xlu1 %v435_v60, %s2904_s8  ;;  %619 = vrot.lane.b32.xlu2 %v598_v58, %s2907_s13 }
  0xd9   : > { %v3176_v61 = vpop.permute.xlu1 %502 }
  0xda   : > { %4814 = vst [vmem:[#allocation21_spill] sm:$0xff] %v3176_v61  ;;  %v518_v63 = vmul.f32 %v3176_v61, %v3087_v24 }
  0xdc   : > { %459 = vrot.lane.b32.xlu1 %v438_v62, %s2904_s8  ;;  %539 = vrot.lane.b32.xlu0 %v518_v63, %s2905_s9 }
  0xdd   : > { %642 = vperm.xlu2 %2759, %v3045_v19  }
  0xe2   : > { %v3189_v2 = vpop.permute.xlu1 %566 }
  0xe3   : > { %4815 = vst [vmem:[#allocation22_spill] sm:$0xff] %v3189_v2  ;;  %v594_v17 = vmul.f32 %v3189_v2, %v3087_v24 }
  0xe4   : > { %535 = vrot.lane.b32.xlu1 %v516_v1, %s2905_s9  ;;  %609 = vrot.lane.b32.xlu0 %v593_v0, %s2907_s13 }
  0xe5   : > { %654 = vperm.xlu2 %2759, %v3036_v15  }
  0xea   : > { %v3198_v6 = vpop.permute.xlu1 %574 }
  0xeb   : > { %4817 = vst [vmem:[#allocation24_spill] sm:$0xff] %v3198_v6  ;;  %v596_v11 = vmul.f32 %v3198_v6, %v3087_v24 }
  0xec   : > { %541 = vrot.lane.b32.xlu1 %v519_v5, %s2905_s9 }
  0xed   : > { %615 = vrot.lane.b32.xlu0 %v596_v11, %s2907_s13  ;;  %v3204_v12 = vpop.permute.xlu2 %449  ;;  %662 = vperm.xlu2 %2759, %v3034_v14  }
  0xf4   : > { %586 = vperm.xlu1 %2757, %v3038_v16  }
  0xf5   : > { %v3208_v13 = vpop.permute.xlu2 %455 }
  0xfc   : > { %611 = vrot.lane.b32.xlu1 %v594_v17, %s2907_s13 }
  0xfd   : > { %v3213_v26 = vpop.permute.xlu2 %461  ;;  %2761 = vset.pattern.permute.xlu1 %v4720_v48 }
  0xfe   : > { %4818 = vst [vmem:[#allocation25_spill] sm:$0xff] %v3213_v26 }
 0x104   : > { %617 = vrot.lane.b32.xlu1 %v597_v30, %s2907_s13  ;;  %v4724_v30 = vmov 5  }
 0x105   : > { %2763 = vset.pattern.permute.xlu2 %v4724_v30 }
 0x106   : > { %v3219_v31 = vpop.permute.xlu2 %531 }
 0x10e   : > { %v3221_v35 = vpop.permute.xlu2 %537 }
 0x116   : > { %v3223_v38 = vpop.permute.xlu2 %543 }
 0x117   : > { %4819 = vst [vmem:[#allocation26_spill] sm:$0xff] %v3223_v38 }
 0x11e   : > { %v3225_v42 = vpop.permute.xlu2 %590 }
 0x11f   : > { %4820 = vst [vmem:[#allocation27_spill] sm:$0xff] %v3225_v42  ;;  %v600_v45 = vmul.f32 %v3225_v42, %v3087_v24 }
 0x121   : > { %623 = vrot.lane.b32.xlu1 %v600_v45, %s2907_s13 }
 0x126   : > { %v3230_v46 = vpop.permute.xlu2 %613 }
 0x129   : > { %650 = vperm.xlu1 %2761, %v3027_v9  }
 0x12e   : > { %v3233_v50 = vpop.permute.xlu2 %619 }
 0x12f   : > { %4821 = vst [vmem:[#allocation28_spill] sm:$0xff] %v3233_v50 }
 0x131   : > { %658 = vperm.xlu1 %2761, %v3025_v8  }
 0x137   : > { %v3236_v53 = vpop.permute.xlu2 %642 }
 0x138   : > { %4822 = vst [vmem:[#allocation29_spill] sm:$0xff] %v3236_v53  ;;  %v673_v54 = vmul.f32 %v3236_v53, %v3087_v24 }
 0x139   : > { %670 = vperm.xlu1 %2761, %v3043_v18  }
 0x13a   : > { %689 = vrot.lane.b32.xlu2 %v673_v54, %s2908_s14 }
 0x13e   : > { %v3242_v56 = vpop.permute.xlu1 %529 }
 0x13f   : > { %v3244_v58 = vpop.permute.xlu2 %654 }
 0x140   : > { %4823 = vst [vmem:[#allocation30_spill] sm:$0xff] %v3244_v58  ;;  %v676_v60 = vmul.f32 %v3244_v58, %v3087_v24 }
 0x141   : > { %2762 = vset.pattern.permute.xlu1 %v4724_v30 }
 0x142   : > { %695 = vrot.lane.b32.xlu2 %v676_v60, %s2908_s14  ;;  %v3273_v60 = vpop.permute.xlu0 %451 }
 0x146   : > { %v3249_v62 = vpop.permute.xlu1 %453 }
 0x147   : > { %v3280_v7 = vpop.permute.xlu2 %662 }
 0x148   : > { %4829 = vst [vmem:[#allocation36_spill] sm:$0xff] %v3280_v7  ;;  %v678_v48 = vmul.f32 %v3280_v7, %v3087_v24 }
 0x14a   : > { %v3284_v20 = vpop.permute.xlu0 %457 }
 0x14e   : > { %v3251_v63 = vpop.permute.xlu1 %459 }
 0x14f   : > { %4824 = vst [vmem:[#allocation31_spill] sm:$0xff] %v3251_v63 }
 0x156   : > { %v3253_v0 = vpop.permute.xlu1 %535 }
 0x15e   : > { %v3255_v1 = vpop.permute.xlu1 %541 }
 0x15f   : > { %4825 = vst [vmem:[#allocation32_spill] sm:$0xff] %v3255_v1 }
 0x166   : > { %v3257_v5 = vpop.permute.xlu1 %586 }
 0x167   : > { %4826 = vst [vmem:[#allocation33_spill] sm:$0xff] %v3257_v5  ;;  %v599_v11 = vmul.f32 %v3257_v5, %v3087_v24 }
 0x169   : > { %621 = vrot.lane.b32.xlu0 %v599_v11, %s2907_s13 }
 0x16e   : > { %v3264_v17 = vpop.permute.xlu1 %611 }
 0x171   : > { %646 = vperm.xlu0 %2760, %v3029_v10  }
 0x176   : > { %v3269_v45 = vpop.permute.xlu1 %617 }
 0x179   : > { %666 = vperm.xlu0 %2760, %v3038_v16  }
 0x181   : > { %2764 = vset.pattern.permute.xlu0 %v4724_v30  ;;  %v3287_v30 = vpop.permute.xlu0 %463 }
 0x182   : > { %4830 = vst [vmem:[#allocation37_spill] sm:$0xff] %v3287_v30 }
 0x189   : > { %v3290_v3 = vpop.permute.xlu0 %533 }
 0x193   : > { %v3271_v54 = vpop.permute.xlu1 %623 }
 0x194   : > { %4827 = vst [vmem:[#allocation34_spill] sm:$0xff] %v3271_v54  ;;  %v3341_v54 = vpop.permute.xlu2 %689 }
 0x19b   : > { %v3275_v11 = vpop.permute.xlu1 %650 }
 0x19c   : > { %4828 = vst [vmem:[#allocation35_spill] sm:$0xff] %v3275_v11  ;;  %v675_v21 = vmul.f32 %v3275_v11, %v3087_v24  ;;  %v3343_v38 = vpop.permute.xlu2 %695 }
 0x19e   : > { %693 = vrot.lane.b32.xlu1 %v675_v21, %s2908_s14  ;;  %v3294_v21 = vpop.permute.xlu0 %539 }
 0x19f   : > { %4831 = vst [vmem:[#allocation38_spill] sm:$0xff] %v3294_v21 }
 0x1a3   : > { %v3307_v2 = vpop.permute.xlu1 %658 }
 0x1a4   : > { %4834 = vst [vmem:[#allocation41_spill] sm:$0xff] %v3307_v2  ;;  %v677_v47 = vmul.f32 %v3307_v2, %v3087_v24 }
 0x1a6   : > { %699 = vrot.lane.b32.xlu1 %v678_v48, %s2908_s14  ;;  %v3296_v11 = vpop.permute.xlu0 %609 }
 0x1ab   : > { %v3317_v59 = vpop.permute.xlu1 %670 }
 0x1ac   : > { %4836 = vst [vmem:[#allocation43_spill] sm:$0xff] %v3317_v59 }
 0x1ae   : > { %722 = vperm.xlu1 %2762, %v3045_v19   ;;  %v3298_v42 = vpop.permute.xlu0 %615 }
 0x1b6   : > { %734 = vperm.xlu1 %2762, %v3036_v15  }
 0x1be   : > { %742 = vperm.xlu1 %2762, %v3034_v14  }
 0x1db   : > { %v3300_v7 = vpop.permute.xlu0 %621 }
 0x1dc   : > { %4832 = vst [vmem:[#allocation39_spill] sm:$0xff] %v3300_v7 }
 0x1e3   : > { %v3302_v4 = vpop.permute.xlu0 %646 }
 0x1e4   : > { %4833 = vst [vmem:[#allocation40_spill] sm:$0xff] %v3302_v4  ;;  %v674_v48 = vmul.f32 %v3302_v4, %v3087_v24  ;;  %v680_v4 = vmul.f32 %v3317_v59, %v3087_v24 }
 0x1e6   : > { %691 = vrot.lane.b32.xlu0 %v674_v48, %s2908_s14 }
 0x1eb   : > { %v3309_v5 = vpop.permute.xlu0 %666 }
 0x1ec   : > { %4835 = vst [vmem:[#allocation42_spill] sm:$0xff] %v3309_v5  ;;  %v679_v6 = vmul.f32 %v3309_v5, %v3087_v24  ;;  %v4746_v5 = vmov 6  }
 0x1ed   : > { %2766 = vset.pattern.permute.xlu1 %v4746_v5 }
 0x1ee   : > { %697 = vrot.lane.b32.xlu0 %v677_v47, %s2908_s14  ;;  %701 = vrot.lane.b32.xlu2 %v679_v6, %s2908_s14 }
 0x1f6   : > { %703 = vrot.lane.b32.xlu0 %v680_v4, %s2908_s14  ;;  %726 = vperm.xlu2 %2763, %v3029_v10  }
 0x1fe   : > { %730 = vperm.xlu0 %2764, %v3027_v9   ;;  %738 = vperm.xlu2 %2763, %v3025_v8  }
 0x206   : > { %750 = vperm.xlu0 %2764, %v3043_v18   ;;  %746 = vperm.xlu2 %2763, %v3038_v16  }
 0x20e   : > { %2765 = vset.pattern.permute.xlu0 %v4746_v5  ;;  %2767 = vset.pattern.permute.xlu2 %v4746_v5 }
 0x210   : > { %v3327_v47 = vpop.permute.xlu1 %693 }
 0x218   : > { %v3329_v6 = vpop.permute.xlu1 %699 }
 0x219   : > { %4837 = vst [vmem:[#allocation44_spill] sm:$0xff] %v3329_v6 }
 0x220   : > { %v3331_v48 = vpop.permute.xlu1 %722 }
 0x221   : > { %4838 = vst [vmem:[#allocation45_spill] sm:$0xff] %v3331_v48  ;;  %v753_v59 = vmul.f32 %v3331_v48, %v3087_v24 }
 0x223   : > { %769 = vrot.lane.b32.xlu1 %v753_v59, %s2910_s15 }
 0x228   : > { %v3336_v4 = vpop.permute.xlu1 %734 }
 0x229   : > { %4839 = vst [vmem:[#allocation46_spill] sm:$0xff] %v3336_v4  ;;  %v756_v2 = vmul.f32 %v3336_v4, %v3087_v24 }
 0x22b   : > { %775 = vrot.lane.b32.xlu1 %v756_v2, %s2910_s15 }
 0x248   : > { %v3345_v51 = vpop.permute.xlu2 %701 }
 0x249   : > { %4840 = vst [vmem:[#allocation47_spill] sm:$0xff] %v3345_v51 }
 0x250   : > { %v3350_v59 = vpop.permute.xlu2 %726 }
 0x251   : > { %4841 = vst [vmem:[#allocation48_spill] sm:$0xff] %v3350_v59  ;;  %v754_v4 = vmul.f32 %v3350_v59, %v3087_v24 }
 0x253   : > { %771 = vrot.lane.b32.xlu2 %v754_v4, %s2910_s15 }
 0x258   : > { %v3355_v2 = vpop.permute.xlu0 %691  ;;  %v3357_v48 = vpop.permute.xlu2 %738 }
 0x259   : > { %4842 = vst [vmem:[#allocation49_spill] sm:$0xff] %v3357_v48  ;;  %v757_v55 = vmul.f32 %v3357_v48, %v3087_v24 }
 0x25b   : > { %777 = vrot.lane.b32.xlu2 %v757_v55, %s2910_s15  ;;  %v3378_v55 = vpop.permute.xlu1 %742 }
 0x25c   : > { %4847 = vst [vmem:[#allocation54_spill] sm:$0xff] %v3378_v55 }
 0x260   : > { %v3362_v30 = vpop.permute.xlu0 %697  ;;  %v3364_v36 = vpop.permute.xlu2 %746 }
 0x261   : > { %4843 = vst [vmem:[#allocation50_spill] sm:$0xff] %v3362_v30  ;;  %v759_v5 = vmul.f32 %v3364_v36, %v3087_v24 }
 0x262   : > { %4844 = vst [vmem:[#allocation51_spill] sm:$0xff] %v3364_v36 }
 0x263   : > { %781 = vrot.lane.b32.xlu1 %v759_v5, %s2910_s15  ;;  %v758_v5 = vmul.f32 %v3378_v55, %v3087_v24 }
 0x268   : > { %v3369_v59 = vpop.permute.xlu0 %703 }
 0x269   : > { %4845 = vst [vmem:[#allocation52_spill] sm:$0xff] %v3369_v59  ;;  %v4758_v59 = vmov 7  }
 0x26b   : > { %806 = vperm.xlu1 %2766, %v3029_v10  }
 0x270   : > { %v3372_v4 = vpop.permute.xlu0 %730 }
 0x271   : > { %4846 = vst [vmem:[#allocation53_spill] sm:$0xff] %v3372_v4  ;;  %v755_v48 = vmul.f32 %v3372_v4, %v3087_v24 }
 0x273   : > { %773 = vrot.lane.b32.xlu0 %v755_v48, %s2910_s15  ;;  %814 = vperm.xlu1 %2766, %v3036_v15  }
 0x278   : > { %v3380_v61 = vpop.permute.xlu0 %750 }
 0x279   : > { %4848 = vst [vmem:[#allocation55_spill] sm:$0xff] %v3380_v61  ;;  %v760_v36 = vmul.f32 %v3380_v61, %v3087_v24 }
 0x27b   : > { %779 = vrot.lane.b32.xlu0 %v758_v5, %s2910_s15  ;;  %783 = vrot.lane.b32.xlu2 %v760_v36, %s2910_s15 }
 0x27c   : > { %826 = vperm.xlu1 %2766, %v3038_v16  }
 0x283   : > { %802 = vperm.xlu0 %2765, %v3045_v19   ;;  %810 = vperm.xlu2 %2767, %v3027_v9  }
 0x284   : > { %2770 = vset.pattern.permute.xlu1 %v4758_v59 }
 0x28b   : > { %822 = vperm.xlu0 %2765, %v3034_v14   ;;  %818 = vperm.xlu2 %2767, %v3025_v8  }
 0x293   : > { %830 = vperm.xlu2 %2767, %v3043_v18   ;;  %2769 = vset.pattern.permute.xlu0 %v4758_v59 }
 0x295   : > { %v3394_v48 = vpop.permute.xlu1 %769 }
 0x29b   : > { %2768 = vset.pattern.permute.xlu2 %v4758_v59 }
 0x29d   : > { %v3398_v4 = vpop.permute.xlu1 %775 }
 0x2ad   : > { %v3396_v55 = vpop.permute.xlu2 %771 }
 0x2b5   : > { %v3400_v5 = vpop.permute.xlu2 %777 }
 0x2b6   : > { %4849 = vst [vmem:[#allocation56_spill] sm:$0xff] %v3400_v5 }
 0x2d5   : > { %v3402_v36 = vpop.permute.xlu1 %781  ;;  %v3404_v61 = vpop.permute.xlu2 %783 }
 0x2d6   : > { %4850 = vst [vmem:[#allocation57_spill] sm:$0xff] %v3402_v36 }
 0x2d7   : > { %4851 = vst [vmem:[#allocation58_spill] sm:$0xff] %v3404_v61 }
 0x2dd   : > { %v3409_v58 = vpop.permute.xlu1 %806  ;;  %v3411_v33 = vpop.permute.xlu2 %810 }
 0x2de   : > { %4852 = vst [vmem:[#allocation59_spill] sm:$0xff] %v3409_v58  ;;  %v834_v51 = vmul.f32 %v3409_v58, %v3087_v24  ;;  %v835_v39 = vmul.f32 %v3411_v33, %v3087_v24 }
 0x2df   : > { %4853 = vst [vmem:[#allocation60_spill] sm:$0xff] %v3411_v33 }
 0x2e0   : > { %851 = vrot.lane.b32.xlu1 %v834_v51, %s2913_s16  ;;  %853 = vrot.lane.b32.xlu2 %v835_v39, %s2913_s16 }
 0x2e5   : > { %v3419_v61 = vpop.permute.xlu0 %773  ;;  %v3421_v36 = vpop.permute.xlu2 %818 }
 0x2e6   : > { %4854 = vst [vmem:[#allocation61_spill] sm:$0xff] %v3421_v36  ;;  %v837_v59 = vmul.f32 %v3421_v36, %v3087_v24  ;;  %v3438_v40 = vpop.permute.xlu1 %814 }
 0x2e7   : > { %4858 = vst [vmem:[#allocation65_spill] sm:$0xff] %v3438_v40  ;;  %v836_v36 = vmul.f32 %v3438_v40, %v3087_v24 }
 0x2e8   : > { %857 = vrot.lane.b32.xlu1 %v837_v59, %s2913_s16 }
 0x2ed   : > { %v3426_v53 = vpop.permute.xlu0 %779  ;;  %v3428_v58 = vpop.permute.xlu2 %830 }
 0x2ee   : > { %4855 = vst [vmem:[#allocation62_spill] sm:$0xff] %v3426_v53  ;;  %v840_v33 = vmul.f32 %v3428_v58, %v3087_v24 }
 0x2ef   : > { %4856 = vst [vmem:[#allocation63_spill] sm:$0xff] %v3428_v58 }
 0x2f0   : > { %863 = vrot.lane.b32.xlu1 %v840_v33, %s2913_s16  ;;  %v3450_v33 = vpop.permute.xlu1 %826 }
 0x2f1   : > { %4860 = vst [vmem:[#allocation67_spill] sm:$0xff] %v3450_v33 }
 0x2f5   : > { %v3433_v51 = vpop.permute.xlu0 %802 }
 0x2f6   : > { %4857 = vst [vmem:[#allocation64_spill] sm:$0xff] %v3433_v51  ;;  %v833_v39 = vmul.f32 %v3433_v51, %v3087_v24 }
 0x2f8   : > { %849 = vrot.lane.b32.xlu0 %v833_v39, %s2913_s16  ;;  %890 = vperm.xlu1 %2770, %v3027_v9   ;;  %v839_v39 = vmul.f32 %v3450_v33, %v3087_v24  ;;  %v4861_v9 = vmov 0  }
 0x2fd   : > { %v3441_v59 = vpop.permute.xlu0 %822 }
 0x2fe   : > { %4859 = vst [vmem:[#allocation66_spill] sm:$0xff] %v3441_v59  ;;  %v838_v58 = vmul.f32 %v3441_v59, %v3087_v24 }
 0x300   : > { %855 = vrot.lane.b32.xlu0 %v836_v36, %s2913_s16  ;;  %859 = vrot.lane.b32.xlu2 %v838_v58, %s2913_s16 }
 0x301   : > { %898 = vperm.xlu1 %2770, %v3025_v8  }
 0x308   : > { %861 = vrot.lane.b32.xlu0 %v839_v39, %s2913_s16  ;;  %882 = vperm.xlu2 %2768, %v3045_v19  }
 0x309   : > { %910 = vperm.xlu1 %2770, %v3043_v18  }
 0x310   : > { %886 = vperm.xlu0 %2769, %v3029_v10   ;;  %894 = vperm.xlu2 %2768, %v3036_v15  }
 0x311   : > { %2772 = vset.pattern.permute.xlu1 %v4861_v9 }
 0x318   : > { %906 = vperm.xlu0 %2769, %v3038_v16   ;;  %902 = vperm.xlu2 %2768, %v3034_v14  }
 0x320   : > { %2771 = vset.pattern.permute.xlu0 %v4861_v9  ;;  %2773 = vset.pattern.permute.xlu2 %v4861_v9 }
 0x321   : > { %354 = vperm.xlu0 %2771, %v3045_v19  }
 0x329   : > { %358 = vperm.xlu0 %2771, %v3029_v10  }
 0x331   : > { %378 = vperm.xlu0 %2771, %v3038_v16  }
 0x33a   : > { %v3467_v8 = vpop.permute.xlu2 %853 }
 0x352   : > { %v3469_v18 = vpop.permute.xlu1 %851 }
 0x35a   : > { %v3471_v15 = vpop.permute.xlu2 %859  ;;  %v3473_v58 = vpop.permute.xlu1 %857 }
 0x35b   : > { %4862 = vst [vmem:[#allocation68_spill] sm:$0xff] %v3471_v15 }
 0x35c   : > { %4863 = vst [vmem:[#allocation69_spill] sm:$0xff] %v3473_v58 }
 0x362   : > { %v3475_v36 = vpop.permute.xlu2 %882  ;;  %v3477_v14 = vpop.permute.xlu1 %863 }
 0x363   : > { %4864 = vst [vmem:[#allocation70_spill] sm:$0xff] %v3475_v36  ;;  %v913_v39 = vmul.f32 %v3475_v36, %v3087_v24 }
 0x364   : > { %4865 = vst [vmem:[#allocation71_spill] sm:$0xff] %v3477_v14 }
 0x365   : > { %929 = vrot.lane.b32.xlu2 %v913_v39, %s2914_s17 }
 0x36a   : > { %v3482_v10 = vpop.permute.xlu0 %849  ;;  %v3484_v16 = vpop.permute.xlu2 %894 }
 0x36b   : > { %4866 = vst [vmem:[#allocation72_spill] sm:$0xff] %v3484_v16  ;;  %v3486_v19 = vpop.permute.xlu1 %890  ;;  %v916_v9 = vmul.f32 %v3484_v16, %v3087_v24  ;;  %v317_v16 = vld [vmem:[%s4710_s2] sm:$0xff] }
 0x36c   : > { %4867 = vst [vmem:[#allocation73_spill] sm:$0xff] %v3486_v19  ;;  %v915_v33 = vmul.f32 %v3486_v19, %v3087_v24  ;;  %v961_v19 = vperm.slane %v317_v16, 0  ;;  %v324_v57 = vrot.slane %v317_v16, 6 }
 0x36d   : > { %935 = vrot.lane.b32.xlu2 %v916_v9, %s2914_s17  ;;  %v321_v9 = vrot.slane %v317_v16, 3 }
 0x36e   : > { %933 = vrot.lane.b32.xlu1 %v915_v33, %s2914_s17  ;;  %v967_v26 = vperm.slane %v324_v57, 0 }
 0x36f   : > { %v964_v33 = vperm.slane %v321_v9, 0  ;;  %v319_v9 = vrot.slane %v317_v16, 1 }
 0x372   : > { %v3494_v40 = vpop.permute.xlu0 %855  ;;  %v3496_v51 = vpop.permute.xlu2 %902 }
 0x373   : > { %4868 = vst [vmem:[#allocation74_spill] sm:$0xff] %v3496_v51  ;;  %v918_v39 = vmul.f32 %v3496_v51, %v3087_v24  ;;  %v3511_v51 = vpop.permute.xlu1 %898 }
 0x374   : > { %4871 = vst [vmem:[#allocation77_spill] sm:$0xff] %v3511_v51 }
 0x376   : > { %939 = vrot.lane.b32.xlu1 %v918_v39, %s2914_s17  ;;  %v323_v39 = vrot.slane %v317_v16, 5 }
 0x378   : > { %v966_v1 = vperm.slane %v323_v39, 0 }
 0x37a   : > { %v3504_v36 = vpop.permute.xlu0 %861 }
 0x37b   : > { %4869 = vst [vmem:[#allocation75_spill] sm:$0xff] %v3504_v36  ;;  %v917_v36 = vmul.f32 %v3511_v51, %v3087_v24 }
 0x37e   : > { %970 = vperm.xlu1 %2772, %v961_v19  }
 0x382   : > { %v3506_v59 = vpop.permute.xlu0 %886 }
 0x383   : > { %4870 = vst [vmem:[#allocation76_spill] sm:$0xff] %v3506_v59  ;;  %v914_v14 = vmul.f32 %v3506_v59, %v3087_v24  ;;  %v962_v59 = vperm.slane %v319_v9, 0  ;;  %v325_v9 = vrot.slane %v317_v16, 7 }
 0x385   : > { %931 = vrot.lane.b32.xlu0 %v914_v14, %s2914_s17  ;;  %v326_v14 = vld [vmem:[%s4711_s3] sm:$0xff] }
 0x386   : > { %982 = vperm.xlu1 %2772, %v964_v33   ;;  %v3524_v33 = vpop.permute.xlu1 %910  ;;  %v3526_v39 = vperm.slane %v326_v14, 0  ;;  %v1023_v53 = vrot.slane %v326_v14, 6  ;;  %v1018_v6 = vrot.slane %v326_v14, 1 }
 0x387   : > { %4873 = vst [vmem:[#allocation79_spill] sm:$0xff] %v3524_v33  ;;  %v920_v51 = vmul.f32 %v3524_v33, %v3087_v24  ;;  %v968_v33 = vperm.slane %v325_v9, 0 }
 0x38a   : > { %v3513_v7 = vpop.permute.xlu0 %906 }
 0x38b   : > { %4872 = vst [vmem:[#allocation78_spill] sm:$0xff] %v3513_v7  ;;  %v919_v19 = vmul.f32 %v3513_v7, %v3087_v24  ;;  %v322_v7 = vrot.slane %v317_v16, 4 }
 0x38d   : > { %937 = vrot.lane.b32.xlu0 %v917_v36, %s2914_s17  ;;  %941 = vrot.lane.b32.xlu2 %v919_v19, %s2914_s17  ;;  %v320_v36 = vrot.slane %v317_v16, 2  ;;  %v965_v15 = vperm.slane %v322_v7, 0  ;;  %v1021_v16 = vrot.slane %v326_v14, 4 }
 0x38e   : > { %990 = vperm.xlu1 %2772, %v966_v1   ;;  %v1020_v1 = vrot.slane %v326_v14, 3 }
 0x38f   : > { %v963_v19 = vperm.slane %v320_v36, 0  ;;  %v3540_v36 = vperm.slane %v1018_v6, 0 }
 0x390   : > { %v3532_v49 = vperm.slane %v1020_v1, 0  ;;  %v4874_v1 = vmov 2  }
 0x395   : > { %943 = vrot.lane.b32.xlu0 %v920_v51, %s2914_s17  ;;  %974 = vperm.xlu2 %2773, %v962_v59   ;;  %v3535_v51 = vperm.slane %v1023_v53, 0  ;;  %v1019_v59 = vrot.slane %v326_v14, 2  ;;  %v1024_v53 = vrot.slane %v326_v14, 7 }
 0x396   : > { %1034 = vperm.xlu1 %2772, %v3526_v39  }
 0x397   : > { %v3538_v7 = vperm.slane %v1019_v59, 0  ;;  %v3553_v6 = vperm.slane %v1024_v53, 0  ;;  %v4876_v59 = vmov 6  }
 0x39d   : > { %978 = vperm.xlu0 %2771, %v963_v19   ;;  %986 = vperm.xlu2 %2773, %v965_v15   ;;  %v1022_v15 = vrot.slane %v326_v14, 5  ;;  %v3573_v19 = vpop.permute.xlu0 %354 }
 0x39e   : > { %1046 = vperm.xlu1 %2772, %v3532_v49  }
 0x39f   : > { %v3546_v57 = vperm.slane %v1022_v15, 0 }
 0x3a5   : > { %998 = vperm.xlu0 %2771, %v968_v33   ;;  %994 = vperm.xlu2 %2773, %v967_v26   ;;  %v3548_v26 = vperm.slane %v1021_v16, 0  ;;  %v4875_v33 = vmov 4   ;;  %v3585_v16 = vpop.permute.xlu0 %358 }
 0x3a6   : > { %1058 = vperm.xlu1 %2772, %v3535_v51   ;;  %4877 = vst [vmem:[#allocation80_spill] sm:$0xff] %v3585_v16 }
 0x3ad   : > { %1042 = vperm.xlu0 %2771, %v3538_v7   ;;  %1038 = vperm.xlu2 %2773, %v3540_v36  }
 0x3ae   : > { %2775 = vset.pattern.permute.xlu1 %v4874_v1 }
 0x3af   : > { %1086 = vperm.xlu1 %2775, %v3540_v36  }
 0x3b5   : > { %1054 = vperm.xlu0 %2771, %v3546_v57   ;;  %1050 = vperm.xlu2 %2773, %v3548_v26  }
 0x3b7   : > { %1094 = vperm.xlu1 %2775, %v3532_v49  }
 0x3bd   : > { %2774 = vset.pattern.permute.xlu0 %v4874_v1  ;;  %1062 = vperm.xlu2 %2773, %v3553_v6  }
 0x3be   : > { %1082 = vperm.xlu0 %2774, %v3526_v39  }
 0x3bf   : > { %1106 = vperm.xlu1 %2775, %v3535_v51   ;;  %v3568_v14 = vpop.permute.xlu2 %929 }
 0x3c5   : > { %2776 = vset.pattern.permute.xlu2 %v4874_v1 }
 0x3c6   : > { %1102 = vperm.xlu0 %2774, %v3546_v57   ;;  %1090 = vperm.xlu2 %2776, %v3538_v7  }
 0x3c7   : > { %2778 = vset.pattern.permute.xlu1 %v4875_v33  ;;  %v3576_v9 = vpop.permute.xlu2 %935 }
 0x3c8   : > { %1134 = vperm.xlu1 %2778, %v3540_v36  }
 0x3ce   : > { %2777 = vset.pattern.permute.xlu0 %v4875_v33  ;;  %1098 = vperm.xlu2 %2776, %v3548_v26  }
 0x3cf   : > { %1130 = vperm.xlu0 %2777, %v3526_v39  }
 0x3d0   : > { %1142 = vperm.xlu1 %2778, %v3532_v49  }
 0x3d6   : > { %1110 = vperm.xlu2 %2776, %v3553_v6  }
 0x3d7   : > { %1150 = vperm.xlu0 %2777, %v3546_v57  }
 0x3d8   : > { %1154 = vperm.xlu1 %2778, %v3535_v51  }
 0x3de   : > { %2779 = vset.pattern.permute.xlu2 %v4875_v33  ;;  %v3594_v33 = vpop.permute.xlu0 %378 }
 0x3df   : > { %2780 = vset.pattern.permute.xlu0 %v4876_v59  ;;  %1138 = vperm.xlu2 %2779, %v3538_v7   ;;  %4880 = vst [vmem:[#allocation83_spill] sm:$0xff] %v3594_v33 }
 0x3e0   : > { %v3580_v15 = vpop.permute.xlu1 %933  ;;  %2781 = vset.pattern.permute.xlu1 %v4876_v59  ;;  %1178 = vperm.xlu0 %2780, %v3526_v39  }
 0x3e1   : > { %1182 = vperm.xlu1 %2781, %v3540_v36  }
 0x3e7   : > { %1146 = vperm.xlu2 %2779, %v3548_v26   ;;  %v3588_v1 = vpop.permute.xlu2 %941 }
 0x3e8   : > { %4878 = vst [vmem:[#allocation81_spill] sm:$0xff] %v3588_v1  ;;  %v3590_v53 = vpop.permute.xlu1 %939  ;;  %1198 = vperm.xlu0 %2780, %v3546_v57  }
 0x3e9   : > { %4879 = vst [vmem:[#allocation82_spill] sm:$0xff] %v3590_v53  ;;  %1190 = vperm.xlu1 %2781, %v3532_v49  }
 0x3ef   : > { %1158 = vperm.xlu2 %2779, %v3553_v6   ;;  %v3597_v50 = vpop.permute.xlu2 %974 }
 0x3f0   : > { %v3599_v44 = vpop.permute.xlu1 %970  ;;  %2783 = vset.pattern.permute.xlu0 %v2915_v52 }
 0x3f1   : > { %1202 = vperm.xlu1 %2781, %v3535_v51   ;;  %1226 = vperm.xlu0 %2783, %v3526_v39  }
 0x3f7   : > { %v3603_v1 = vpop.permute.xlu0 %931  ;;  %2782 = vset.pattern.permute.xlu2 %v4876_v59  ;;  %v3606_v53 = vpop.permute.xlu2 %986  ;;  %v2916_v59 = vmov 10  }
 0x3f8   : > { %4881 = vst [vmem:[#allocation84_spill] sm:$0xff] %v3606_v53  ;;  %v3608_v21 = vpop.permute.xlu1 %982  ;;  %1186 = vperm.xlu2 %2782, %v3538_v7  }
 0x3f9   : > { %4882 = vst [vmem:[#allocation85_spill] sm:$0xff] %v3608_v21  ;;  %2784 = vset.pattern.permute.xlu1 %v2915_v52  ;;  %1246 = vperm.xlu0 %2783, %v3546_v57  }
 0x3fa   : > { %1230 = vperm.xlu1 %2784, %v3540_v36  }
 0x3ff   : > { %v3613_v33 = vpop.permute.xlu0 %937  ;;  %v3615_v63 = vpop.permute.xlu2 %994 }
 0x400   : > { %4883 = vst [vmem:[#allocation86_spill] sm:$0xff] %v3613_v33  ;;  %v3617_v29 = vpop.permute.xlu1 %990  ;;  %1194 = vperm.xlu2 %2782, %v3548_v26  }
 0x401   : > { %4884 = vst [vmem:[#allocation87_spill] sm:$0xff] %v3615_v63  ;;  %2786 = vset.pattern.permute.xlu0 %v2916_v59 }
 0x402   : > { %4885 = vst [vmem:[#allocation88_spill] sm:$0xff] %v3617_v29  ;;  %1238 = vperm.xlu1 %2784, %v3532_v49   ;;  %1274 = vperm.xlu0 %2786, %v3526_v39  }
 0x407   : > { %v3622_v53 = vpop.permute.xlu0 %943  ;;  %v3624_v23 = vpop.permute.xlu2 %1038 }
 0x408   : > { %4886 = vst [vmem:[#allocation89_spill] sm:$0xff] %v3622_v53  ;;  %v3626_v43 = vpop.permute.xlu1 %1034  ;;  %1206 = vperm.xlu2 %2782, %v3553_v6   ;;  %v4790_v53 = vmov 12  }
 0x409   : > { %4887 = vst [vmem:[#allocation90_spill] sm:$0xff] %v3624_v23 }
 0x40a   : > { %1250 = vperm.xlu1 %2784, %v3535_v51   ;;  %1294 = vperm.xlu0 %2786, %v3546_v57  }
 0x40f   : > { %v3631_v63 = vpop.permute.xlu0 %978  ;;  %v3633_v29 = vpop.permute.xlu2 %1050 }
 0x410   : > { %4888 = vst [vmem:[#allocation91_spill] sm:$0xff] %v3633_v29  ;;  %v3635_v33 = vpop.permute.xlu1 %1046  ;;  %2785 = vset.pattern.permute.xlu2 %v2915_v52 }
 0x411   : > { %4889 = vst [vmem:[#allocation92_spill] sm:$0xff] %v3635_v33  ;;  %1234 = vperm.xlu2 %2785, %v3538_v7   ;;  %v386_v33 = vmul.f32 %v3585_v16, %v3087_v24 }
 0x412   : > { %2787 = vset.pattern.permute.xlu1 %v2916_v59  ;;  %2789 = vset.pattern.permute.xlu0 %v4790_v53 }
 0x413   : > { %1278 = vperm.xlu1 %2787, %v3540_v36   ;;  %1322 = vperm.xlu0 %2789, %v3526_v39  }
 0x417   : > { %v3641_v23 = vpop.permute.xlu0 %998  ;;  %v3643_v58 = vpop.permute.xlu2 %1062 }
 0x418   : > { %4890 = vst [vmem:[#allocation93_spill] sm:$0xff] %v3641_v23  ;;  %v3645_v5 = vpop.permute.xlu1 %1058 }
 0x419   : > { %4891 = vst [vmem:[#allocation94_spill] sm:$0xff] %v3643_v58  ;;  %1242 = vperm.xlu2 %2785, %v3548_v26   ;;  %v4794_v58 = vmov 14  }
 0x41a   : > { %4892 = vst [vmem:[#allocation95_spill] sm:$0xff] %v3645_v5  ;;  %v385_v5 = vmul.f32 %v3573_v19, %v3087_v24 }
 0x41b   : > { %1286 = vperm.xlu1 %2787, %v3532_v49   ;;  %1342 = vperm.xlu0 %2789, %v3546_v57  }
 0x41c   : > { %v473_v16 = vadd.f32 %v3204_v12, %v385_v5 }
 0x41f   : > { %v3650_v52 = vpop.permute.xlu0 %1042 }
 0x420   : > { %4893 = vst [vmem:[#allocation96_spill] sm:$0xff] %v3650_v52  ;;  %v3652_v29 = vpop.permute.xlu2 %1090  ;;  %v474_v52 = vadd.f32 %v3273_v60, %v386_v33  ;;  %v553_v60 = vadd.f32 %v3242_v56, %v473_v16 }
 0x421   : > { %4894 = vst [vmem:[#allocation97_spill] sm:$0xff] %v3652_v29  ;;  %v3654_v53 = vpop.permute.xlu1 %1086  ;;  %1254 = vperm.xlu2 %2785, %v3553_v6  }
 0x422   : > { %4895 = vst [vmem:[#allocation98_spill] sm:$0xff] %v3654_v53  ;;  %v554_v30 = vadd.f32 %v3219_v31, %v474_v52  ;;  %v3686_v31 = vld [vmem:[%s3084_s29 + $0x8] sm:$0xff]  ;;  %v633_v56 = vadd.f32 %v3296_v11, %v553_v60 }
 0x423   : > { %1298 = vperm.xlu1 %2787, %v3535_v51   ;;  %2792 = vset.pattern.permute.xlu0 %v4794_v58  ;;  %v4898_v58 = vmov 12   ;;  %v1435_v52 = vmul.f32 %v3686_v31, %v3089_v25  ;;  %v1438_v11 = vmul.f32 %v3686_v31, %v3096_v28  ;;  %v388_v28 = vmul.f32 %v3106_v32, %v3087_v24 }
 0x424   : > { %1370 = vperm.xlu0 %2792, %v3526_v39   ;;  %v634_v33 = vadd.f32 %v3264_v17, %v554_v30  ;;  %v4901_v30 = vmov 1  }
 0x426   : > { %v714_v17 = vadd.f32 %v3355_v2, %v634_v33 }
 0x427   : > { %v3665_v29 = vpop.permute.xlu0 %1054 }
 0x428   : > { %v3667_v53 = vpop.permute.xlu2 %1098  ;;  %v794_v25 = vadd.f32 %v3396_v55, %v714_v17  ;;  %v476_v55 = vadd.f32 %v3208_v13, %v388_v28 }
 0x429   : > { %4896 = vst [vmem:[#allocation99_spill] sm:$0xff] %v3667_v53  ;;  %v3669_v23 = vpop.permute.xlu1 %1094  ;;  %2788 = vset.pattern.permute.xlu2 %v2916_v59  ;;  %v387_v53 = vmul.f32 %v3094_v27, %v3087_v24 }
 0x42a   : > { %4897 = vst [vmem:[#allocation100_spill] sm:$0xff] %v3669_v23  ;;  %1282 = vperm.xlu2 %2788, %v3538_v7   ;;  %v874_v60 = vadd.f32 %v3469_v18, %v794_v25 }
 0x42b   : > { %2790 = vset.pattern.permute.xlu1 %v4898_v58  ;;  %v475_v23 = vadd.f32 %v3249_v62, %v387_v53 }
 0x42c   : > { %1326 = vperm.xlu1 %2790, %v3540_v36   ;;  %1390 = vperm.xlu0 %2792, %v3546_v57  }
 0x42d   : > { %v555_v16 = vadd.f32 %v3290_v3, %v475_v23  ;;  %v954_v23 = vadd.f32 %v3603_v1, %v874_v60  ;;  %v556_v1 = vadd.f32 %v3253_v0, %v476_v55  ;;  %v1484_v60 = vmul.f32 %v3686_v31, %v3117_v37 }
 0x42e   : > { %v1487_v55 = vmul.f32 %v3686_v31, %v3126_v41  ;;  %v4907_v41 = vld [vmem:[#allocation56_spill] sm:$0xff] }
 0x42f   : > { %v635_v2 = vadd.f32 %v3230_v46, %v555_v16  ;;  %v636_v13 = vadd.f32 %v3298_v42, %v556_v1 }
 0x430   : > { %v3681_v59 = vpop.permute.xlu0 %1082  ;;  %v3683_v12 = vpop.permute.xlu2 %1110 }
 0x431   : > { %4899 = vst [vmem:[#allocation101_spill] sm:$0xff] %v3683_v12  ;;  %v3688_v5 = vpop.permute.xlu1 %1106  ;;  %v713_v12 = vadd.f32 %v3341_v54, %v633_v56  ;;  %v715_v3 = vadd.f32 %v3327_v47, %v635_v2  ;;  %v1002_v47 = vadd.f32 %v3597_v50, %v954_v23  ;;  %v1441_v56 = vmul.f32 %v3686_v31, %v3110_v34 }
 0x432   : > { %4900 = vst [vmem:[#allocation102_spill] sm:$0xff] %v3688_v5  ;;  %1290 = vperm.xlu2 %2788, %v3548_v26   ;;  %v716_v34 = vadd.f32 %v3343_v38, %v636_v13  ;;  %v389_v38 = vmul.f32 %v3076_v22, %v3087_v24  ;;  %v4909_v13 = vld [vmem:[#allocation12_spill] sm:$0xff] }
 0x433   : > { %v793_v53 = vadd.f32 %v3394_v48, %v713_v12  ;;  %v795_v46 = vadd.f32 %v3419_v61, %v715_v3 }
 0x434   : > { %1334 = vperm.xlu1 %2790, %v3532_v49   ;;  %1451 = vrot.lane.b32.xlu0 %v1435_v52, %s2904_s8  ;;  %v796_v42 = vadd.f32 %v3398_v4, %v716_v34  ;;  %v4910_v34 = vld [vmem:[#allocation86_spill] sm:$0xff] }
 0x435   : > { %2796 = vset.pattern.permute.xlu0 %v4901_v30  ;;  %v873_v54 = vadd.f32 %v3482_v10, %v793_v53  ;;  %v875_v48 = vadd.f32 %v3467_v8, %v795_v46  ;;  %v3736_v8 = vmax.f32 %v1002_v47, 0.0 }
 0x437   : > { %v953_v18 = vadd.f32 %v3568_v14, %v873_v54  ;;  %v955_v61 = vadd.f32 %v3580_v15, %v875_v48  ;;  %v4903_v14 = vmov 14   ;;  %v1113_v24 = vmul.f32 %v3681_v59, %v3736_v8 }
 0x438   : > { %v1103_v5 = vpop.permute.xlu0 %1102 }
 0x439   : > { %v3702_v62 = vpop.permute.xlu2 %1138  ;;  %v1001_v10 = vadd.f32 %v3599_v44, %v953_v18  ;;  %v1003_v0 = vadd.f32 %v3631_v63, %v955_v61  ;;  %v4908_v61 = vld [vmem:[#allocation69_spill] sm:$0xff] }
 0x43a   : > { %v3709_v33 = vpop.permute.xlu1 %1134  ;;  %1302 = vperm.xlu2 %2788, %v3553_v6  }
 0x43b   : > { %v3743_v15 = vmax.f32 %v1001_v10, 0.0  ;;  %v3747_v16 = vmax.f32 %v1003_v0, 0.0  ;;  %v1490_v0 = vmul.f32 %v3686_v31, %v4909_v13 }
 0x43c   : > { %1346 = vperm.xlu1 %2790, %v3535_v51   ;;  %1457 = vrot.lane.b32.xlu0 %v1438_v11, %s2904_s8  ;;  %v876_v11 = vadd.f32 %v3494_v40, %v796_v42 }
 0x43d   : > { %v1070_v25 = vmul.f32 %v3665_v29, %v3743_v15  ;;  %v477_v29 = vadd.f32 %v3284_v20, %v389_v38  ;;  %v1065_v37 = vmul.f32 %v3626_v43, %v3743_v15 }
 0x43e   : > { %v956_v23 = vadd.f32 %v3576_v9, %v876_v11  ;;  %v3795_v11 = vld [vmem:[%s3084_s29] sm:$0xff]  ;;  %s2683_s29 = sshll.u32 %s2600_s28, 3  ;;  %s2521_s28 = scalar_lea.sflag [#allocation4], %s3079_s22 }
 0x43f   : > { %v557_v9 = vadd.f32 %v3221_v35, %v477_v29  ;;  %v1121_v20 = vadd.f32 %v1113_v24, %v1065_v37  ;;  %v4906_v35 = vld [vmem:[#allocation50_spill] sm:$0xff]  ;;  %v4914_v29 = vld [vmem:[#allocation31_spill] sm:$0xff]  ;;  %v4915_v37 = vld [vmem:[#allocation84_spill] sm:$0xff] }
 0x440   : > { %v1004_v28 = vadd.f32 %v3608_v21, %v956_v23 }
 0x441   : > { %v1131_v12 = vpop.permute.xlu0 %1130  ;;  %v3725_v52 = vpop.permute.xlu2 %1146  ;;  %v637_v48 = vadd.f32 %v3269_v45, %v557_v9  ;;  %v4916_v9 = vld [vmem:[#allocation38_spill] sm:$0xff] }
 0x442   : > { %4902 = vst [vmem:[#allocation103_spill] sm:$0xff] %v3725_v52  ;;  %v3731_v17 = vpop.permute.xlu1 %1142  ;;  %2791 = vset.pattern.permute.xlu2 %v4898_v58  ;;  %v1118_v58 = vmul.f32 %v1103_v5, %v3736_v8  ;;  %v1161_v46 = vmul.f32 %v1131_v12, %v3747_v16  ;;  %v3773_v54 = vmax.f32 %v1004_v28, 0.0 }
 0x443   : > { %1330 = vperm.xlu2 %2791, %v3538_v7   ;;  %v717_v12 = vadd.f32 %v4906_v35, %v637_v48 }
 0x444   : > { %2793 = vset.pattern.permute.xlu1 %v4903_v14  ;;  %1463 = vrot.lane.b32.xlu0 %v1441_v56, %s2904_s8  ;;  %v1126_v3 = vadd.f32 %v1118_v58, %v1070_v25  ;;  %v1169_v47 = vadd.f32 %v1161_v46, %v1121_v20 }
 0x445   : > { %1374 = vperm.xlu1 %2793, %v3540_v36   ;;  %v797_v45 = vadd.f32 %v4907_v41, %v717_v12  ;;  %v4920_v12 = vld [vmem:[#allocation83_spill] sm:$0xff] }
 0x446   : > { %v391_v41 = vmul.f32 %v3795_v11, %v4920_v12 }
 0x447   : > { %v877_v10 = vadd.f32 %v4908_v61, %v797_v45  ;;  %v4921_v61 = vld [vmem:[#allocation28_spill] sm:$0xff] }
 0x449   : > { %v1151_v2 = vpop.permute.xlu0 %1150  ;;  %v3752_v53 = vpop.permute.xlu2 %1158  ;;  %v957_v58 = vadd.f32 %v4910_v34, %v877_v10 }
 0x44a   : > { %4904 = vst [vmem:[#allocation104_spill] sm:$0xff] %v3752_v53  ;;  %v1166_v5 = vmul.f32 %v1151_v2, %v3747_v16  ;;  %v3759_v4 = vpop.permute.xlu1 %1154  ;;  %v4912_v2 = vld [vmem:[#allocation6_spill] sm:$0xff]  ;;  %v4986_v53 = vld [vmem:[#allocation53_spill] sm:$0xff] }
 0x44b   : > { %1338 = vperm.xlu2 %2791, %v3548_v26   ;;  %v390_v38 = vmul.f32 %v3795_v11, %v4912_v2  ;;  %v1005_v46 = vadd.f32 %v4915_v37, %v957_v58  ;;  %v4923_v58 = vld [vmem:[#allocation25_spill] sm:$0xff]  ;;  %v4951_v37 = vld [vmem:[#allocation16_spill] sm:$0xff] }
 0x44c   : > { %v1174_v40 = vadd.f32 %v1166_v5, %v1126_v3  ;;  %1501 = vrot.lane.b32.xlu0 %v1484_v60, %s2905_s9  ;;  %v4913_v60 = vld [vmem:[#allocation7_spill] sm:$0xff] }
 0x44d   : > { %1382 = vperm.xlu1 %2793, %v3532_v49   ;;  %v1436_v3 = vmul.f32 %v3686_v31, %v4913_v60  ;;  %v478_v28 = vadd.f32 %v4914_v29, %v390_v38  ;;  %v4924_v38 = vld [vmem:[#allocation62_spill] sm:$0xff]  ;;  %v4926_v29 = vld [vmem:[#allocation15_spill] sm:$0xff] }
 0x44f   : > { %v558_v20 = vadd.f32 %v4916_v9, %v478_v28  ;;  %v1442_v28 = vmul.f32 %v3686_v31, %v4926_v29 }
 0x451   : > { %v638_v10 = vadd.f32 %v4921_v61, %v558_v20  ;;  %v4929_v20 = vld [vmem:[#allocation32_spill] sm:$0xff] }
 0x452   : > { %v1179_v18 = vpop.permute.xlu0 %1178  ;;  %v3778_v59 = vpop.permute.xlu2 %1186  ;;  %v4931_v61 = vld [vmem:[#allocation88_spill] sm:$0xff] }
 0x453   : > { %4905 = vst [vmem:[#allocation105_spill] sm:$0xff] %v3778_v59  ;;  %v1209_v1 = vmul.f32 %v1179_v18, %v3773_v54  ;;  %v3781_v43 = vpop.permute.xlu1 %1182  ;;  %1350 = vperm.xlu2 %2791, %v3553_v6   ;;  %v3814_v18 = vmax.f32 %v1005_v46, 0.0  ;;  %v4927_v46 = vld [vmem:[#allocation68_spill] sm:$0xff]  ;;  %v5006_v59 = vld [vmem:[#allocation77_spill] sm:$0xff] }
 0x454   : > { %1507 = vrot.lane.b32.xlu0 %v1487_v55, %s2905_s9  ;;  %v4917_v55 = vld [vmem:[#allocation17_spill] sm:$0xff] }
 0x455   : > { %v1217_v56 = vadd.f32 %v1209_v1, %v1169_v47  ;;  %1394 = vperm.xlu1 %2793, %v3535_v51   ;;  %v1533_v48 = vmul.f32 %v3686_v31, %v4917_v55  ;;  %v4919_v47 = vld [vmem:[#allocation13_spill] sm:$0xff] }
 0x456   : > { %v1439_v1 = vmul.f32 %v3686_v31, %v4919_v47 }
 0x45a   : > { %v1199_v42 = vpop.permute.xlu0 %1198  ;;  %v3792_v25 = vpop.permute.xlu2 %1194 }
 0x45b   : > { %4911 = vst [vmem:[#allocation50_spill] sm:$0xff] %v3792_v25  ;;  %v1214_v5 = vmul.f32 %v1199_v42, %v3773_v54  ;;  %v3802_v23 = vpop.permute.xlu1 %1190  ;;  %2794 = vset.pattern.permute.xlu2 %v4903_v14  ;;  %v479_v42 = vadd.f32 %v4923_v58, %v391_v41  ;;  %v4933_v58 = vld [vmem:[#allocation11_spill] sm:$0xff]  ;;  %v4994_v25 = vld [vmem:[#allocation78_spill] sm:$0xff] }
 0x45c   : > { %1513 = vrot.lane.b32.xlu0 %v1490_v0, %s2905_s9  ;;  %1378 = vperm.xlu2 %2794, %v3538_v7   ;;  %v4922_v0 = vld [vmem:[#allocation44_spill] sm:$0xff] }
 0x45d   : > { %v1222_v24 = vadd.f32 %v1214_v5, %v1174_v40  ;;  %1453 = vrot.lane.b32.xlu1 %v1436_v3, %s2904_s8  ;;  %v718_v34 = vadd.f32 %v4922_v0, %v638_v10  ;;  %v4925_v3 = vld [vmem:[#allocation19_spill] sm:$0xff]  ;;  %v559_v47 = vadd.f32 %v4929_v20, %v479_v42  ;;  %v1437_v42 = vmul.f32 %v3686_v31, %v4933_v58  ;;  %v4942_v58 = vld [vmem:[#allocation21_spill] sm:$0xff] }
 0x45e   : > { %2797 = vset.pattern.permute.xlu1 %v4901_v30  ;;  %v1536_v5 = vmul.f32 %v3686_v31, %v4925_v3  ;;  %v4932_v0 = vld [vmem:[#allocation39_spill] sm:$0xff]  ;;  %v4935_v3 = vld [vmem:[#allocation10_spill] sm:$0xff] }
 0x45f   : > { %v798_v60 = vadd.f32 %v4924_v38, %v718_v34  ;;  %v639_v34 = vadd.f32 %v4932_v0, %v559_v47  ;;  %v4934_v38 = vld [vmem:[#allocation29_spill] sm:$0xff]  ;;  %v4941_v0 = vld [vmem:[#allocation30_spill] sm:$0xff] }
 0x461   : > { %v878_v9 = vadd.f32 %v4927_v46, %v798_v60  ;;  %v1579_v60 = vmul.f32 %v3686_v31, %v4934_v38  ;;  %v1488_v38 = vmul.f32 %v3686_v31, %v4942_v58 }
 0x462   : > { %v3816_v14 = vpop.permute.xlu2 %1206 }
 0x463   : > { %4918 = vst [vmem:[#allocation56_spill] sm:$0xff] %v3816_v14  ;;  %v3820_v35 = vpop.permute.xlu1 %1202  ;;  %v1227_v40 = vpop.permute.xlu0 %1226  ;;  %v4967_v14 = vld [vmem:[#allocation33_spill] sm:$0xff] }
 0x464   : > { %v1257_v45 = vmul.f32 %v1227_v40, %v3814_v18  ;;  %1551 = vrot.lane.b32.xlu0 %v1533_v48, %s2907_s13  ;;  %1386 = vperm.xlu2 %2794, %v3548_v26   ;;  %v4930_v40 = vld [vmem:[#allocation82_spill] sm:$0xff] }
 0x465   : > { %1459 = vrot.lane.b32.xlu1 %v1439_v1, %s2904_s8  ;;  %v958_v41 = vadd.f32 %v4930_v40, %v878_v9  ;;  %v4937_v9 = vld [vmem:[#allocation47_spill] sm:$0xff] }
 0x466   : > { %v1265_v13 = vadd.f32 %v1257_v45, %v1217_v56 }
 0x467   : > { %v1006_v10 = vadd.f32 %v4931_v61, %v958_v41  ;;  %v4940_v41 = vld [vmem:[#allocation8_spill] sm:$0xff]  ;;  %v4950_v61 = vld [vmem:[#allocation42_spill] sm:$0xff] }
 0x469   : > { %v3855_v29 = vmax.f32 %v1006_v10, 0.0  ;;  %v1440_v10 = vmul.f32 %v3686_v31, %v4940_v41  ;;  %v4947_v41 = vld [vmem:[#allocation87_spill] sm:$0xff] }
 0x46b   : > { %v1247_v55 = vpop.permute.xlu0 %1246  ;;  %v3837_v48 = vpop.permute.xlu2 %1234 }
 0x46c   : > { %4928 = vst [vmem:[#allocation69_spill] sm:$0xff] %v3837_v48  ;;  %v1262_v56 = vmul.f32 %v1247_v55, %v3814_v18  ;;  %v3841_v1 = vpop.permute.xlu1 %1230  ;;  %1557 = vrot.lane.b32.xlu0 %v1536_v5, %s2907_s13  ;;  %1398 = vperm.xlu2 %2794, %v3553_v6   ;;  %v1485_v5 = vmul.f32 %v3686_v31, %v4935_v3  ;;  %v5004_v48 = vmov 3  }
 0x46d   : > { %1465 = vrot.lane.b32.xlu1 %v1442_v28, %s2904_s8  ;;  %v719_v28 = vadd.f32 %v4937_v9, %v639_v34  ;;  %v1582_v34 = vmul.f32 %v3686_v31, %v4941_v0 }
 0x46e   : > { %v1270_v45 = vadd.f32 %v1262_v56, %v1222_v24  ;;  %v4939_v56 = vld [vmem:[#allocation57_spill] sm:$0xff] }
 0x46f   : > { %v799_v40 = vadd.f32 %v4939_v56, %v719_v28 }
 0x473   : > { %v3857_v46 = vpop.permute.xlu2 %1242 }
 0x474   : > { %4936 = vst [vmem:[#allocation12_spill] sm:$0xff] %v3857_v46  ;;  %v3860_v24 = vpop.permute.xlu1 %1238  ;;  %1595 = vrot.lane.b32.xlu0 %v1579_v60, %s2908_s14  ;;  %v1275_v55 = vpop.permute.xlu0 %1274  ;;  %1455 = vrot.lane.b32.xlu2 %v1437_v42, %s2904_s8  ;;  %v4944_v42 = vld [vmem:[#allocation75_spill] sm:$0xff]  ;;  %v4990_v46 = vld [vmem:[#allocation54_spill] sm:$0xff] }
 0x475   : > { %4938 = vst [vmem:[#allocation86_spill] sm:$0xff] %v3860_v24  ;;  %v1305_v20 = vmul.f32 %v1275_v55, %v3855_v29  ;;  %1503 = vrot.lane.b32.xlu1 %v1485_v5, %s2905_s9  ;;  %2795 = vset.pattern.permute.xlu2 %v4901_v30  ;;  %v879_v3 = vadd.f32 %v4944_v42, %v799_v40  ;;  %v4945_v5 = vld [vmem:[#allocation81_spill] sm:$0xff]  ;;  %v4949_v42 = vld [vmem:[#allocation18_spill] sm:$0xff] }
 0x476   : > { %v4946_v55 = vld [vmem:[#allocation9_spill] sm:$0xff] }
 0x477   : > { %v1313_v47 = vadd.f32 %v1305_v20, %v1265_v13  ;;  %v959_v28 = vadd.f32 %v4945_v5, %v879_v3  ;;  %v392_v20 = vmul.f32 %v3795_v11, %v4946_v55  ;;  %v4948_v40 = vld [vmem:[#allocation37_spill] sm:$0xff] }
 0x479   : > { %v1007_v0 = vadd.f32 %v4947_v41, %v959_v28  ;;  %v480_v58 = vadd.f32 %v4948_v40, %v392_v20  ;;  %v4954_v28 = vld [vmem:[#allocation34_spill] sm:$0xff] }
 0x47b   : > { %v3874_v60 = vpop.permute.xlu2 %1254 }
 0x47c   : > { %4943 = vst [vmem:[#allocation6_spill] sm:$0xff] %v3874_v60  ;;  %v3877_v9 = vpop.permute.xlu1 %1250  ;;  %1601 = vrot.lane.b32.xlu0 %v1582_v34, %s2908_s14  ;;  %v1295_v30 = vpop.permute.xlu0 %1294  ;;  %1461 = vrot.lane.b32.xlu2 %v1440_v10, %s2904_s8  ;;  %v1483_v34 = vmul.f32 %v3686_v31, %v4949_v42  ;;  %v1585_v10 = vmul.f32 %v3686_v31, %v4950_v61  ;;  %v4956_v42 = vld [vmem:[#allocation20_spill] sm:$0xff]  ;;  %s2856_s8 = scalar_lea.hbm %s4715_s7, 16 }
 0x47d   : > { %v1310_v13 = vmul.f32 %v1295_v30, %v3855_v29  ;;  %1509 = vrot.lane.b32.xlu1 %v1488_v38, %s2905_s9  ;;  %v1531_v30 = vmul.f32 %v3686_v31, %v4951_v37  ;;  %v3894_v38 = vmax.f32 %v1007_v0, 0.0  ;;  %v4955_v0 = vld [vmem:[#allocation52_spill] sm:$0xff] }
 0x47e   : > { %v4958_v60 = vld [vmem:[#allocation24_spill] sm:$0xff] }
 0x47f   : > { %v1318_v56 = vadd.f32 %v1310_v13, %v1270_v45  ;;  %v4953_v45 = vld [vmem:[#allocation26_spill] sm:$0xff] }
 0x480   : > { %v560_v3 = vadd.f32 %v4953_v45, %v480_v58  ;;  %v1534_v58 = vmul.f32 %v3686_v31, %v4958_v60 }
 0x482   : > { %v640_v20 = vadd.f32 %v4954_v28, %v560_v3 }
 0x484   : > { %1607 = vrot.lane.b32.xlu0 %v1585_v10, %s2908_s14  ;;  %1499 = vrot.lane.b32.xlu2 %v1483_v34, %s2905_s9  ;;  %v3898_v11 = vpop.permute.xlu2 %1282  ;;  %v720_v40 = vadd.f32 %v4955_v0, %v640_v20  ;;  %v1486_v10 = vmul.f32 %v3686_v31, %v4956_v42  ;;  %v4957_v34 = vld [vmem:[#allocation48_spill] sm:$0xff]  ;;  %v4963_v0 = vld [vmem:[#allocation89_spill] sm:$0xff] }
 0x485   : > { %4952 = vst [vmem:[#allocation7_spill] sm:$0xff] %v3898_v11  ;;  %1547 = vrot.lane.b32.xlu1 %v1531_v30, %s2907_s13  ;;  %v3902_v13 = vpop.permute.xlu1 %1278  ;;  %v1323_v5 = vpop.permute.xlu0 %1322  ;;  %v1628_v41 = vmul.f32 %v3686_v31, %v4957_v34  ;;  %v4959_v30 = vld [vmem:[#allocation58_spill] sm:$0xff]  ;;  %v4964_v34 = vld [vmem:[#allocation93_spill] sm:$0xff]  ;;  %v5001_v11 = vld [vmem:[#allocation67_spill] sm:$0xff] }
 0x486   : > { %v1353_v61 = vmul.f32 %v1323_v5, %v3894_v38  ;;  %v800_v45 = vadd.f32 %v4959_v30, %v720_v40  ;;  %v4965_v30 = vld [vmem:[#allocation14_spill] sm:$0xff] }
 0x488   : > { %v1361_v37 = vadd.f32 %v1353_v61, %v1313_v47  ;;  %v4961_v47 = vld [vmem:[#allocation71_spill] sm:$0xff] }
 0x489   : > { %v880_v3 = vadd.f32 %v4961_v47, %v800_v45  ;;  %v1537_v45 = vmul.f32 %v3686_v31, %v4967_v14 }
 0x48b   : > { %v960_v42 = vadd.f32 %v4963_v0, %v880_v3  ;;  %v4970_v0 = vld [vmem:[#allocation22_spill] sm:$0xff] }
 0x48c   : > { %1645 = vrot.lane.b32.xlu0 %v1628_v41, %s2910_s15  ;;  %1505 = vrot.lane.b32.xlu2 %v1486_v10, %s2905_s9  ;;  %v3916_v5 = vpop.permute.xlu2 %1290  ;;  %v1489_v41 = vmul.f32 %v3686_v31, %v4965_v30  ;;  %v4966_v10 = vld [vmem:[#allocation49_spill] sm:$0xff]  ;;  %v1532_v14 = vmul.f32 %v3686_v31, %v4970_v0  ;;  %v4972_v30 = vld [vmem:[#allocation40_spill] sm:$0xff] }
 0x48d   : > { %4960 = vst [vmem:[#allocation31_spill] sm:$0xff] %v3916_v5  ;;  %1553 = vrot.lane.b32.xlu1 %v1534_v58, %s2907_s13  ;;  %v3920_v61 = vpop.permute.xlu1 %1286  ;;  %v1343_v28 = vpop.permute.xlu0 %1342  ;;  %v1008_v40 = vadd.f32 %v4964_v34, %v960_v42  ;;  %v1631_v21 = vmul.f32 %v3686_v31, %v4966_v10  ;;  %v4971_v42 = vld [vmem:[#allocation55_spill] sm:$0xff]  ;;  %v4981_v34 = vld [vmem:[#allocation66_spill] sm:$0xff]  ;;  %v4989_v5 = vld [vmem:[#allocation72_spill] sm:$0xff] }
 0x48e   : > { %4962 = vst [vmem:[#allocation38_spill] sm:$0xff] %v3920_v61  ;;  %v1358_v20 = vmul.f32 %v1343_v28, %v3894_v38  ;;  %v5002_v61 = vld [vmem:[#allocation59_spill] sm:$0xff] }
 0x48f   : > { %v3935_v47 = vmax.f32 %v1008_v40, 0.0 }
 0x490   : > { %v1366_v60 = vadd.f32 %v1358_v20, %v1318_v56 }
 0x494   : > { %1651 = vrot.lane.b32.xlu0 %v1631_v21, %s2910_s15  ;;  %1511 = vrot.lane.b32.xlu2 %v1489_v41, %s2905_s9  ;;  %v3933_v58 = vpop.permute.xlu2 %1302  ;;  %v1634_v21 = vmul.f32 %v3686_v31, %v4971_v42  ;;  %v1580_v41 = vmul.f32 %v3686_v31, %v4972_v30  ;;  %v4976_v42 = vld [vmem:[#allocation60_spill] sm:$0xff] }
 0x495   : > { %4968 = vst [vmem:[#allocation17_spill] sm:$0xff] %v3933_v58  ;;  %1559 = vrot.lane.b32.xlu1 %v1537_v45, %s2907_s13  ;;  %v3938_v56 = vpop.permute.xlu1 %1298  ;;  %v1677_v30 = vmul.f32 %v3686_v31, %v4976_v42  ;;  %v1680_v42 = vmul.f32 %v3686_v31, %v4981_v34  ;;  %v4984_v58 = vld [vmem:[#allocation35_spill] sm:$0xff] }
 0x496   : > { %v1371_v3 = vpop.permute.xlu0 %1370 }
 0x497   : > { %v1401_v28 = vmul.f32 %v1371_v3, %v3935_v47 }
 0x499   : > { %v3941_v20 = vadd.f32 %v1401_v28, %v1361_v37  ;;  %v4975_v28 = vld [vmem:[#allocation23_spill] sm:$0xff] }
 0x49a   : > { %v1535_v0 = vmul.f32 %v3686_v31, %v4975_v28 }
 0x49b   : > { %4969 = vst [vmem:[#allocation13_spill] sm:$0xff] %v3941_v20  ;;  %v5000_v20 = vld [vmem:[#allocation51_spill] sm:$0xff] }
 0x49c   : > { %1657 = vrot.lane.b32.xlu0 %v1634_v21, %s2910_s15  ;;  %1549 = vrot.lane.b32.xlu2 %v1532_v14, %s2907_s13  ;;  %v4977_v21 = vld [vmem:[#allocation41_spill] sm:$0xff] }
 0x49d   : > { %1597 = vrot.lane.b32.xlu1 %v1580_v41, %s2908_s14  ;;  %v3952_v40 = vpop.permute.xlu2 %1330  ;;  %v1583_v14 = vmul.f32 %v3686_v31, %v4977_v21 }
 0x49e   : > { %4973 = vst [vmem:[#allocation83_spill] sm:$0xff] %v3952_v40  ;;  %v3954_v10 = vpop.permute.xlu1 %1326  ;;  %v1391_v37 = vpop.permute.xlu0 %1390  ;;  %v4995_v40 = vld [vmem:[#allocation64_spill] sm:$0xff] }
 0x49f   : > { %v1406_v45 = vmul.f32 %v1391_v37, %v3935_v47 }
 0x4a1   : > { %v3957_v3 = vadd.f32 %v1406_v45, %v1366_v60  ;;  %v4980_v45 = vld [vmem:[#allocation27_spill] sm:$0xff] }
 0x4a2   : > { %v1538_v28 = vmul.f32 %v3686_v31, %v4980_v45  ;;  %v1581_v45 = vmul.f32 %v3686_v31, %v4984_v58 }
 0x4a3   : > { %4974 = vst [vmem:[#allocation28_spill] sm:$0xff] %v3957_v3  ;;  %v4982_v3 = vld [vmem:[#allocation43_spill] sm:$0xff] }
 0x4a4   : > { %1695 = vrot.lane.b32.xlu0 %v1677_v30, %s2913_s16  ;;  %1555 = vrot.lane.b32.xlu2 %v1535_v0, %s2907_s13  ;;  %v1586_v21 = vmul.f32 %v3686_v31, %v4982_v3  ;;  %v1629_v3 = vmul.f32 %v3686_v31, %v4986_v53  ;;  %v1632_v53 = vmul.f32 %v3686_v31, %v4990_v46 }
 0x4a5   : > { %1603 = vrot.lane.b32.xlu1 %v1583_v14, %s2908_s14  ;;  %v3968_v41 = vpop.permute.xlu2 %1338  ;;  %v1675_v46 = vmul.f32 %v3686_v31, %v4995_v40 }
 0x4a6   : > { %4978 = vst [vmem:[#allocation44_spill] sm:$0xff] %v3968_v41  ;;  %v3970_v37 = vpop.permute.xlu1 %1334  ;;  %v3972_v60 = vpop.permute.xlu0 %1451  ;;  %v4985_v41 = vld [vmem:[#allocation70_spill] sm:$0xff] }
 0x4a7   : > { %4979 = vst [vmem:[#allocation25_spill] sm:$0xff] %v3970_v37  ;;  %v1723_v34 = vmul.f32 %v3686_v31, %v4985_v41  ;;  %v1726_v41 = vmul.f32 %v3686_v31, %v4989_v5  ;;  %v1729_v5 = vmul.f32 %v3686_v31, %v4994_v25  ;;  %v1633_v37 = vmul.f32 %v3686_v31, %v5000_v20 }
 0x4ac   : > { %1701 = vrot.lane.b32.xlu0 %v1680_v42, %s2913_s16  ;;  %1561 = vrot.lane.b32.xlu2 %v1538_v28, %s2907_s13  ;;  %s2531_s13 = scalar_lea.hbm %s4715_s7, %s2683_s29 }
 0x4ad   : > { %1609 = vrot.lane.b32.xlu1 %v1586_v21, %s2908_s14  ;;  %v3983_v0 = vpop.permute.xlu2 %1350  ;;  %s2535_s18 = sshll.u32 %s2531_s13, 4  ;;  %s2536_s18 = int_to_ptr.hbm [resolvable:$true] %s2535_s18 }
 0x4ae   : > { %4983 = vst [vmem:[#allocation62_spill] sm:$0xff] %v3983_v0  ;;  %v3985_v30 = vpop.permute.xlu1 %1346  ;;  %v3987_v14 = vpop.permute.xlu0 %1457  ;;  %v4988_v0 = vld [vmem:[#allocation36_spill] sm:$0xff]  ;;  %s2850_s19 = sshra.s32 %s2536_s18, 4  ;;  %s2851_s19 = int_to_ptr.hbm [resolvable:$true] %s2850_s19 }
 0x4af   : > { %v1584_v58 = vmul.f32 %v3686_v31, %v4988_v0  ;;  %s2852_s20 = scalar_lea.hbm %s2851_s19, 8  ;;  %p2857_p2 = scmp.lt.s32.totalorder %s2851_s19, %s4715_s7 }
 0x4b0   : > { %p2853_p13 = scmp.ne.s32.totalorder %s2851_s19, %s2852_s20  ;;  %p2858_p3 = scmp.lt.s32.totalorder %s2856_s8, %s2852_s20 }
 0x4b2   : > { %p2854_p0 = pnand %p2853_p13, %p3001_p6  ;;  %p2859_p4 = por %p2858_p3, %p2857_p2 }
 0x4b4   : > { %1739 = vrot.lane.b32.xlu0 %v1723_v34, %s2914_s17  ;;  %1599 = vrot.lane.b32.xlu2 %v1581_v45, %s2908_s14  ;;  %p2855_p1 = pneg %p2854_p0 }
 0x4b5   : > { %1647 = vrot.lane.b32.xlu1 %v1629_v3, %s2910_s15 }
 0x4b6   : > { %v3998_v28 = vpop.permute.xlu0 %1463  ;;  %v4000_v42 = vpop.permute.xlu2 %1378  ;;  %p2860_p5 = pnand %p2859_p4, %p2855_p1 }
 0x4b7   : > { %4987 = vst [vmem:[#allocation19_spill] sm:$0xff] %v4000_v42  ;;  %v4002_v21 = vpop.permute.xlu1 %1374  ;;  %v4993_v42 = vld [vmem:[#allocation45_spill] sm:$0xff] }
 0x4b8   : > { %v1627_v0 = vmul.f32 %v3686_v31, %v4993_v42 }
 0x4bc   : > { %1745 = vrot.lane.b32.xlu0 %v1726_v41, %s2914_s17  ;;  %1605 = vrot.lane.b32.xlu2 %v1584_v58, %s2908_s14 }
 0x4bd   : > { %1653 = vrot.lane.b32.xlu1 %v1632_v53, %s2910_s15 }
 0x4be   : > { %v1502_v45 = vpop.permute.xlu0 %1501  ;;  %v4013_v34 = vpop.permute.xlu2 %1386 }
 0x4bf   : > { %4991 = vst [vmem:[#allocation15_spill] sm:$0xff] %v4013_v34  ;;  %v4015_v3 = vpop.permute.xlu1 %1382  ;;  %v4997_v34 = vld [vmem:[#allocation46_spill] sm:$0xff] }
 0x4c0   : > { %4992 = vst [vmem:[#allocation68_spill] sm:$0xff] %v4015_v3  ;;  %v1630_v42 = vmul.f32 %v3686_v31, %v4997_v34  ;;  %v4998_v3 = vld [vmem:[#allocation65_spill] sm:$0xff] }
 0x4c1   : > { %v1678_v25 = vmul.f32 %v3686_v31, %v4998_v3  ;;  %v1681_v3 = vmul.f32 %v3686_v31, %v5001_v11 }
 0x4c4   : > { %1751 = vrot.lane.b32.xlu0 %v1729_v5, %s2914_s17  ;;  %1643 = vrot.lane.b32.xlu2 %v1627_v0, %s2910_s15  ;;  %v4999_v0 = vld [vmem:[#allocation80_spill] sm:$0xff] }
 0x4c5   : > { %1691 = vrot.lane.b32.xlu1 %v1675_v46, %s2913_s16  ;;  %v1420_v5 = vmul.f32 %v3686_v31, %v4999_v0 }
 0x4c6   : > { %v1508_v58 = vpop.permute.xlu0 %1507  ;;  %v4026_v41 = vpop.permute.xlu2 %1398 }
 0x4c7   : > { %4996 = vst [vmem:[#allocation32_spill] sm:$0xff] %v4026_v41  ;;  %v4028_v53 = vpop.permute.xlu1 %1394 }
 0x4cc   : > { %1792 = vperm.xlu0 %2796, %v3540_v36   ;;  %1649 = vrot.lane.b32.xlu2 %v1630_v42, %s2910_s15 }
 0x4cd   : > { %1697 = vrot.lane.b32.xlu1 %v1678_v25, %s2913_s16  ;;  %v1423_v25 = vmul.f32 %v3686_v31, %v3076_v22 }
 0x4ce   : > { %v1514_v40 = vpop.permute.xlu0 %1513  ;;  %v1456_v46 = vpop.permute.xlu2 %1455 }
 0x4cf   : > { %v1454_v41 = vpop.permute.xlu1 %1453 }
 0x4d0   : > { %v1476_v52 = vadd.f32 %v1454_v41, %v1420_v5 }
 0x4d2   : > { %v4041_v34 = vadd.f32 %v1502_v45, %v1476_v52  ;;  %v1676_v52 = vmul.f32 %v3686_v31, %v5002_v61  ;;  %v5003_v45 = vld [vmem:[#allocation76_spill] sm:$0xff]  ;;  %v1426_v61 = vmul.f32 %v3686_v31, %v4946_v55 }
 0x4d3   : > { %v1724_v11 = vmul.f32 %v3686_v31, %v5003_v45  ;;  %v5005_v45 = vld [vmem:[#allocation61_spill] sm:$0xff] }
 0x4d4   : > { %1812 = vperm.xlu0 %2796, %v3535_v51   ;;  %1655 = vrot.lane.b32.xlu2 %v1633_v37, %s2910_s15  ;;  %v1419_v37 = vmul.f32 %v3686_v31, %v3573_v19  ;;  %v1679_v19 = vmul.f32 %v3686_v31, %v5005_v45  ;;  %v5008_v45 = vld [vmem:[#allocation79_spill] sm:$0xff] }
 0x4d5   : > { %1703 = vrot.lane.b32.xlu1 %v1681_v3, %s2913_s16 }
 0x4d6   : > { %v1552_v42 = vpop.permute.xlu0 %1551  ;;  %v1462_v0 = vpop.permute.xlu2 %1461  ;;  %v1475_v22 = vadd.f32 %v3972_v60, %v1419_v37  ;;  %v1422_v60 = vmul.f32 %v3686_v31, %v3106_v32 }
 0x4d7   : > { %v1460_v41 = vpop.permute.xlu1 %1459 }
 0x4d8   : > { %v1479_v5 = vadd.f32 %v1460_v41, %v1423_v25  ;;  %v1478_v55 = vadd.f32 %v3987_v14, %v1422_v60  ;;  %v1425_v14 = vmul.f32 %v3686_v31, %v4920_v12  ;;  %v5010_v12 = vld [vmem:[#allocation73_spill] sm:$0xff] }
 0x4da   : > { %v4052_v20 = vadd.f32 %v1508_v58, %v1479_v5 }
 0x4dc   : > { %2799 = vset.pattern.permute.xlu0 %v5004_v48  ;;  %1693 = vrot.lane.b32.xlu2 %v1676_v52, %s2913_s16  ;;  %v1727_v52 = vmul.f32 %v3686_v31, %v5006_v59 }
 0x4dd   : > { %1741 = vrot.lane.b32.xlu1 %v1724_v11, %s2914_s17  ;;  %1840 = vperm.xlu0 %2799, %v3540_v36   ;;  %v1421_v11 = vmul.f32 %v3686_v31, %v3094_v27  ;;  %v1730_v27 = vmul.f32 %v3686_v31, %v5008_v45  ;;  %v5011_v45 = vld [vmem:[#allocation74_spill] sm:$0xff] }
 0x4de   : > { %v1558_v3 = vpop.permute.xlu0 %1557  ;;  %v1500_v58 = vpop.permute.xlu2 %1499 }
 0x4df   : > { %v1466_v25 = vpop.permute.xlu1 %1465  ;;  %v1523_v41 = vadd.f32 %v1500_v58, %v1475_v22  ;;  %v1477_v37 = vadd.f32 %v1456_v46, %v1421_v11  ;;  %v1481_v46 = vadd.f32 %v3998_v28, %v1425_v14 }
 0x4e0   : > { %v1482_v5 = vadd.f32 %v1466_v25, %v1426_v61  ;;  %v5007_v25 = vld [vmem:[#allocation63_spill] sm:$0xff] }
 0x4e1   : > { %v1682_v32 = vmul.f32 %v3686_v31, %v5007_v25 }
 0x4e2   : > { %v1530_v24 = vadd.f32 %v1514_v40, %v1482_v5 }
 0x4e4   : > { %1699 = vrot.lane.b32.xlu2 %v1679_v19, %s2913_s16  ;;  %v1424_v19 = vmul.f32 %v3686_v31, %v4912_v2 }
 0x4e5   : > { %1747 = vrot.lane.b32.xlu1 %v1727_v52, %s2914_s17  ;;  %1860 = vperm.xlu0 %2799, %v3535_v51   ;;  %v5009_v52 = vmov 5  }
 0x4e6   : > { %v1596_v22 = vpop.permute.xlu0 %1595  ;;  %v1506_v40 = vpop.permute.xlu2 %1505  ;;  %v1480_v60 = vadd.f32 %v1462_v0, %v1424_v19  ;;  %v5012_v19 = vmov 7  }
 0x4e7   : > { %v1504_v61 = vpop.permute.xlu1 %1503  ;;  %v1526_v58 = vadd.f32 %v1506_v40, %v1478_v55 }
 0x4e8   : > { %v1525_v59 = vadd.f32 %v1504_v61, %v1477_v37  ;;  %v1725_v61 = vmul.f32 %v3686_v31, %v5010_v12 }
 0x4ea   : > { %v1573_v5 = vadd.f32 %v1552_v42, %v1525_v59 }
 0x4ec   : > { %1705 = vrot.lane.b32.xlu2 %v1682_v32, %s2913_s16  ;;  %s315_s16 = scalar_lea.vmem [#allocation3], %s2608_s23 }
 0x4ed   : > { %1753 = vrot.lane.b32.xlu1 %v1730_v27, %s2914_s17  ;;  %2802 = vset.pattern.permute.xlu0 %v5009_v52  ;;  %v1728_v27 = vmul.f32 %v3686_v31, %v5011_v45 }
 0x4ee   : > { %v1602_v11 = vpop.permute.xlu0 %1601  ;;  %1888 = vperm.xlu0 %2802, %v3540_v36   ;;  %v1512_v42 = vpop.permute.xlu2 %1511 }
 0x4ef   : > { %v1510_v55 = vpop.permute.xlu1 %1509  ;;  %v1529_v37 = vadd.f32 %v1512_v42, %v1481_v46 }
 0x4f0   : > { %v1528_v40 = vadd.f32 %v1510_v55, %v1480_v60 }
 0x4f2   : > { %v1576_v2 = vadd.f32 %v1558_v3, %v1528_v40 }
 0x4f4   : > { %1743 = vrot.lane.b32.xlu2 %v1725_v61, %s2914_s17 }
 0x4f5   : > { %1796 = vperm.xlu1 %2797, %v3538_v7  }
 0x4f6   : > { %v1608_v28 = vpop.permute.xlu0 %1607  ;;  %1908 = vperm.xlu0 %2802, %v3535_v51   ;;  %v1550_v59 = vpop.permute.xlu2 %1549 }
 0x4f7   : > { %v1548_v0 = vpop.permute.xlu1 %1547  ;;  %v1572_v25 = vadd.f32 %v1550_v59, %v4041_v34 }
 0x4f8   : > { %v1571_v32 = vadd.f32 %v1548_v0, %v1523_v41  ;;  %v2919_v0 = vmov 9  }
 0x4fa   : > { %v1619_v14 = vadd.f32 %v1596_v22, %v1571_v32 }
 0x4fc   : > { %1749 = vrot.lane.b32.xlu2 %v1728_v27, %s2914_s17  ;;  %s2533_s17 = sshll.u32 %s315_s16, 4  ;;  %s2534_s17 = int_to_ptr.vmem [resolvable:$true] %s2533_s17 }
 0x4fd   : > { %1804 = vperm.xlu1 %2797, %v3548_v26  }
 0x4fe   : > { %v1646_v3 = vpop.permute.xlu0 %1645  ;;  %2805 = vset.pattern.permute.xlu0 %v5012_v19  ;;  %v1556_v46 = vpop.permute.xlu2 %1555 }
 0x4ff   : > { %v1554_v60 = vpop.permute.xlu1 %1553  ;;  %v1575_v42 = vadd.f32 %v1556_v46, %v4052_v20  ;;  %1936 = vperm.xlu0 %2805, %v3540_v36  }
 0x500   : > { %v1574_v55 = vadd.f32 %v1554_v60, %v1526_v58 }
 0x502   : > { %v1622_v34 = vadd.f32 %v1602_v11, %v1574_v55 }
 0x504   : > { %1788 = vperm.xlu2 %2795, %v3526_v39  }
 0x505   : > { %1816 = vperm.xlu1 %2797, %v3553_v6  }
 0x506   : > { %v1652_v31 = vpop.permute.xlu0 %1651  ;;  %v1562_v41 = vpop.permute.xlu2 %1561 }
 0x507   : > { %v1560_v22 = vpop.permute.xlu1 %1559  ;;  %v1578_v40 = vadd.f32 %v1562_v41, %v1530_v24  ;;  %1956 = vperm.xlu0 %2805, %v3535_v51  }
 0x508   : > { %v1577_v12 = vadd.f32 %v1560_v22, %v1529_v37  ;;  %v2920_v22 = vmov 15  }
 0x50a   : > { %v1625_v61 = vadd.f32 %v1608_v28, %v1577_v12 }
 0x50c   : > { %1800 = vperm.xlu2 %2795, %v3532_v49  }
 0x50d   : > { %2800 = vset.pattern.permute.xlu1 %v5004_v48 }
 0x50e   : > { %1844 = vperm.xlu1 %2800, %v3538_v7   ;;  %v1658_v20 = vpop.permute.xlu0 %1657  ;;  %v1600_v58 = vpop.permute.xlu2 %1599 }
 0x50f   : > { %v1598_v11 = vpop.permute.xlu1 %1597  ;;  %v1621_v59 = vadd.f32 %v1600_v58, %v1573_v5  ;;  %2808 = vset.pattern.permute.xlu0 %v2919_v0 }
 0x510   : > { %v1620_v32 = vadd.f32 %v1598_v11, %v1572_v25  ;;  %1984 = vperm.xlu0 %2808, %v3540_v36  }
 0x512   : > { %v1668_v24 = vadd.f32 %v1646_v3, %v1620_v32 }
 0x514   : > { %1808 = vperm.xlu2 %2795, %v3546_v57  }
 0x516   : > { %1852 = vperm.xlu1 %2800, %v3548_v26   ;;  %v1696_v37 = vpop.permute.xlu0 %1695  ;;  %v1606_v28 = vpop.permute.xlu2 %1605 }
 0x517   : > { %v1604_v45 = vpop.permute.xlu1 %1603  ;;  %v1624_v27 = vadd.f32 %v1606_v28, %v1576_v2 }
 0x518   : > { %v1623_v46 = vadd.f32 %v1604_v45, %v1575_v42  ;;  %2004 = vperm.xlu0 %2808, %v3535_v51   ;;  %v5013_v45 = vld [vmem:[#allocation98_spill] sm:$0xff] }
 0x51a   : > { %v4114_v60 = vadd.f32 %v1652_v31, %v1623_v46  ;;  %v5014_v46 = vld [vmem:[#allocation90_spill] sm:$0xff] }
 0x51c   : > { %2798 = vset.pattern.permute.xlu2 %v5004_v48 }
 0x51d   : > { %1836 = vperm.xlu2 %2798, %v3526_v39  }
 0x51e   : > { %1864 = vperm.xlu1 %2800, %v3553_v6   ;;  %v1702_v5 = vpop.permute.xlu0 %1701  ;;  %v1644_v25 = vpop.permute.xlu2 %1643 }
 0x51f   : > { %v1610_v3 = vpop.permute.xlu1 %1609  ;;  %v1667_v55 = vadd.f32 %v1644_v25, %v1619_v14  ;;  %v2921_v14 = vmov 11   ;;  %v1066_v25 = vmul.f32 %v5014_v46, %v3743_v15 }
 0x520   : > { %v1626_v41 = vadd.f32 %v1610_v3, %v1578_v40  ;;  %2814 = vset.pattern.permute.xlu0 %v2920_v22 }
 0x521   : > { %2132 = vperm.xlu0 %2814, %v3538_v7  }
 0x522   : > { %v4121_v2 = vadd.f32 %v1658_v20, %v1626_v41 }
 0x525   : > { %1848 = vperm.xlu2 %2798, %v3532_v49  }
 0x526   : > { %2803 = vset.pattern.permute.xlu1 %v5009_v52  ;;  %v1740_v48 = vpop.permute.xlu0 %1739  ;;  %v1650_v42 = vpop.permute.xlu2 %1649 }
 0x527   : > { %1892 = vperm.xlu1 %2803, %v3538_v7   ;;  %v1648_v31 = vpop.permute.xlu1 %1647  ;;  %v1670_v12 = vadd.f32 %v1650_v42, %v1622_v34  ;;  %v1114_v34 = vmul.f32 %v5013_v45, %v3736_v8  ;;  %v1210_v42 = vmul.f32 %v3781_v43, %v3773_v54  ;;  %v1306_v43 = vmul.f32 %v3902_v13, %v3855_v29 }
 0x528   : > { %v1669_v58 = vadd.f32 %v1648_v31, %v1621_v59 }
 0x529   : > { %2815 = vset.pattern.permute.xlu0 %v2921_v14  ;;  %v1122_v41 = vadd.f32 %v1114_v34, %v1066_v25  ;;  %v5016_v34 = vld [vmem:[#allocation95_spill] sm:$0xff]  ;;  %v1354_v25 = vmul.f32 %v3954_v10, %v3894_v38  ;;  %v1263_v10 = vmul.f32 %v3877_v9, %v3814_v18 }
 0x52a   : > { %2040 = vperm.xlu0 %2815, %v3532_v49   ;;  %v4128_v40 = vadd.f32 %v1696_v37, %v1669_v58  ;;  %v1162_v37 = vmul.f32 %v3709_v33, %v3747_v16  ;;  %v5015_v33 = vld [vmem:[#allocation102_spill] sm:$0xff] }
 0x52d   : > { %1856 = vperm.xlu2 %2798, %v3546_v57  }
 0x52e   : > { %v1746_v20 = vpop.permute.xlu0 %1745  ;;  %v1656_v11 = vpop.permute.xlu2 %1655 }
 0x52f   : > { %1900 = vperm.xlu1 %2803, %v3548_v26   ;;  %v1654_v32 = vpop.permute.xlu1 %1653  ;;  %v4132_v28 = vadd.f32 %v1656_v11, %v1625_v61  ;;  %v1170_v61 = vadd.f32 %v1162_v37, %v1122_v41  ;;  %v1119_v11 = vmul.f32 %v5015_v33, %v3736_v8  ;;  %v2922_v41 = vmov 13  }
 0x530   : > { %v1672_v59 = vadd.f32 %v1654_v32, %v1624_v27  ;;  %v1258_v27 = vmul.f32 %v3841_v1, %v3814_v18  ;;  %v1167_v1 = vmul.f32 %v3759_v4, %v3747_v16 }
 0x531   : > { %v1218_v45 = vadd.f32 %v1210_v42, %v1170_v61  ;;  %v1215_v42 = vmul.f32 %v3820_v35, %v3773_v54 }
 0x532   : > { %2052 = vperm.xlu0 %2815, %v3535_v51   ;;  %v4141_v3 = vadd.f32 %v1702_v5, %v1672_v59  ;;  %v1071_v59 = vmul.f32 %v5016_v34, %v3743_v15 }
 0x533   : > { %v1266_v46 = vadd.f32 %v1258_v27, %v1218_v45 }
 0x535   : > { %2801 = vset.pattern.permute.xlu2 %v5009_v52  ;;  %v1314_v13 = vadd.f32 %v1306_v43, %v1266_v46 }
 0x536   : > { %v1752_v31 = vpop.permute.xlu0 %1751  ;;  %1884 = vperm.xlu2 %2801, %v3526_v39   ;;  %v1694_v58 = vpop.permute.xlu2 %1693 }
 0x537   : > { %1912 = vperm.xlu1 %2803, %v3553_v6   ;;  %v1692_v5 = vpop.permute.xlu1 %1691  ;;  %v1716_v32 = vadd.f32 %v1694_v58, %v1668_v24  ;;  %v1127_v24 = vadd.f32 %v1119_v11, %v1071_v59  ;;  %v1311_v11 = vmul.f32 %v3938_v56, %v3855_v29  ;;  %v1407_v56 = vmul.f32 %v4028_v53, %v3935_v47 }
 0x538   : > { %v1715_v52 = vadd.f32 %v1692_v5, %v1667_v55  ;;  %v1402_v55 = vmul.f32 %v4002_v21, %v3935_v47 }
 0x539   : > { %v1175_v61 = vadd.f32 %v1167_v1, %v1127_v24 }
 0x53a   : > { %v1763_v37 = vadd.f32 %v1740_v48, %v1715_v52  ;;  %2822 = vset.pattern.permute.xlu0 %v2922_v41  ;;  %v1362_v48 = vadd.f32 %v1354_v25, %v1314_v13  ;;  %v1359_v52 = vmul.f32 %v3985_v30, %v3894_v38 }
 0x53b   : > { %2100 = vperm.xlu0 %2822, %v3535_v51   ;;  %v1223_v35 = vadd.f32 %v1215_v42, %v1175_v61 }
 0x53c   : > { %v1771_v4 = vadd.f32 %v1763_v37, %v3599_v44  ;;  %v1410_v5 = vadd.f32 %v1402_v55, %v1362_v48  ;;  %v5017_v48 = vld [vmem:[#allocation96_spill] sm:$0xff] }
 0x53d   : > { %v1271_v43 = vadd.f32 %v1263_v10, %v1223_v35 }
 0x53e   : > { %v4169_v27 = vmax.f32 %v1771_v4, 0.0  ;;  %v1793_v58 = vpop.permute.xlu0 %1792  ;;  %1896 = vperm.xlu2 %2801, %v3532_v49   ;;  %v1700_v33 = vpop.permute.xlu2 %1699 }
 0x53f   : > { %2806 = vset.pattern.permute.xlu1 %v5012_v19  ;;  %v1698_v21 = vpop.permute.xlu1 %1697  ;;  %v1719_v44 = vadd.f32 %v1700_v33, %v4114_v60  ;;  %v1319_v1 = vadd.f32 %v1311_v11, %v1271_v43  ;;  %v5019_v11 = vld [vmem:[#allocation97_spill] sm:$0xff]  ;;  %v5020_v43 = vld [vmem:[#allocation92_spill] sm:$0xff] }
 0x540   : > { %v1820_v45 = vmul.f32 %v1793_v58, %v4169_v27  ;;  %v1718_v9 = vadd.f32 %v1698_v21, %v1670_v12  ;;  %1940 = vperm.xlu1 %2806, %v3538_v7   ;;  %v5018_v58 = vld [vmem:[#allocation100_spill] sm:$0xff]  ;;  %v1115_v21 = vmul.f32 %v5019_v11, %v3736_v8  ;;  %v5028_v11 = vld [vmem:[#allocation25_spill] sm:$0xff] }
 0x541   : > { %v1367_v60 = vadd.f32 %v1359_v52, %v1319_v1  ;;  %v1116_v33 = vmul.f32 %v5018_v58, %v3736_v8  ;;  %v1068_v52 = vmul.f32 %v5020_v43, %v3743_v15  ;;  %v1163_v1 = vmul.f32 %v3702_v62, %v3747_v16  ;;  %v5024_v62 = vld [vmem:[#allocation69_spill] sm:$0xff] }
 0x542   : > { %v1828_v34 = vadd.f32 %v1820_v45, %v1410_v5  ;;  %v4180_v59 = vadd.f32 %v1746_v20, %v1718_v9 }
 0x543   : > { %2104 = vperm.xlu0 %2822, %v3553_v6   ;;  %v1415_v25 = vadd.f32 %v1407_v56, %v1367_v60 }
 0x546   : > { %v1813_v46 = vpop.permute.xlu0 %1812  ;;  %1904 = vperm.xlu2 %2801, %v3546_v57   ;;  %v1706_v12 = vpop.permute.xlu2 %1705 }
 0x547   : > { %v1825_v37 = vmul.f32 %v1813_v46, %v4169_v27  ;;  %v1704_v24 = vpop.permute.xlu1 %1703  ;;  %v1722_v30 = vadd.f32 %v1706_v12, %v4121_v2  ;;  %v5021_v12 = vld [vmem:[#allocation105_spill] sm:$0xff] }
 0x548   : > { %v1721_v20 = vadd.f32 %v1704_v24, %v4132_v28  ;;  %1948 = vperm.xlu1 %2806, %v3548_v26   ;;  %v5023_v24 = vld [vmem:[#allocation86_spill] sm:$0xff] }
 0x549   : > { %v1833_v42 = vadd.f32 %v1825_v37, %v1415_v25  ;;  %v1211_v25 = vmul.f32 %v5021_v12, %v3773_v54  ;;  %v5022_v37 = vmov 0  }
 0x54a   : > { %v4190_v13 = vadd.f32 %v1752_v31, %v1721_v20  ;;  %v1260_v20 = vmul.f32 %v5023_v24, %v3814_v18 }
 0x54b   : > { %2096 = vperm.xlu0 %2822, %v3546_v57  }
 0x54e   : > { %2804 = vset.pattern.permute.xlu2 %v5012_v19  ;;  %v1744_v53 = vpop.permute.xlu2 %1743 }
 0x54f   : > { %v1742_v55 = vpop.permute.xlu1 %1741  ;;  %v1765_v4 = vadd.f32 %v1744_v53, %v4128_v40  ;;  %v1841_v61 = vpop.permute.xlu0 %1840  ;;  %1932 = vperm.xlu2 %2804, %v3526_v39   ;;  %v1067_v40 = vmul.f32 %v5017_v48, %v3743_v15 }
 0x550   : > { %v1764_v10 = vadd.f32 %v1742_v55, %v1716_v32  ;;  %1960 = vperm.xlu1 %2806, %v3553_v6  }
 0x551   : > { %v1773_v60 = vadd.f32 %v1765_v4, %v3631_v63  ;;  %v1123_v46 = vadd.f32 %v1115_v21, %v1067_v40  ;;  %v5027_v40 = vld [vmem:[#allocation7_spill] sm:$0xff]  ;;  %v1356_v21 = vmul.f32 %v5028_v11, %v3894_v38 }
 0x552   : > { %v1772_v2 = vadd.f32 %v1764_v10, %v3597_v50  ;;  %v1307_v58 = vmul.f32 %v5027_v40, %v3855_v29  ;;  %v5038_v11 = vld [vmem:[#allocation31_spill] sm:$0xff] }
 0x553   : > { %2830 = vset.pattern.permute.xlu0 %v2920_v22  ;;  %v1171_v53 = vadd.f32 %v1163_v1, %v1123_v46  ;;  %v4238_v63 = vmax.f32 %v1773_v60, 0.0  ;;  %v5032_v60 = vld [vmem:[#allocation83_spill] sm:$0xff] }
 0x554   : > { %v4199_v28 = vmax.f32 %v1772_v2, 0.0  ;;  %2144 = vperm.xlu0 %2830, %v3546_v57   ;;  %v1355_v46 = vmul.f32 %v5032_v60, %v3894_v38 }
 0x555   : > { %v1219_v48 = vadd.f32 %v1211_v25, %v1171_v53  ;;  %v5033_v25 = vld [vmem:[#allocation68_spill] sm:$0xff]  ;;  %v5034_v53 = vld [vmem:[#allocation50_spill] sm:$0xff] }
 0x556   : > { %v1868_v19 = vmul.f32 %v1841_v61, %v4199_v28  ;;  %v1750_v31 = vpop.permute.xlu2 %1749 }
 0x557   : > { %v1748_v32 = vpop.permute.xlu1 %1747  ;;  %v4208_v35 = vadd.f32 %v1750_v31, %v4141_v3  ;;  %v1861_v50 = vpop.permute.xlu0 %1860  ;;  %1944 = vperm.xlu2 %2804, %v3532_v49   ;;  %v1164_v3 = vmul.f32 %v3731_v17, %v3747_v16 }
 0x558   : > { %v1876_v5 = vadd.f32 %v1868_v19, %v1828_v34  ;;  %v4213_v45 = vadd.f32 %v1748_v32, %v1719_v44  ;;  %v1873_v9 = vmul.f32 %v1861_v50, %v4199_v28  ;;  %2809 = vset.pattern.permute.xlu1 %v2919_v0  ;;  %v1124_v34 = vadd.f32 %v1116_v33, %v1068_v52  ;;  %v5026_v19 = vld [vmem:[#allocation99_spill] sm:$0xff] }
 0x559   : > { %1988 = vperm.xlu1 %2809, %v3538_v7   ;;  %v1212_v44 = vmul.f32 %v3802_v23, %v3773_v54  ;;  %v5025_v23 = vld [vmem:[#allocation38_spill] sm:$0xff]  ;;  %v1117_v31 = vmul.f32 %v5026_v19, %v3736_v8 }
 0x55a   : > { %v4224_v56 = vadd.f32 %v1873_v9, %v1833_v42  ;;  %v1172_v17 = vadd.f32 %v1164_v3, %v1124_v34  ;;  %v1259_v42 = vmul.f32 %v5024_v62, %v3814_v18  ;;  %v1308_v10 = vmul.f32 %v5025_v23, %v3855_v29  ;;  %v5029_v9 = vld [vmem:[#allocation13_spill] sm:$0xff]  ;;  %v5030_v3 = vld [vmem:[#allocation91_spill] sm:$0xff] }
 0x55b   : > { %v1069_v1 = vmul.f32 %v5030_v3, %v3743_v15  ;;  %v5031_v34 = vld [vmem:[#allocation103_spill] sm:$0xff]  ;;  %v1213_v62 = vmul.f32 %v5034_v53, %v3773_v54  ;;  %v5042_v53 = vld [vmem:[#allocation56_spill] sm:$0xff] }
 0x55c   : > { %2833 = vset.pattern.permute.xlu0 %v5022_v37  ;;  %v1220_v61 = vadd.f32 %v1212_v44, %v1172_v17  ;;  %v1165_v44 = vmul.f32 %v5031_v34, %v3747_v16  ;;  %v1404_v17 = vmul.f32 %v5033_v25, %v3935_v47 }
 0x55e   : > { %v1789_v55 = vpop.permute.xlu2 %1788  ;;  %v1268_v50 = vadd.f32 %v1260_v20, %v1220_v61  ;;  %v1125_v20 = vadd.f32 %v1117_v31, %v1069_v1  ;;  %v5035_v61 = vld [vmem:[#allocation19_spill] sm:$0xff]  ;;  %v5039_v1 = vld [vmem:[#allocation94_spill] sm:$0xff] }
 0x55f   : > { %v1754_v4 = vpop.permute.xlu1 %1753  ;;  %v1819_v2 = vmul.f32 %v1789_v55, %v4169_v27  ;;  %1952 = vperm.xlu2 %2804, %v3546_v57   ;;  %v1403_v23 = vmul.f32 %v5035_v61, %v3935_v47  ;;  %v1072_v34 = vmul.f32 %v5039_v1, %v3743_v15 }
 0x560   : > { %v4246_v33 = vadd.f32 %v1754_v4, %v1722_v30  ;;  %v1889_v32 = vpop.permute.xlu0 %1888  ;;  %v1267_v30 = vadd.f32 %v1259_v42, %v1219_v48  ;;  %v1316_v12 = vadd.f32 %v1308_v10, %v1268_v50  ;;  %v5036_v42 = vld [vmem:[#allocation12_spill] sm:$0xff]  ;;  %v5037_v10 = vld [vmem:[#allocation101_spill] sm:$0xff] }
 0x561   : > { %v4251_v43 = vadd.f32 %v1819_v2, %v5029_v9  ;;  %v1916_v52 = vmul.f32 %v1889_v32, %v4238_v63  ;;  %1996 = vperm.xlu1 %2809, %v3548_v26   ;;  %v1173_v2 = vadd.f32 %v1165_v44, %v1125_v20  ;;  %v1261_v19 = vmul.f32 %v5036_v42, %v3814_v18  ;;  %v5045_v42 = vld [vmem:[#allocation6_spill] sm:$0xff] }
 0x562   : > { %v1315_v55 = vadd.f32 %v1307_v58, %v1267_v30  ;;  %v1364_v4 = vadd.f32 %v1356_v21, %v1316_v12  ;;  %v1120_v32 = vmul.f32 %v5037_v10, %v3736_v8  ;;  %v1309_v9 = vmul.f32 %v5038_v11, %v3855_v29  ;;  %v5040_v8 = vld [vmem:[#allocation104_spill] sm:$0xff] }
 0x563   : > { %v1924_v24 = vadd.f32 %v1916_v52, %v1876_v5  ;;  %v1221_v58 = vadd.f32 %v1213_v62, %v1173_v2  ;;  %v1168_v44 = vmul.f32 %v5040_v8, %v3747_v16  ;;  %v5041_v12 = vld [vmem:[#allocation44_spill] sm:$0xff]  ;;  %v1216_v62 = vmul.f32 %v5042_v53, %v3773_v54  ;;  %v5043_v16 = vld [vmem:[#allocation15_spill] sm:$0xff]  ;;  %v5046_v54 = vld [vmem:[#allocation17_spill] sm:$0xff] }
 0x564   : > { %v1363_v48 = vadd.f32 %v1355_v46, %v1315_v55  ;;  %v1412_v50 = vadd.f32 %v1404_v17, %v1364_v4  ;;  %v1357_v25 = vmul.f32 %v5041_v12, %v3894_v38  ;;  %v1128_v20 = vadd.f32 %v1120_v32, %v1072_v34  ;;  %v5049_v34 = vld [vmem:[#allocation32_spill] sm:$0xff] }
 0x565   : > { %v1269_v46 = vadd.f32 %v1261_v19, %v1221_v58  ;;  %v1405_v61 = vmul.f32 %v5043_v16, %v3935_v47  ;;  %v1264_v19 = vmul.f32 %v5045_v42, %v3814_v18  ;;  %v1408_v8 = vmul.f32 %v5049_v34, %v3935_v47 }
 0x566   : > { %v1801_v40 = vpop.permute.xlu2 %1800  ;;  %v1411_v21 = vadd.f32 %v1403_v23, %v1363_v48  ;;  %v5044_v23 = vld [vmem:[#allocation85_spill] sm:$0xff]  ;;  %v1176_v2 = vadd.f32 %v1168_v44, %v1128_v20 }
 0x567   : > { %v1797_v5 = vpop.permute.xlu1 %1796  ;;  %v1822_v31 = vmul.f32 %v1801_v40, %v4169_v27  ;;  %2807 = vset.pattern.permute.xlu2 %v2919_v0  ;;  %v1317_v55 = vadd.f32 %v1309_v9, %v1269_v46  ;;  %v1774_v4 = vadd.f32 %v4180_v59, %v5044_v23  ;;  %v5047_v59 = vld [vmem:[#allocation28_spill] sm:$0xff] }
 0x568   : > { %v1821_v52 = vmul.f32 %v1797_v5, %v4169_v27  ;;  %v1909_v3 = vpop.permute.xlu0 %1908  ;;  %1980 = vperm.xlu2 %2807, %v3526_v39   ;;  %v1224_v10 = vadd.f32 %v1216_v62, %v1176_v2 }
 0x569   : > { %v1830_v30 = vadd.f32 %v1822_v31, %v1412_v50  ;;  %v1921_v60 = vmul.f32 %v1909_v3, %v4238_v63  ;;  %2810 = vset.pattern.permute.xlu1 %v2921_v14  ;;  %v1365_v48 = vadd.f32 %v1357_v25, %v1317_v55  ;;  %v4298_v31 = vmax.f32 %v1774_v4, 0.0 }
 0x56a   : > { %v1829_v17 = vadd.f32 %v1821_v52, %v1411_v21  ;;  %2036 = vperm.xlu1 %2810, %v3538_v7   ;;  %v1272_v18 = vadd.f32 %v1264_v19, %v1224_v10  ;;  %v5048_v21 = vld [vmem:[#allocation62_spill] sm:$0xff] }
 0x56b   : > { %v1929_v15 = vadd.f32 %v1921_v60, %v4224_v56  ;;  %v1312_v56 = vmul.f32 %v5046_v54, %v3855_v29  ;;  %v1413_v5 = vadd.f32 %v1405_v61, %v1365_v48  ;;  %v1360_v52 = vmul.f32 %v5048_v21, %v3894_v38 }
 0x56d   : > { %v1320_v29 = vadd.f32 %v1312_v56, %v1272_v18 }
 0x56e   : > { %v1809_v40 = vpop.permute.xlu2 %1808 }
 0x56f   : > { %v1805_v32 = vpop.permute.xlu1 %1804  ;;  %v1824_v50 = vmul.f32 %v1809_v40, %v4169_v27  ;;  %v1368_v60 = vadd.f32 %v1360_v52, %v1320_v29 }
 0x570   : > { %v1823_v58 = vmul.f32 %v1805_v32, %v4169_v27  ;;  %1992 = vperm.xlu2 %2807, %v3532_v49  }
 0x571   : > { %v1832_v11 = vadd.f32 %v1824_v50, %v5047_v59  ;;  %v1937_v9 = vpop.permute.xlu0 %1936  ;;  %v1416_v25 = vadd.f32 %v1408_v8, %v1368_v60 }
 0x572   : > { %v1831_v3 = vadd.f32 %v1823_v58, %v1413_v5  ;;  %v1964_v1 = vmul.f32 %v1937_v9, %v4298_v31  ;;  %2812 = vset.pattern.permute.xlu1 %v2922_v41 }
 0x573   : > { %2084 = vperm.xlu1 %2812, %v3538_v7  }
 0x574   : > { %v1972_v44 = vadd.f32 %v1964_v1, %v1924_v24  ;;  %v5050_v24 = vld [vmem:[#allocation84_spill] sm:$0xff] }
 0x575   : > { %v1775_v16 = vadd.f32 %v4213_v45, %v5050_v24  ;;  %v5052_v24 = vld [vmem:[#allocation87_spill] sm:$0xff] }
 0x577   : > { %v1817_v46 = vpop.permute.xlu1 %1816  ;;  %v1837_v12 = vpop.permute.xlu2 %1836  ;;  %v4320_v4 = vmax.f32 %v1775_v16, 0.0  ;;  %v1777_v16 = vadd.f32 %v4190_v13, %v5052_v24 }
 0x578   : > { %v1826_v20 = vmul.f32 %v1817_v46, %v4169_v27  ;;  %v1867_v38 = vmul.f32 %v1837_v12, %v4199_v28  ;;  %2000 = vperm.xlu2 %2807, %v3546_v57  }
 0x579   : > { %v1957_v53 = vpop.permute.xlu0 %1956 }
 0x57a   : > { %v1834_v62 = vadd.f32 %v1826_v20, %v1416_v25  ;;  %v1875_v55 = vadd.f32 %v1867_v38, %v4251_v43  ;;  %v1969_v7 = vmul.f32 %v1957_v53, %v4298_v31 }
 0x57b   : > { %2080 = vperm.xlu1 %2812, %v3540_v36  }
 0x57c   : > { %v1977_v47 = vadd.f32 %v1969_v7, %v1929_v15 }
 0x57f   : > { %v1849_v61 = vpop.permute.xlu2 %1848 }
 0x580   : > { %v1845_v23 = vpop.permute.xlu1 %1844  ;;  %v1870_v27 = vmul.f32 %v1849_v61, %v4199_v28  ;;  %2811 = vset.pattern.permute.xlu2 %v2921_v14 }
 0x581   : > { %v1869_v2 = vmul.f32 %v1845_v23, %v4199_v28  ;;  %2032 = vperm.xlu2 %2811, %v3540_v36  }
 0x582   : > { %v1878_v43 = vadd.f32 %v1870_v27, %v1830_v30  ;;  %v1985_v42 = vpop.permute.xlu0 %1984 }
 0x583   : > { %v1877_v19 = vadd.f32 %v1869_v2, %v1829_v17  ;;  %v2012_v15 = vmul.f32 %v1985_v42, %v4320_v4  ;;  %2076 = vperm.xlu1 %2812, %v3526_v39  }
 0x585   : > { %v4326_v45 = vadd.f32 %v2012_v15, %v1972_v44  ;;  %v5051_v44 = vld [vmem:[#allocation88_spill] sm:$0xff] }
 0x586   : > { %v1776_v60 = vadd.f32 %v4208_v35, %v5051_v44 }
 0x587   : > { %v1857_v48 = vpop.permute.xlu2 %1856 }
 0x588   : > { %v1853_v40 = vpop.permute.xlu1 %1852  ;;  %v1872_v10 = vmul.f32 %v1857_v48, %v4199_v28  ;;  %v4359_v38 = vmax.f32 %v1776_v60, 0.0 }
 0x589   : > { %v1871_v32 = vmul.f32 %v1853_v40, %v4199_v28  ;;  %2028 = vperm.xlu2 %2811, %v3526_v39  }
 0x58a   : > { %v1880_v50 = vadd.f32 %v1872_v10, %v1832_v11  ;;  %v2005_v54 = vpop.permute.xlu0 %2004 }
 0x58b   : > { %v1879_v56 = vadd.f32 %v1871_v32, %v1831_v3  ;;  %v2017_v30 = vmul.f32 %v2005_v54, %v4320_v4  ;;  %2817 = vset.pattern.permute.xlu1 %v2920_v22 }
 0x58c   : > { %2136 = vperm.xlu1 %2817, %v3532_v49  }
 0x58d   : > { %v2025_v17 = vadd.f32 %v2017_v30, %v1977_v47 }
 0x590   : > { %v1865_v5 = vpop.permute.xlu1 %1864  ;;  %v1885_v58 = vpop.permute.xlu2 %1884 }
 0x591   : > { %v1874_v59 = vmul.f32 %v1865_v5, %v4199_v28  ;;  %v1915_v9 = vmul.f32 %v1885_v58, %v4238_v63  ;;  %2813 = vset.pattern.permute.xlu2 %v2922_v41 }
 0x592   : > { %2088 = vperm.xlu2 %2813, %v3532_v49   ;;  %v4348_v49 = vld [vmem:[%s4712_s4] sm:$0xff] }
 0x593   : > { %v1882_v11 = vadd.f32 %v1874_v59, %v1834_v62  ;;  %v1923_v18 = vadd.f32 %v1915_v9, %v1875_v55  ;;  %v4338_v21 = vpop.permute.xlu0 %2132  ;;  %v329_v8 = vrot.slane %v4348_v49, 1  ;;  %v330_v35 = vrot.slane %v4348_v49, 2 }
 0x594   : > { %2124 = vperm.xlu1 %2817, %v3526_v39  }
 0x595   : > { %v2172_v20 = vperm.slane %v329_v8, 0  ;;  %v2173_v27 = vperm.slane %v330_v35, 0 }
 0x598   : > { %v1897_v52 = vpop.permute.xlu2 %1896 }
 0x599   : > { %v1893_v3 = vpop.permute.xlu1 %1892  ;;  %v1918_v1 = vmul.f32 %v1897_v52, %v4238_v63 }
 0x59a   : > { %v1917_v29 = vmul.f32 %v1893_v3, %v4238_v63  ;;  %2816 = vset.pattern.permute.xlu2 %v2920_v22 }
 0x59b   : > { %v1926_v28 = vadd.f32 %v1918_v1, %v1878_v43  ;;  %2128 = vperm.xlu2 %2816, %v3540_v36   ;;  %v4370_v43 = vmax.f32 %v1777_v16, 0.0 }
 0x59c   : > { %v1925_v34 = vadd.f32 %v1917_v29, %v1877_v19  ;;  %2820 = vset.pattern.permute.xlu1 %v2921_v14  ;;  %v4351_v39 = vpop.permute.xlu0 %2040 }
 0x59d   : > { %2044 = vperm.xlu1 %2820, %v3548_v26   ;;  %v2062_v60 = vmul.f32 %v4351_v39, %v4359_v38  ;;  %v2629_v39 = vld [vmem:[%s4713_s5 + $0xb8] sm:$0x1] }
 0x59e   : > { %2630 = vmatpush.msk.msra.mxu2 %vm2248_vm0, %v2629_v39 }
 0x5a0   : > { %v1905_v46 = vpop.permute.xlu2 %1904 }
 0x5a1   : > { %v1901_v12 = vpop.permute.xlu1 %1900  ;;  %v1920_v36 = vmul.f32 %v1905_v46, %v4238_v63 }
 0x5a2   : > { %v1919_v25 = vmul.f32 %v1901_v12, %v4238_v63 }
 0x5a3   : > { %v1928_v53 = vadd.f32 %v1920_v36, %v1880_v50  ;;  %2818 = vset.pattern.permute.xlu2 %v2919_v0 }
 0x5a4   : > { %v1927_v62 = vadd.f32 %v1919_v25, %v1879_v56  ;;  %v2053_v55 = vpop.permute.xlu0 %2052  ;;  %2008 = vperm.xlu2 %2818, %v3553_v6   ;;  %v331_v56 = vrot.slane %v4348_v49, 3 }
 0x5a5   : > { %v2065_v7 = vmul.f32 %v2053_v55, %v4359_v38  ;;  %2823 = vset.pattern.permute.xlu1 %v5022_v37 }
 0x5a6   : > { %2184 = vperm.xlu1 %2823, %v2172_v20   ;;  %v2174_v58 = vperm.slane %v331_v56, 0  ;;  %v2623_v56 = vld [vmem:[%s4713_s5 + $0x88] sm:$0xff] }
 0x5a7   : > { %v2073_v47 = vadd.f32 %v2065_v7, %v2025_v17 }
 0x5a9   : > { %v1913_v61 = vpop.permute.xlu1 %1912  ;;  %v1933_v23 = vpop.permute.xlu2 %1932 }
 0x5aa   : > { %v1922_v0 = vmul.f32 %v1913_v61, %v4238_v63  ;;  %v1963_v2 = vmul.f32 %v1933_v23, %v4298_v31 }
 0x5ac   : > { %v1930_v42 = vadd.f32 %v1922_v0, %v1882_v11  ;;  %v1971_v19 = vadd.f32 %v1963_v2, %v1923_v18  ;;  %2819 = vset.pattern.permute.xlu2 %v5022_v37  ;;  %v2626_v2 = vld [vmem:[%s4713_s5 + $0xa0] sm:$0xff] }
 0x5ad   : > { %v2101_v15 = vpop.permute.xlu0 %2100  ;;  %2188 = vperm.xlu2 %2819, %v2173_v27  }
 0x5ae   : > { %v2113_v48 = vmul.f32 %v2101_v15, %v4370_v43  ;;  %2825 = vset.pattern.permute.xlu1 %v2921_v14  ;;  %v333_v15 = vrot.slane %v4348_v49, 5 }
 0x5af   : > { %2048 = vperm.xlu1 %2825, %v3546_v57  }
 0x5b0   : > { %v4376_v13 = vadd.f32 %v2113_v48, %v2073_v47  ;;  %v332_v47 = vrot.slane %v4348_v49, 4  ;;  %v2625_v48 = vld [vmem:[%s4713_s5 + $0x98] sm:$0xff] }
 0x5b1   : > { %v1945_v40 = vpop.permute.xlu2 %1944 }
 0x5b2   : > { %v1941_v63 = vpop.permute.xlu1 %1940  ;;  %v1966_v10 = vmul.f32 %v1945_v40, %v4298_v31  ;;  %v2175_v0 = vperm.slane %v332_v47, 0 }
 0x5b3   : > { %v1965_v32 = vmul.f32 %v1941_v63, %v4298_v31 }
 0x5b4   : > { %v1974_v50 = vadd.f32 %v1966_v10, %v1926_v28  ;;  %v335_v28 = vrot.slane %v4348_v49, 7 }
 0x5b5   : > { %v1973_v54 = vadd.f32 %v1965_v32, %v1925_v34  ;;  %2821 = vset.pattern.permute.xlu2 %v2921_v14  ;;  %v334_v14 = vrot.slane %v4348_v49, 6 }
 0x5b6   : > { %2056 = vperm.xlu2 %2821, %v3553_v6   ;;  %v2178_v12 = vperm.slane %v335_v28, 0  ;;  %v2613_v28 = vld [vmem:[%s4713_s5 + $0x58] sm:$0xff] }
 0x5b7   : > { %2827 = vset.pattern.permute.xlu1 %v2920_v22  ;;  %v2177_v29 = vperm.slane %v334_v14, 0  ;;  %v2616_v14 = vld [vmem:[%s4713_s5 + $0x70] sm:$0xff] }
 0x5b8   : > { %2148 = vperm.xlu1 %2827, %v3535_v51  }
 0x5b9   : > { %v1953_v57 = vpop.permute.xlu2 %1952 }
 0x5ba   : > { %v1949_v30 = vpop.permute.xlu1 %1948  ;;  %v1968_v17 = vmul.f32 %v1953_v57, %v4298_v31 }
 0x5bb   : > { %v1967_v5 = vmul.f32 %v1949_v30, %v4298_v31  ;;  %v2622_v30 = vld [vmem:[%s4713_s5 + $0x80] sm:$0xff] }
 0x5bc   : > { %v1976_v59 = vadd.f32 %v1968_v17, %v1928_v53 }
 0x5bd   : > { %v1975_v9 = vadd.f32 %v1967_v5, %v1927_v62 }
 0x5be   : > { %2824 = vset.pattern.permute.xlu2 %v5022_v37 }
 0x5bf   : > { %2192 = vperm.xlu2 %2824, %v2174_v58  }
 0x5c0   : > { %2140 = vperm.xlu1 %2827, %v3548_v26  }
 0x5c2   : > { %v1961_v11 = vpop.permute.xlu1 %1960  ;;  %v1981_v18 = vpop.permute.xlu2 %1980 }
 0x5c3   : > { %v1970_v51 = vmul.f32 %v1961_v11, %v4298_v31  ;;  %v2011_v52 = vmul.f32 %v1981_v18, %v4320_v4  ;;  %v2639_v11 = vld [vmem:[%s4713_s5 + $0xf8] sm:$0x1] }
 0x5c4   : > { %2640 = vmatpush.msk.msra.mxu3 %vm2248_vm0, %v2639_v11  ;;  %v2646_v11 = vld [vmem:[%s4713_s5 + $0x120] sm:$0xff] }
 0x5c5   : > { %v4392_v3 = vadd.f32 %v1970_v51, %v1930_v42  ;;  %v2019_v1 = vadd.f32 %v2011_v52, %v1971_v19  ;;  %v5053_v42 = vld [vmem:[#allocation93_spill] sm:$0xff]  ;;  %v2638_v52 = vld [vmem:[%s4713_s5 + $0xf0] sm:$0xff] }
 0x5c6   : > { %v1778_v19 = vadd.f32 %v4246_v33, %v5053_v42  ;;  %v2615_v51 = vld [vmem:[%s4713_s5 + $0x68] sm:$0xff]  ;;  %2358 = vmatpush.msra.mxu3 %v2638_v52  ;;  %v2664_v52 = vld [vmem:[%s4713_s5 + $0x190] sm:$0xff] }
 0x5c7   : > { %2826 = vset.pattern.permute.xlu2 %v2922_v41  ;;  %v2171_v41 = vperm.slane %v4348_v49, 0 }
 0x5c8   : > { %2831 = vset.pattern.permute.xlu1 %v5022_v37  ;;  %2092 = vperm.xlu2 %2826, %v3548_v26   ;;  %v4437_v10 = vmax.f32 %v1778_v19, 0.0 }
 0x5c9   : > { %2204 = vperm.xlu1 %2831, %v2177_v29   ;;  %v2637_v29 = vld [vmem:[%s4713_s5 + $0xe8] sm:$0xff] }
 0x5ca   : > { %v1993_v34 = vpop.permute.xlu2 %1992  ;;  %v2157_v49 = vmul.f32 %v4338_v21, %v4437_v10  ;;  %v2617_v21 = vld [vmem:[%s4713_s5 + $0x78] sm:$0x1]  ;;  %2359 = vmatpush.msra.mxu3 %v2637_v29 }
 0x5cb   : > { %v1989_v8 = vpop.permute.xlu1 %1988  ;;  %v2014_v44 = vmul.f32 %v1993_v34, %v4320_v4  ;;  %2618 = vmatpush.msk.msra.mxu0 %vm2248_vm0, %v2617_v21  ;;  %v2636_v34 = vld [vmem:[%s4713_s5 + $0xe0] sm:$0xff]  ;;  %v2667_v21 = vld [vmem:[%s4713_s5 + $0x1a8] sm:$0xff] }
 0x5cc   : > { %v2013_v31 = vmul.f32 %v1989_v8, %v4320_v4  ;;  %2360 = vmatpush.msra.mxu3 %v2636_v34 }
 0x5cd   : > { %v2022_v46 = vadd.f32 %v2014_v44, %v1974_v50  ;;  %v2624_v50 = vld [vmem:[%s4713_s5 + $0x90] sm:$0xff]  ;;  %2261 = vmatpush.msra.mxu0 %v2616_v14  ;;  %v2679_v14 = vld [vmem:[%s4713_s5 + $0x1f8] sm:$0x1] }
 0x5ce   : > { %v2021_v36 = vadd.f32 %v2013_v31, %v1973_v54  ;;  %v2612_v31 = vld [vmem:[%s4713_s5 + $0x50] sm:$0xff] }
 0x5cf   : > { %v2070_v25 = vadd.f32 %v2062_v60, %v2022_v46  ;;  %2262 = vmatpush.msra.mxu0 %v2615_v51  ;;  %v2635_v60 = vld [vmem:[%s4713_s5 + $0xd8] sm:$0xff] }
 0x5d0   : > { %2828 = vset.pattern.permute.xlu2 %v5022_v37  ;;  %2361 = vmatpush.msra.mxu3 %v2635_v60 }
 0x5d1   : > { %2208 = vperm.xlu1 %2831, %v2178_v12   ;;  %2180 = vperm.xlu2 %2828, %v2171_v41  }
 0x5d2   : > { %v2001_v26 = vpop.permute.xlu2 %2000 }
 0x5d3   : > { %v1997_v20 = vpop.permute.xlu1 %1996  ;;  %v2016_v53 = vmul.f32 %v2001_v26, %v4320_v4  ;;  %v2634_v26 = vld [vmem:[%s4713_s5 + $0xd0] sm:$0xff] }
 0x5d4   : > { %v2015_v62 = vmul.f32 %v1997_v20, %v4320_v4  ;;  %2362 = vmatpush.msra.mxu3 %v2634_v26  ;;  %v2610_v20 = vld [vmem:[%s4713_s5 + $0x40] sm:$0xff] }
 0x5d5   : > { %v4406_v55 = vadd.f32 %v2016_v53, %v1976_v59  ;;  %v2633_v53 = vld [vmem:[%s4713_s5 + $0xc8] sm:$0xff]  ;;  %v2676_v26 = vld [vmem:[%s4713_s5 + $0x1e0] sm:$0xff] }
 0x5d6   : > { %v4408_v7 = vadd.f32 %v2015_v62, %v1975_v9  ;;  %2363 = vmatpush.msra.mxu3 %v2633_v53  ;;  %v2632_v62 = vld [vmem:[%s4713_s5 + $0xc0] sm:$0xff]  ;;  %v2657_v53 = vld [vmem:[%s4713_s5 + $0x168] sm:$0xff] }
 0x5d8   : > { %2364 = vmatpush.msra.mxu3 %v2632_v62  ;;  %v2675_v62 = vld [vmem:[%s4713_s5 + $0x1d8] sm:$0xff] }
 0x5d9   : > { %2829 = vset.pattern.permute.xlu2 %v2920_v22  ;;  %v2628_v22 = vld [vmem:[%s4713_s5 + $0xb0] sm:$0xff] }
 0x5da   : > { %2152 = vperm.xlu2 %2829, %v3553_v6   ;;  %2322 = vmatpush.msra.mxu2 %v2628_v22  ;;  %v2627_v6 = vld [vmem:[%s4713_s5 + $0xa8] sm:$0xff] }
 0x5db   : > { %v2033_v35 = vpop.permute.xlu2 %2032  ;;  %2680 = vmatpush.msk.msrb.mxu3 %vm2248_vm0, %v2679_v14 }
 0x5dc   : > { %v2037_v24 = vpop.permute.xlu1 %2036  ;;  %v2060_v16 = vmul.f32 %v2033_v35, %v4359_v38  ;;  %2323 = vmatpush.msra.mxu2 %v2627_v6 }
 0x5dd   : > { %v2061_v61 = vmul.f32 %v2037_v24, %v4359_v38 }
 0x5de   : > { %v2068_v23 = vadd.f32 %v2060_v16, %v4326_v45  ;;  %2324 = vmatpush.msra.mxu2 %v2626_v2  ;;  %v2230_v2 = vld [vmem:[%s4713_s5 + $0x18] sm:$0xff] }
 0x5df   : > { %v2069_v27 = vadd.f32 %v2061_v61, %v2021_v36 }
 0x5e0   : > { %2325 = vmatpush.msra.mxu2 %v2625_v48  ;;  %v2228_v48 = vld [vmem:[%s4713_s5 + $0x8] sm:$0xff] }
 0x5e2   : > { %2832 = vset.pattern.permute.xlu2 %v5022_v37  ;;  %v2176_v37 = vperm.slane %v333_v15, 0  ;;  %2326 = vmatpush.msra.mxu2 %v2624_v50  ;;  %v2229_v15 = vld [vmem:[%s4713_s5 + $0x10] sm:$0xff]  ;;  %v2669_v50 = vld [vmem:[%s4713_s5 + $0x1b8] sm:$0x1] }
 0x5e3   : > { %2196 = vperm.xlu2 %2832, %v2175_v0   ;;  %v2029_v45 = vpop.permute.xlu2 %2028  ;;  %v2232_v0 = vld [vmem:[%s4713_s5 + $0x28] sm:$0xff] }
 0x5e4   : > { %v2059_v40 = vmul.f32 %v2029_v45, %v4359_v38  ;;  %2327 = vmatpush.msra.mxu2 %v2623_v56  ;;  %v2668_v56 = vld [vmem:[%s4713_s5 + $0x1b0] sm:$0xff] }
 0x5e5   : > { %v2085_v63 = vpop.permute.xlu1 %2084 }
 0x5e6   : > { %v2067_v32 = vadd.f32 %v2059_v40, %v2019_v1  ;;  %v2109_v33 = vmul.f32 %v2085_v63, %v4370_v43  ;;  %2328 = vmatpush.msra.mxu2 %v2622_v30  ;;  %v2614_v1 = vld [vmem:[%s4713_s5 + $0x60] sm:$0xff]  ;;  %v2105_v63 = vpop.permute.xlu0 %2104 }
 0x5e7   : > { %2263 = vmatpush.msra.mxu0 %v2614_v1  ;;  %v2227_v40 = vld [vmem:[%s4713_s5] sm:$0xff] }
 0x5e8   : > { %v2117_v54 = vadd.f32 %v2109_v33, %v2069_v27  ;;  %v2233_v27 = vld [vmem:[%s4713_s5 + $0x30] sm:$0xff]  ;;  %2670 = vmatpush.msk.msrb.mxu2 %vm2248_vm0, %v2669_v50 }
 0x5e9   : > { %2264 = vmatpush.msra.mxu0 %v2613_v28 }
 0x5ea   : > { %v4448_v57 = vadd.f32 %v2157_v49, %v2117_v54  ;;  %2466 = vmatpush.msrb.mxu2 %v2668_v56 }
 0x5eb   : > { %2200 = vperm.xlu2 %2832, %v2176_v37   ;;  %2265 = vmatpush.msra.mxu0 %v2612_v31  ;;  %v2659_v31 = vld [vmem:[%s4713_s5 + $0x178] sm:$0x1] }
 0x5ec   : > { %v2089_v17 = vpop.permute.xlu2 %2088  ;;  %2467 = vmatpush.msrb.mxu2 %v2667_v21 }
 0x5ed   : > { %v2081_v5 = vpop.permute.xlu1 %2080  ;;  %v2110_v58 = vmul.f32 %v2089_v17, %v4370_v43  ;;  %v2649_v17 = vld [vmem:[%s4713_s5 + $0x138] sm:$0x1] }
 0x5ee   : > { %v2108_v59 = vmul.f32 %v2081_v5, %v4370_v43  ;;  %v2666_v5 = vld [vmem:[%s4713_s5 + $0x1a0] sm:$0xff]  ;;  %v2097_v1 = vpop.permute.xlu0 %2096 }
 0x5ef   : > { %v2118_v9 = vadd.f32 %v2110_v58, %v2070_v25  ;;  %v2611_v25 = vld [vmem:[%s4713_s5 + $0x48] sm:$0xff]  ;;  %2468 = vmatpush.msrb.mxu2 %v2666_v5 }
 0x5f0   : > { %v2116_v18 = vadd.f32 %v2108_v59, %v2068_v23  ;;  %2266 = vmatpush.msra.mxu0 %v2611_v25  ;;  %v2234_v23 = vld [vmem:[%s4713_s5 + $0x38] sm:$0x1]  ;;  %v2647_v58 = vld [vmem:[%s4713_s5 + $0x128] sm:$0xff]  ;;  %v2662_v25 = vld [vmem:[%s4713_s5 + $0x180] sm:$0xff] }
 0x5f1   : > { %2620 = vmatpush.msk.msra.mxu1 %vm2248_vm0, %v2234_v23 }
 0x5f2   : > { %2267 = vmatpush.msra.mxu0 %v2610_v20  ;;  %v2643_v20 = vld [vmem:[%s4713_s5 + $0x108] sm:$0xff] }
 0x5f3   : > { %2287 = vmatpush.msra.mxu1 %v2233_v27 }
 0x5f4   : > { %2650 = vmatpush.msk.msrb.mxu0 %vm2248_vm0, %v2649_v17 }
 0x5f5   : > { %v2077_v8 = vpop.permute.xlu1 %2076  ;;  %v2129_v44 = vpop.permute.xlu2 %2128  ;;  %2288 = vmatpush.msra.mxu1 %v2232_v0  ;;  %v2655_v0 = vld [vmem:[%s4713_s5 + $0x158] sm:$0xff] }
 0x5f6   : > { %v2107_v46 = vmul.f32 %v2077_v8, %v4370_v43  ;;  %v2156_v12 = vmul.f32 %v2129_v44, %v4437_v10  ;;  %v2645_v44 = vld [vmem:[%s4713_s5 + $0x118] sm:$0xff]  ;;  %v2145_v23 = vpop.permute.xlu0 %2144 }
 0x5f8   : > { %v2115_v41 = vadd.f32 %v2107_v46, %v2067_v32  ;;  %v4492_v36 = vadd.f32 %v2156_v12, %v2116_v18  ;;  %v2678_v18 = vld [vmem:[%s4713_s5 + $0x1f0] sm:$0xff]  ;;  %v2663_v46 = vld [vmem:[%s4713_s5 + $0x188] sm:$0xff] }
 0x5f9   : > { %2502 = vmatpush.msrb.mxu3 %v2678_v18  ;;  %v2677_v12 = vld [vmem:[%s4713_s5 + $0x1e8] sm:$0xff] }
 0x5fb   : > { %2503 = vmatpush.msrb.mxu3 %v2677_v12 }
 0x5fd   : > { %2504 = vmatpush.msrb.mxu3 %v2676_v26 }
 0x5fe   : > { %v2137_v39 = vpop.permute.xlu1 %2136  ;;  %v2009_v35 = vpop.permute.xlu2 %2008 }
 0x5ff   : > { %v2158_v47 = vmul.f32 %v2137_v39, %v4437_v10  ;;  %v2018_v24 = vmul.f32 %v2009_v35, %v4320_v4  ;;  %v2231_v4 = vld [vmem:[%s4713_s5 + $0x20] sm:$0xff]  ;;  %2505 = vmatpush.msrb.mxu3 %v2675_v62 }
 0x600   : > { %2289 = vmatpush.msra.mxu1 %v2231_v4  ;;  %v2642_v39 = vld [vmem:[%s4713_s5 + $0x100] sm:$0xff]  ;;  %v2112_v4 = vmul.f32 %v2097_v1, %v4370_v43 }
 0x601   : > { %v2026_v16 = vadd.f32 %v2018_v24, %v4392_v3  ;;  %v2166_v61 = vadd.f32 %v2158_v47, %v2118_v9  ;;  %v2665_v9 = vld [vmem:[%s4713_s5 + $0x198] sm:$0xff]  ;;  %v2656_v35 = vld [vmem:[%s4713_s5 + $0x160] sm:$0xff] }
 0x602   : > { %2290 = vmatpush.msra.mxu1 %v2230_v2  ;;  %2469 = vmatpush.msrb.mxu2 %v2665_v9  ;;  %v2160_v2 = vmul.f32 %v2145_v23, %v4437_v10 }
 0x604   : > { %2291 = vmatpush.msra.mxu1 %v2229_v15  ;;  %2470 = vmatpush.msrb.mxu2 %v2664_v52  ;;  %v2652_v15 = vld [vmem:[%s4713_s5 + $0x140] sm:$0xff] }
 0x606   : > { %v2125_v3 = vpop.permute.xlu1 %2124  ;;  %2292 = vmatpush.msra.mxu1 %v2228_v48  ;;  %2471 = vmatpush.msrb.mxu2 %v2663_v46 }
 0x607   : > { %v2155_v22 = vmul.f32 %v2125_v3, %v4437_v10  ;;  %v2189_v6 = vpop.permute.xlu2 %2188 }
 0x608   : > { %v2213_v42 = vadd.f32 %v2189_v6, %v4448_v57  ;;  %2293 = vmatpush.msra.mxu1 %v2227_v40  ;;  %v2114_v57 = vmul.f32 %v2105_v63, %v4370_v43  ;;  %2472 = vmatpush.msrb.mxu2 %v2662_v25  ;;  %v2654_v6 = vld [vmem:[%s4713_s5 + $0x150] sm:$0xff] }
 0x609   : > { %v4530_v19 = vadd.f32 %v2155_v22, %v2115_v41  ;;  %v2644_v41 = vld [vmem:[%s4713_s5 + $0x110] sm:$0xff] }
 0x60a   : > { %v2221_v45 = vmax.f32 %v2213_v42, 0.0  ;;  %2660 = vmatpush.msk.msrb.mxu1 %vm2248_vm0, %v2659_v31 }
 0x60c   : > { %2631 = vmatmul.msk.f32.vlgmr.msra.gmra.mxu2 %vm2244_vm1, %v2221_v45 }
 0x60f   : > { %v2045_v32 = vpop.permute.xlu1 %2044 }
 0x610   : > { %v2063_v33 = vmul.f32 %v2045_v32, %v4359_v38  ;;  %v2057_v37 = vpop.permute.xlu2 %2056 }
 0x611   : > { %v2066_v49 = vmul.f32 %v2057_v37, %v4359_v38 }
 0x612   : > { %v4549_v54 = vadd.f32 %v2063_v33, %v4408_v7  ;;  %v2648_v7 = vld [vmem:[%s4713_s5 + $0x130] sm:$0xff] }
 0x613   : > { %v2074_v30 = vadd.f32 %v2066_v49, %v2026_v16  ;;  %2394 = vmatpush.msrb.mxu0 %v2648_v7 }
 0x615   : > { %v4571_v59 = vadd.f32 %v2114_v57, %v2074_v30  ;;  %2395 = vmatpush.msrb.mxu0 %v2647_v58 }
 0x617   : > { %2396 = vmatpush.msrb.mxu0 %v2646_v11 }
 0x618   : > { %v2185_v51 = vpop.permute.xlu1 %2184 }
 0x619   : > { %v2212_v29 = vadd.f32 %v2185_v51, %v4492_v36  ;;  %v2193_v28 = vpop.permute.xlu2 %2192  ;;  %2397 = vmatpush.msrb.mxu0 %v2645_v44  ;;  %v2658_v36 = vld [vmem:[%s4713_s5 + $0x170] sm:$0xff] }
 0x61a   : > { %v2214_v34 = vadd.f32 %v2193_v28, %v2166_v61  ;;  %2430 = vmatpush.msrb.mxu1 %v2658_v36  ;;  %v2674_v61 = vld [vmem:[%s4713_s5 + $0x1d0] sm:$0xff] }
 0x61b   : > { %v2220_v8 = vmax.f32 %v2212_v29, 0.0  ;;  %2398 = vmatpush.msrb.mxu0 %v2644_v41  ;;  %2506 = vmatpush.msrb.mxu3 %v2674_v61  ;;  %v2834_v41 = vld [vmem:[%s4714_s6] ss:$0 sm:$0xff] }
 0x61c   : > { %v2222_v60 = vmax.f32 %v2214_v34, 0.0  ;;  %2431 = vmatpush.msrb.mxu1 %v2657_v53 }
 0x61d   : > { %2619 = vmatmul.msk.f32.vlgmr.msra.gmra.mxu0 %vm2244_vm1, %v2220_v8 }
 0x61e   : > { %2641 = vmatmul.msk.f32.vlgmr.msra.gmra.mxu3 %vm2244_vm1, %v2222_v60  ;;  %2399 = vmatpush.msrb.mxu0 %v2643_v20 }
 0x61f   : > { %2432 = vmatpush.msrb.mxu1 %v2656_v35 }
 0x620   : > { %2400 = vmatpush.msrb.mxu0 %v2642_v39 }
 0x621   : > { %v2049_v47 = vpop.permute.xlu1 %2048  ;;  %2433 = vmatpush.msrb.mxu1 %v2655_v0 }
 0x622   : > { %v2064_v24 = vmul.f32 %v2049_v47, %v4359_v38  ;;  %v2093_v16 = vpop.permute.xlu2 %2092  ;;  %v2673_v38 = vld [vmem:[%s4713_s5 + $0x1c8] sm:$0xff] }
 0x623   : > { %v2111_v27 = vmul.f32 %v2093_v16, %v4370_v43  ;;  %v2672_v43 = vld [vmem:[%s4713_s5 + $0x1c0] sm:$0xff]  ;;  %2507 = vmatpush.msrb.mxu3 %v2673_v38  ;;  %2434 = vmatpush.msrb.mxu1 %v2654_v6 }
 0x624   : > { %v2072_v3 = vadd.f32 %v2064_v24, %v4406_v55  ;;  %v2653_v55 = vld [vmem:[%s4713_s5 + $0x148] sm:$0xff] }
 0x625   : > { %v2119_v22 = vadd.f32 %v2111_v27, %v4549_v54  ;;  %2508 = vmatpush.msrb.mxu3 %v2672_v43  ;;  %2435 = vmatpush.msrb.mxu1 %v2653_v55 }
 0x626   : > { %v2120_v42 = vadd.f32 %v2112_v4, %v2072_v3 }
 0x627   : > { %2436 = vmatpush.msrb.mxu1 %v2652_v15 }
 0x628   : > { %v2168_v45 = vadd.f32 %v2160_v2, %v2120_v42 }
 0x62a   : > { %v2149_v48 = vpop.permute.xlu1 %2148 }
 0x62b   : > { %v2161_v40 = vmul.f32 %v2149_v48, %v4437_v10  ;;  %v2181_v63 = vpop.permute.xlu2 %2180 }
 0x62c   : > { %v2211_v32 = vadd.f32 %v2181_v63, %v4530_v19 }
 0x62d   : > { %v2169_v33 = vadd.f32 %v2161_v40, %v4376_v13 }
 0x62e   : > { %v2219_v37 = vmax.f32 %v2211_v32, 0.0 }
 0x630   : > { %2621 = vmatmul.msk.f32.vlgmr.msra.gmra.mxu1 %vm2244_vm1, %v2219_v37 }
 0x632   : > { %v2141_v50 = vpop.permute.xlu1 %2140 }
 0x633   : > { %v2159_v49 = vmul.f32 %v2141_v50, %v4437_v10 }
 0x634   : > { %v2153_v54 = vpop.permute.xlu2 %2152 }
 0x635   : > { %v2162_v56 = vmul.f32 %v2153_v54, %v4437_v10  ;;  %v2167_v57 = vadd.f32 %v2159_v49, %v2119_v22 }
 0x637   : > { %v2170_v30 = vadd.f32 %v2162_v56, %v4571_v59 }
 0x63b   : > { %v2205_v17 = vpop.permute.xlu1 %2204 }
 0x63c   : > { %v2217_v21 = vadd.f32 %v2205_v17, %v2169_v33 }
 0x63d   : > { %v2197_v7 = vpop.permute.xlu2 %2196 }
 0x63e   : > { %v2225_v5 = vmax.f32 %v2217_v21, 0.0  ;;  %v2215_v58 = vadd.f32 %v2197_v7, %v2167_v57 }
 0x640   : > { %v2223_v19 = vmax.f32 %v2215_v58, 0.0  ;;  %2671 = vmatmul.msk.f32.vlgmr.msrb.gmra.mxu2 %vm2244_vm1, %v2225_v5 }
 0x642   : > { %2651 = vmatmul.msk.f32.vlgmr.msrb.gmra.mxu0 %vm2244_vm1, %v2223_v19 }
 0x643   : > { %v2209_v13 = vpop.permute.xlu1 %2208 }
 0x644   : > { %v2218_v9 = vadd.f32 %v2209_v13, %v2170_v30 }
 0x645   : > { %v2201_v14 = vpop.permute.xlu2 %2200 }
 0x646   : > { %v2226_v11 = vmax.f32 %v2218_v9, 0.0  ;;  %v2216_v10 = vadd.f32 %v2201_v14, %v2168_v45 }
 0x648   : > { %v2224_v18 = vmax.f32 %v2216_v10, 0.0  ;;  %2681 = vmatmul.msk.f32.vlgmr.msrb.gmra.mxu3 %vm2244_vm1, %v2226_v11 }
 0x64a   : > { %2661 = vmatmul.msk.f32.vlgmr.msrb.gmra.mxu1 %vm2244_vm1, %v2224_v18 }
 0x68f   : > { %v2330_v1 = vpop.f32.mrf.mxu2 }
 0x69a   : > { %v2269_v51 = vpop.f32.mrf.mxu0 }
 0x6a1   : > { %v2366_v28 = vpop.f32.mrf.mxu3 }
 0x6ad   : > { %v2295_v59 = vpop.f32.mrf.mxu1 }
 0x6ae   : > { %v2296_v52 = vadd.f32 %v2295_v59, %v2269_v51 }
 0x6b0   : > { %v2333_v29 = vadd.f32 %v2330_v1, %v2296_v52 }
 0x6b2   : > { %v2369_v8 = vadd.f32 %v2366_v28, %v2333_v29 }
 0x6bf   : > { %v2402_v34 = vpop.f32.mrf.mxu0 }
 0x6c0   : > { %v2405_v44 = vadd.f32 %v2402_v34, %v2369_v8 }
 0x6c3   : > { %v2474_v46 = vpop.f32.mrf.mxu2 }
 0x6c7   : > { %v2438_v31 = vpop.f32.mrf.mxu1 }
 0x6c8   : > { %v2441_v60 = vadd.f32 %v2438_v31, %v2405_v44 }
 0x6ca   : > { %v2477_v12 = vadd.f32 %v2474_v46, %v2441_v60 }
 0x6cb   : > { %v2510_v36 = vpop.f32.mrf.mxu3 }
 0x6cc   : > { %v2513_v25 = vadd.f32 %v2510_v36, %v2477_v12 }
 0x6ce   : > { %v2518_v26 = vadd.f32 %v2834_v41, %v2513_v25 }
 0x6d0   : > { %2519 = vst [vmem:[%s315_s16] sm:$0xff] %v2518_v26 }
 0x6d1   : > { %2863 = shalt.err (!%p2860_p5)
}
 0x6d2   : > { %2686 = dma.vmem_to_hbm [thread:$0]  (%p3001_p6), %s2534_s17, 128, %s2536_s18, %s2521_s28  }
 0x6d3 PF: > { %s2547_s22 = sand.u32 1, %s2886_s24   ;;  %p2689_p7 = pnand %p2603_p9, %p3005_p8 }
 0x6d4   : > { %s2548_s13 = scalar_lea.sflag [#allocation4], %s2547_s22 }
 0x6d5   : > { %p2690_p10 = pneg %p2689_p7 }
 0x6d7   : > { %2881 = dma.done.wait (%p2690_p10), %s2548_s13, 128  }
 0x6d8   : > { %2883 = vsyncadd (%p2690_p10), %s2548_s13, 4294967168  ;;  %p17_p11 = scmp.ge.s32.totalorder %s2986_s30, 4   ;;  %s5054_s24 = smov %s2890_s25 }
 0x6d9   : > { %s5055_s25 = smov %s2894_s26  ;;  %s5056_s26 = smov %s2999_s10 }
 0x6da   : > { %s5057_s27 = smov %s2986_s30  ;;  %19 = sbr.rel (!%p17_p11) target bundleno = 3 (0x3), region = 134 }
 0x6df   :  { %2554 = vsyncpa [#allocation4], 1 }
 0x6e0   :  { %2556 = vsyncpa [#allocation4 + $0x1], 1 }

</bundles_post_ra>
